<compile_context>
chip_gen: v7x
topology: tpu7x:2x2x1
jax: 0.10.0
libtpu: 0.0.40
codegen_flags: <defaults>
</compile_context>

<pallas_src>
import functools

import jax
import jax.numpy as jnp
from jax.experimental import pallas as pl
from jax.experimental.pallas import tpu as pltpu


def _relu_conv1x1_kernel(x_ref, w_ref, o_ref, *, mxu_dtype):
    # x_ref: (1, C_in, THW) f32 activation tile (C_in on sublanes, pixels on lanes)
    # w_ref: (C_out, C_in)  conv weight, already cast to mxu_dtype, resident
    # o_ref: (1, C_out, THW) f32 output tile (lane-dense, multiple of 128)
    #
    # NOTE on the clipped last pixel tile: its pad lanes hold stale VMEM data
    # that flows through ReLU + matmul.  This is safe -- each output column
    # depends only on its own input column and the clipped store drops the pad
    # columns -- so do NOT "fix" it with masking.
    x = jnp.maximum(x_ref[0], jnp.zeros((), x_ref.dtype))          # fused ReLU
    o_ref[0] = jnp.dot(
        w_ref[...], x.astype(mxu_dtype), preferred_element_type=jnp.float32
    ).astype(o_ref.dtype)


def relu_conv1x1(
    x_nchw: jax.Array,
    w_conv: jax.Array,
    *,
    thw: int = 896,            # 7*128: 4 steps for 56x56 with minimal pad columns
    use_bf16_mxu: bool = True, # bf16 operands, f32 accumulation on the MXU
    input_buffers: int = 3,    # activation-stream pipeline depth
) -> jax.Array:
    """ReLU followed by a bias-free 1x1 conv (stride 1), NCHW in / NCHW out.

    x_nchw: (N, C_in, H, W)
    w_conv: (C_out, C_in, 1, 1)  -- PyTorch Conv2d weight layout
    returns (N, C_out, H, W), same dtype as x_nchw
    """
    n, c_in, h, w = x_nchw.shape
    c_out, c_in_w, kh, kw = w_conv.shape
    assert (c_in_w, kh, kw) == (c_in, 1, 1)

    hw = h * w
    # Free reshapes (contiguous dims only, no data movement):
    #   NCHW -> (N, C_in, H*W);   (C_out, C_in, 1, 1) -> (C_out, C_in)
    x3 = x_nchw.reshape(n, c_in, hw)
    mxu_dtype = jnp.bfloat16 if use_bf16_mxu else x_nchw.dtype
    w_mat = w_conv.reshape(c_out, c_in).astype(mxu_dtype)   # cast once, outside kernel

    # Pixel tile: multiple of 128 lanes, clamped to one (128-padded) pixel row,
    # and capped at 2048 so larger H*W reuses stay inside v7x's 64 MiB VMEM.
    # At thw=896 / f32: 3 x in-tile (2.6 MiB) + 2 x out-tile (1.75 MiB) +
    # 1 x bf16 weight (0.13 MiB) ~= 4.5 MiB -> fits the 16 MiB v5e scoped default.
    thw = max(128, min(int(thw), 2048, pl.cdiv(hw, 128) * 128))
    assert thw % 128 == 0
    num_hw_tiles = pl.cdiv(hw, thw)   # last block may be partial; writes are clipped

    x_item = jnp.dtype(x_nchw.dtype).itemsize
    w_item = jnp.dtype(mxu_dtype).itemsize
    cost = pl.CostEstimate(
        flops=2 * n * hw * c_in * c_out,
        transcendentals=0,
        bytes_accessed=(n * c_in * hw + n * c_out * hw) * x_item
        + c_in * c_out * w_item,
    )

    kernel = functools.partial(_relu_conv1x1_kernel, mxu_dtype=mxu_dtype)

    def _spec(shape, index_map, mode):
        if mode is None:
            return pl.BlockSpec(shape, index_map)
        try:
            return pl.BlockSpec(shape, index_map, pipeline_mode=mode)
        except TypeError:   # JAX version without pipeline_mode on BlockSpec
            return pl.BlockSpec(shape, index_map)

    def run(with_buffering: bool):
        act_mode = pl.Buffered(input_buffers) if with_buffering else None
        w_mode = pl.Buffered(1) if with_buffering else None
        return pl.pallas_call(
            kernel,
            out_shape=jax.ShapeDtypeStruct((n, c_out, hw), x_nchw.dtype),
            grid_spec=pltpu.PrefetchScalarGridSpec(
                num_scalar_prefetch=0,
                grid=(n, num_hw_tiles),
                in_specs=[
                    # Activation stream: deeper buffering hides the first-tile
                    # DMA (biggest relative win on v7x's ~2 us HBM roofline).
                    _spec((1, c_in, thw), lambda b, j: (b, 0, j), act_mode),
                    # Constant block index -> fetched once, kept resident; a
                    # single buffer is enough (no re-DMA ever happens).
                    _spec((c_out, c_in), lambda b, j: (0, 0), w_mode),
                ],
                out_specs=pl.BlockSpec((1, c_out, thw), lambda b, j: (b, 0, j)),
            ),
            compiler_params=pltpu.CompilerParams(
                dimension_semantics=("parallel", "parallel"),
            ),
            cost_estimate=cost,
        )(x3, w_mat)

    try:
        out3 = run(True)
    except Exception:
        # TODO(synk): drop this fallback once pl.Buffered pipeline_mode is
        # confirmed supported on the deployment JAX/Mosaic version.
        out3 = run(False)

    # Free reshape back to NCHW.
    return out3.reshape(n, c_out, h, w)


def _reference(x_nchw, w_conv, *, operand_dtype=jnp.float32):
    x = jnp.maximum(x_nchw, 0.0).astype(operand_dtype)
    w2 = w_conv.reshape(w_conv.shape[0], w_conv.shape[1]).astype(operand_dtype)
    prec = jax.lax.Precision.HIGHEST if operand_dtype == jnp.float32 else None
    return jnp.einsum(
        "nchw,oc->nohw", x, w2,
        preferred_element_type=jnp.float32, precision=prec,
    )


if __name__ == "__main__":
    # Module spec shape: (1, 256, 56, 56); channels must be 256 to match
    # Conv2d(256, 256, 1).  H*W = 3136 also exercises the clipped-tile path.
    key = jax.random.PRNGKey(0)
    kx, kw_ = jax.random.split(key)

    N, C, H, W = 1, 256, 56, 56
    x = jax.random.normal(kx, (N, C, H, W), dtype=jnp.float32)
    # Deterministic synthetic conv weight (C_out, C_in, 1, 1)
    wgt = (jax.random.normal(kw_, (256, 256, 1, 1), dtype=jnp.float32)
           * (1.0 / jnp.sqrt(256.0)))

    out = jax.block_until_ready(relu_conv1x1(x, wgt))
    assert out.shape == (N, 256, H, W), out.shape
    assert out.dtype == jnp.float32, out.dtype

    # Tight check against a reference using the same bf16 operands / f32 acc.
    ref_bf16 = _reference(x, wgt, operand_dtype=jnp.bfloat16)
    assert jnp.allclose(out, ref_bf16, atol=1e-2, rtol=1e-2), \
        "mismatch vs bf16-operand reference"

    # Loose sanity check against the full-f32 reference (bf16 operands over a
    # K=256 contraction carry ~4e-3 relative error, so the old 1e-3 tolerance
    # no longer applies).
    ref_f32 = _reference(x, wgt, operand_dtype=jnp.float32)
    assert jnp.allclose(out, ref_f32, atol=5e-2, rtol=5e-2), \
        "mismatch vs f32 reference"

    print("KERNEL_OK")
</pallas_src>

<mosaic_0001>
module attributes {stable_mosaic.version = 11 : i64} {
  func.func @_relu_conv1x1_kernel(%arg0: i32, %arg1: i32, %arg2: memref<1x256x896xf32, #tpu.memory_space<vmem>>, %arg3: memref<256x256xbf16, #tpu.memory_space<vmem>>, %arg4: memref<1x256x896xf32, #tpu.memory_space<vmem>>) attributes {dimension_semantics = [#tpu.dimension_semantics<parallel>, #tpu.dimension_semantics<parallel>], iteration_bounds = array<i64: 1, 4>, scalar_prefetch = 0 : i64, scratch_operands = 0 : i64, tpu.core_type = #tpu.core_type<tc>, window_params = [{transform_indices = @transform_0, window_bounds = array<i64: 1, 256, 896>}, {pipeline_mode = #tpu.pipeline_mode<synchronous>, transform_indices = @transform_1, window_bounds = array<i64: 256, 256>}, {transform_indices = @transform_2, window_bounds = array<i64: 1, 256, 896>}]} {
    %c0 = arith.constant 0 : index
    %c0_0 = arith.constant 0 : index
    %c0_1 = arith.constant 0 : index
    %0 = vector.load %arg2[%c0, %c0_0, %c0_1] : memref<1x256x896xf32, #tpu.memory_space<vmem>>, vector<1x256x896xf32>
    %1 = vector.shape_cast %0 : vector<1x256x896xf32> to vector<256x896xf32>
    %cst = arith.constant 0.000000e+00 : f32
    %2 = vector.broadcast %cst : f32 to vector<256x896xf32>
    %3 = arith.maximumf %1, %2 : vector<256x896xf32>
    %c0_2 = arith.constant 0 : index
    %c0_3 = arith.constant 0 : index
    %4 = vector.load %arg3[%c0_2, %c0_3] : memref<256x256xbf16, #tpu.memory_space<vmem>>, vector<256x256xbf16>
    %5 = arith.truncf %3 : vector<256x896xf32> to vector<256x896xbf16>
    %cst_4 = arith.constant dense<0.000000e+00> : vector<256x896xf32>
    %6 = tpu.matmul %4, %5, %cst_4 {dimension_numbers = #tpu.dot_dimension_numbers<[1], [0], [0], [1], [0, 0, 1, 1], [], []>} : vector<256x256xbf16>, vector<256x896xbf16>, vector<256x896xf32> -> vector<256x896xf32>
    %c0_5 = arith.constant 0 : index
    %c0_6 = arith.constant 0 : index
    %c0_7 = arith.constant 0 : index
    %7 = vector.load %arg4[%c0_5, %c0_6, %c0_7] : memref<1x256x896xf32, #tpu.memory_space<vmem>>, vector<1x256x896xf32>
    %8 = vector.shape_cast %7 : vector<1x256x896xf32> to vector<256x896xf32>
    %9 = vector.shape_cast %6 : vector<256x896xf32> to vector<1x256x896xf32>
    tpu.vector_store %arg4[%c0_5, %c0_6, %c0_7], %9 {strides = array<i32>} : memref<1x256x896xf32, #tpu.memory_space<vmem>>, vector<1x256x896xf32>,
    return
  }
  func.func @transform_0(%arg0: i32, %arg1: i32) -> (i32, i32, i32) {
    %c0_i32 = arith.constant 0 : i32
    %c0_i32_0 = arith.constant 0 : i32
    return %arg0, %c0_i32, %arg1 : i32, i32, i32
  }
  func.func @transform_1(%arg0: i32, %arg1: i32) -> (i32, i32) {
    %c0_i32 = arith.constant 0 : i32
    %c0_i32_0 = arith.constant 0 : i32
    %c0_i32_1 = arith.constant 0 : i32
    return %c0_i32, %c0_i32_0 : i32, i32
  }
  func.func @transform_2(%arg0: i32, %arg1: i32) -> (i32, i32, i32) {
    %c0_i32 = arith.constant 0 : i32
    %c0_i32_0 = arith.constant 0 : i32
    return %arg0, %c0_i32, %arg1 : i32, i32, i32
  }
}

</mosaic_0001>

<bundles_post_ra>
// kernel: tpu_custom_call.1
= control target key start
LH: loop header
LB: loop body
LE: loop exit
PB: predicated region body
PF: predicated region fallthrough
CT: control target
= control target key end

     0   :  { %s4320_s9 = smov 0   ;;  %s4322_s10 = smov 0   ;;  %s6873_s0 = inlined_call_operand.vmem [shape: f32[1,256,3136], index: 0, kind: input, shape index: {}]   ;;  %s6874_s1 = inlined_call_operand.vmem [shape: bf16[256,256], index: 1, kind: input, shape index: {}]   ;;  %s6875_s2 = inlined_call_operand.vmem [shape: f32[1,256,3136], index: 2, kind: output, shape index: {}]  }
   0x1   :  { %s4324_s11 = smov 0   ;;  %s4326_s12 = smov 0  }
   0x2   :  { %s4328_s13 = smov 0  }
   0x3 LB: > { %s21_s14 = sadd.s32 1, %s4167_s12  ;;  %s3441_s15 = sadd.s32 4294967295, %s4171_s13   ;;  %s4171_s13 = sphi %s4328_s13, %s12_s13   ;;  %s4167_s12 = sphi %s4326_s12, %s6920_s12   ;;  %s4163_s11 = sphi %s4324_s11, %s6919_s11   ;;  %s4159_s10 = sphi %s4322_s10, %s6918_s10   ;;  %s4155_s9 = sphi %s4320_s9, %s6917_s9  }
   0x4   : > { %p22_p0 = scmp.ge.s32.totalorder %s21_s14, 4  ;;  %p40_p1 = scmp.ne.s32.totalorder %s4159_s10, %s4155_s9 }
   0x5   : > { %p41_p2 = scmp.eq.s32.totalorder %s4171_s13, 0  ;;  %p93_p4 = scmp.eq.s32.totalorder %s3441_s15, 3 }
   0x6   : > { %s6922_s14 = smov (%p22_p0, %s21_s14), 0  ;;  %s33_s17 = sadd.s32 1, %s4159_s10 }
   0x7   : > { %p42_p3 = por %p41_p2, %p40_p1  ;;  %s29_s16 = ssub.s32 %s4167_s12, %s6922_s14 }
   0x8   : > { %p31_p5 = scmp.eq.s32.totalorder %s29_s16, 0  ;;  %p4355_p6 = por %p93_p4, %p40_p1 }
   0x9   : > { %p3444_p7 = scmp.ge.s32.totalorder %s4171_s13, 4 }
   0xa   : > { %s4360_s19 = scalar_select %p31_p5, %s4159_s10, %s33_s17  }
   0xb   : > { %118 = sbr.rel (%p3444_p7) target bundleno = 240 (0xf0), region = 20 }
  0x12   : > { %121 = sbr.rel (!%p42_p3) target bundleno = 240 (0xf0), region = 24  ;;  %s123_s20 = sand.u32 (%p42_p3), 1, %s4159_s10  }
  0x13   : > { %s126_s21 = smul.u32 (%p42_p3), 7, %s4167_s12 }
  0x14   : > { %s3652_s22 = smul.u32 (%p42_p3), 1792, %s123_s20 }
  0x15   : > { %s127_s23 = ssub.s32 (%p42_p3), 25, %s126_s21  ;;  %s3530_s24 = smul.u32 (%p42_p3), 56, %s4167_s12 }
  0x16   : > { %p128_p8 = scmp.lt.s32.totalorder (%p42_p3), %s127_s23, 7  ;;  %s4373_s30 = scalar_lea.vmem (%p42_p3), [#allocation2], %s3652_s22  }
  0x17   : > { %s4369_s27 = scalar_lea.vmem (%p42_p3), %s6873_s0, %s3530_s24  }
  0x19   : > { %s6924_s23 = smov (!%p128_p8, %s127_s23), 7 }
  0x1a   : > { %s3445_s28 = sshll.u32 %s6924_s23, 12  ;;  %s4371_s29 = sshll.u32 %s6924_s23, 3 }
  0x1b   : > { %p3449_p9 = scmp.eq.s32.totalorder %s3445_s28, 0 }
  0x1c   : > { %p140_p10 = scmp.lt.u32.totalorder (!%p3449_p9), %s4371_s29, 8 }
  0x1d   : > { %139 = sbr.rel (%p3449_p9) target bundleno = 240 (0xf0), region = 28 }
  0x24   : > { %143 = sbr.rel (%p140_p10) target bundleno = 205 (0xcd), region = 32  ;;  %s4377_s3 = sand.u32 (!%p140_p10), 7, %s4371_s29  }
  0x25   : > { %p221_p11 = scmp.eq.s32.totalorder (!%p140_p10), %s4377_s3, 0  ;;  %p3450_p12 = scmp.ne.s32.totalorder (!%p140_p10), %s4377_s3, 0 }
  0x2b   : > { %224 = sbr.rel (%p3450_p12) target bundleno = 107 (0x6b), region = 47  ;;  %s225_s4 = sshrl.u32 (!%p3450_p12), %s4371_s29, 3 }
  0x2c   : > { %s4384_s5 = sshrl.u32 (!%p3450_p12), %s225_s4, 1  ;;  %s6877_s6 = smov (!%p3450_p12), %s4373_s30 }
  0x2d   : > { %s6878_s7 = smov (!%p3450_p12), %s4369_s27  ;;  %s4392_s8 = smov (!%p3450_p12), 0  }
  0x2e   : > { %s4394_s15 = smov (!%p3450_p12), 0  }
  0x32 LB: >> { %v238_v0 = vld [vmem:[%s4179_s7] sm:$0xff]  ;;  %v240_v1 = vld [vmem:[%s4179_s7 + $0x8] sm:$0xff]  ;;  %s366_s16 = sadd.s32 1, %s4183_s8  ;;  %v244_v3 = vld [vmem:[%s4179_s7 + $0xd0] sm:$0xff]  ;;  %s232_s15 = sadd.s32 1, %s4187_s15   ;;  %s4187_s15 = sphi %s4394_s15, %s232_s15   ;;  %s4183_s8 = sphi %s4392_s8, %s6881_s8   ;;  %s4179_s7 = sphi %s6878_s7, %s6880_s7   ;;  %s4175_s6 = sphi %s6877_s6, %s6879_s6  }
  0x33   : >> { %v242_v2 = vld [vmem:[%s4179_s7 + $0xc8] sm:$0xff]  ;;  %239 = vst [vmem:[%s4175_s6] sm:$0xff] %v238_v0  ;;  %241 = vst [vmem:[%s4175_s6 + $0x8] sm:$0xff] %v240_v1  ;;  %v246_v4 = vld [vmem:[%s4179_s7 + $0x190] sm:$0xff]  ;;  %p367_p13 = scmp.ge.s32.totalorder %s366_s16, %s4384_s5  ;;  %p231_p0 = scmp.ge.s32.totalorder %s232_s15, %s4384_s5 }
  0x34   : >> { %243 = vst [vmem:[%s4175_s6 + $0x38] sm:$0xff] %v242_v2  ;;  %v248_v5 = vld [vmem:[%s4179_s7 + $0x198] sm:$0xff]  ;;  %245 = vst [vmem:[%s4175_s6 + $0x40] sm:$0xff] %v244_v3  ;;  %v252_v7 = vld [vmem:[%s4179_s7 + $0x260] sm:$0xff]  ;;  %s4559_s22 = sand.u32 (%p231_p0), 1, %s225_s4   ;;  %s3531_s23 = sshll.u32 (%p231_p0), %s4384_s5, 8 }
  0x35   : >> { %247 = vst [vmem:[%s4175_s6 + $0x70] sm:$0xff] %v246_v4  ;;  %249 = vst [vmem:[%s4175_s6 + $0x78] sm:$0xff] %v248_v5  ;;  %v250_v6 = vld [vmem:[%s4179_s7 + $0x258] sm:$0xff]  ;;  %v254_v8 = vld [vmem:[%s4179_s7 + $0x320] sm:$0xff]  ;;  %s6926_s16 = smov (%p367_p13, %s366_s16), 0  ;;  %s377_s24 = sshra.s32 (%p231_p0), %s3531_s23, 4 }
  0x36   : >> { %251 = vst [vmem:[%s4175_s6 + $0xa8] sm:$0xff] %v250_v6  ;;  %253 = vst [vmem:[%s4175_s6 + $0xb0] sm:$0xff] %v252_v7  ;;  %v256_v9 = vld [vmem:[%s4179_s7 + $0x328] sm:$0xff]  ;;  %v260_v11 = vld [vmem:[%s4179_s7 + $0x3f0] sm:$0xff]  ;;  %s3452_s17 = sshll.u32 %s6926_s16, 4  ;;  %s6881_s8 = smov %s6926_s16 }
  0x37   : >> { %255 = vst [vmem:[%s4175_s6 + $0xe0] sm:$0xff] %v254_v8  ;;  %v258_v10 = vld [vmem:[%s4179_s7 + $0x3e8] sm:$0xff]  ;;  %257 = vst [vmem:[%s4175_s6 + $0xe8] sm:$0xff] %v256_v9  ;;  %v262_v12 = vld [vmem:[%s4179_s7 + $0x4b0] sm:$0xff]  ;;  %s4450_s20 = scalar_lea.vmem %s4369_s27, %s3452_s17   ;;  %s4453_s21 = scalar_lea.vmem %s4373_s30, %s3452_s17 [#allocation2]  }
  0x38   : >> { %259 = vst [vmem:[%s4175_s6 + $0x118] sm:$0xff] %v258_v10  ;;  %261 = vst [vmem:[%s4175_s6 + $0x120] sm:$0xff] %v260_v11  ;;  %v264_v13 = vld [vmem:[%s4179_s7 + $0x4b8] sm:$0xff]  ;;  %v268_v15 = vld [vmem:[%s4179_s7 + $0x580] sm:$0xff]  ;;  %s4563_s25 = scalar_lea.vmem (%p231_p0), %s4369_s27, %s377_s24   ;;  %s4566_s26 = scalar_lea.vmem (%p231_p0), %s4373_s30, %s377_s24 [#allocation2]  }
  0x39   : >> { %v266_v14 = vld [vmem:[%s4179_s7 + $0x578] sm:$0xff]  ;;  %263 = vst [vmem:[%s4175_s6 + $0x150] sm:$0xff] %v262_v12  ;;  %265 = vst [vmem:[%s4175_s6 + $0x158] sm:$0xff] %v264_v13  ;;  %v270_v16 = vld [vmem:[%s4179_s7 + $0x640] sm:$0xff]  ;;  %p3457_p1 = scmp.le.s32.totalorder (%p231_p0), %s4559_s22, 0 }
  0x3a   : >> { %267 = vst [vmem:[%s4175_s6 + $0x188] sm:$0xff] %v266_v14  ;;  %v272_v17 = vld [vmem:[%s4179_s7 + $0x648] sm:$0xff]  ;;  %269 = vst [vmem:[%s4175_s6 + $0x190] sm:$0xff] %v268_v15  ;;  %v276_v19 = vld [vmem:[%s4179_s7 + $0x710] sm:$0xff] }
  0x3b   : >> { %271 = vst [vmem:[%s4175_s6 + $0x1c0] sm:$0xff] %v270_v16  ;;  %273 = vst [vmem:[%s4175_s6 + $0x1c8] sm:$0xff] %v272_v17  ;;  %v274_v18 = vld [vmem:[%s4179_s7 + $0x708] sm:$0xff]  ;;  %v278_v20 = vld [vmem:[%s4179_s7 + $0x7d0] sm:$0xff] }
  0x3c   : >> { %275 = vst [vmem:[%s4175_s6 + $0x1f8] sm:$0xff] %v274_v18  ;;  %277 = vst [vmem:[%s4175_s6 + $0x200] sm:$0xff] %v276_v19  ;;  %v280_v21 = vld [vmem:[%s4179_s7 + $0x7d8] sm:$0xff]  ;;  %v284_v23 = vld [vmem:[%s4179_s7 + $0x8a0] sm:$0xff] }
  0x3d   : >> { %279 = vst [vmem:[%s4175_s6 + $0x230] sm:$0xff] %v278_v20  ;;  %v282_v22 = vld [vmem:[%s4179_s7 + $0x898] sm:$0xff]  ;;  %281 = vst [vmem:[%s4175_s6 + $0x238] sm:$0xff] %v280_v21  ;;  %v286_v24 = vld [vmem:[%s4179_s7 + $0x960] sm:$0xff] }
  0x3e   : >> { %283 = vst [vmem:[%s4175_s6 + $0x268] sm:$0xff] %v282_v22  ;;  %285 = vst [vmem:[%s4175_s6 + $0x270] sm:$0xff] %v284_v23  ;;  %v288_v25 = vld [vmem:[%s4179_s7 + $0x968] sm:$0xff]  ;;  %v292_v27 = vld [vmem:[%s4179_s7 + $0xa30] sm:$0xff] }
  0x3f   : >> { %v290_v26 = vld [vmem:[%s4179_s7 + $0xa28] sm:$0xff]  ;;  %287 = vst [vmem:[%s4175_s6 + $0x2a0] sm:$0xff] %v286_v24  ;;  %289 = vst [vmem:[%s4175_s6 + $0x2a8] sm:$0xff] %v288_v25  ;;  %v294_v28 = vld [vmem:[%s4179_s7 + $0xaf0] sm:$0xff] }
  0x40   : >> { %291 = vst [vmem:[%s4175_s6 + $0x2d8] sm:$0xff] %v290_v26  ;;  %v296_v29 = vld [vmem:[%s4179_s7 + $0xaf8] sm:$0xff]  ;;  %293 = vst [vmem:[%s4175_s6 + $0x2e0] sm:$0xff] %v292_v27  ;;  %v300_v31 = vld [vmem:[%s4179_s7 + $0xbc0] sm:$0xff] }
  0x41   : >> { %295 = vst [vmem:[%s4175_s6 + $0x310] sm:$0xff] %v294_v28  ;;  %297 = vst [vmem:[%s4175_s6 + $0x318] sm:$0xff] %v296_v29  ;;  %v298_v30 = vld [vmem:[%s4179_s7 + $0xbb8] sm:$0xff]  ;;  %v302_v32 = vld [vmem:[%s4179_s7 + $0xc80] sm:$0xff] }
  0x42   : >> { %299 = vst [vmem:[%s4175_s6 + $0x348] sm:$0xff] %v298_v30  ;;  %301 = vst [vmem:[%s4175_s6 + $0x350] sm:$0xff] %v300_v31  ;;  %v304_v33 = vld [vmem:[%s4179_s7 + $0xc88] sm:$0xff]  ;;  %v308_v35 = vld [vmem:[%s4179_s7 + $0xd50] sm:$0xff] }
  0x43   : >> { %303 = vst [vmem:[%s4175_s6 + $0x380] sm:$0xff] %v302_v32  ;;  %v306_v34 = vld [vmem:[%s4179_s7 + $0xd48] sm:$0xff]  ;;  %305 = vst [vmem:[%s4175_s6 + $0x388] sm:$0xff] %v304_v33  ;;  %v310_v36 = vld [vmem:[%s4179_s7 + $0xe10] sm:$0xff] }
  0x44   : >> { %307 = vst [vmem:[%s4175_s6 + $0x3b8] sm:$0xff] %v306_v34  ;;  %309 = vst [vmem:[%s4175_s6 + $0x3c0] sm:$0xff] %v308_v35  ;;  %v312_v37 = vld [vmem:[%s4179_s7 + $0xe18] sm:$0xff]  ;;  %v316_v39 = vld [vmem:[%s4179_s7 + $0xee0] sm:$0xff] }
  0x45   : >> { %v314_v38 = vld [vmem:[%s4179_s7 + $0xed8] sm:$0xff]  ;;  %311 = vst [vmem:[%s4175_s6 + $0x3f0] sm:$0xff] %v310_v36  ;;  %313 = vst [vmem:[%s4175_s6 + $0x3f8] sm:$0xff] %v312_v37  ;;  %v318_v40 = vld [vmem:[%s4179_s7 + $0xfa0] sm:$0xff] }
  0x46   : >> { %315 = vst [vmem:[%s4175_s6 + $0x428] sm:$0xff] %v314_v38  ;;  %v320_v41 = vld [vmem:[%s4179_s7 + $0xfa8] sm:$0xff]  ;;  %317 = vst [vmem:[%s4175_s6 + $0x430] sm:$0xff] %v316_v39  ;;  %v324_v43 = vld [vmem:[%s4179_s7 + $0x1070] sm:$0xff] }
  0x47   : >> { %319 = vst [vmem:[%s4175_s6 + $0x460] sm:$0xff] %v318_v40  ;;  %321 = vst [vmem:[%s4175_s6 + $0x468] sm:$0xff] %v320_v41  ;;  %v322_v42 = vld [vmem:[%s4179_s7 + $0x1068] sm:$0xff]  ;;  %v326_v44 = vld [vmem:[%s4179_s7 + $0x1130] sm:$0xff] }
  0x48   : >> { %323 = vst [vmem:[%s4175_s6 + $0x498] sm:$0xff] %v322_v42  ;;  %325 = vst [vmem:[%s4175_s6 + $0x4a0] sm:$0xff] %v324_v43  ;;  %v328_v45 = vld [vmem:[%s4179_s7 + $0x1138] sm:$0xff]  ;;  %v332_v47 = vld [vmem:[%s4179_s7 + $0x1200] sm:$0xff] }
  0x49   : >> { %327 = vst [vmem:[%s4175_s6 + $0x4d0] sm:$0xff] %v326_v44  ;;  %v330_v46 = vld [vmem:[%s4179_s7 + $0x11f8] sm:$0xff]  ;;  %329 = vst [vmem:[%s4175_s6 + $0x4d8] sm:$0xff] %v328_v45  ;;  %v334_v48 = vld [vmem:[%s4179_s7 + $0x12c0] sm:$0xff] }
  0x4a   : >> { %331 = vst [vmem:[%s4175_s6 + $0x508] sm:$0xff] %v330_v46  ;;  %333 = vst [vmem:[%s4175_s6 + $0x510] sm:$0xff] %v332_v47  ;;  %v336_v49 = vld [vmem:[%s4179_s7 + $0x12c8] sm:$0xff]  ;;  %v340_v51 = vld [vmem:[%s4179_s7 + $0x1390] sm:$0xff] }
  0x4b   : >> { %v338_v50 = vld [vmem:[%s4179_s7 + $0x1388] sm:$0xff]  ;;  %335 = vst [vmem:[%s4175_s6 + $0x540] sm:$0xff] %v334_v48  ;;  %337 = vst [vmem:[%s4175_s6 + $0x548] sm:$0xff] %v336_v49  ;;  %v342_v52 = vld [vmem:[%s4179_s7 + $0x1450] sm:$0xff] }
  0x4c   : >> { %339 = vst [vmem:[%s4175_s6 + $0x578] sm:$0xff] %v338_v50  ;;  %v344_v53 = vld [vmem:[%s4179_s7 + $0x1458] sm:$0xff]  ;;  %341 = vst [vmem:[%s4175_s6 + $0x580] sm:$0xff] %v340_v51  ;;  %v348_v55 = vld [vmem:[%s4179_s7 + $0x1520] sm:$0xff]  ;;  %234 = sbr.rel (!%p231_p0) target bundleno = 50 (0x32), region = 231 }
  0x4d   : >> { %343 = vst [vmem:[%s4175_s6 + $0x5b0] sm:$0xff] %v342_v52  ;;  %345 = vst [vmem:[%s4175_s6 + $0x5b8] sm:$0xff] %v344_v53  ;;  %v346_v54 = vld [vmem:[%s4179_s7 + $0x1518] sm:$0xff]  ;;  %v350_v56 = vld [vmem:[%s4179_s7 + $0x15e0] sm:$0xff] }
  0x4e   : >> { %347 = vst [vmem:[%s4175_s6 + $0x5e8] sm:$0xff] %v346_v54  ;;  %349 = vst [vmem:[%s4175_s6 + $0x5f0] sm:$0xff] %v348_v55  ;;  %v352_v57 = vld [vmem:[%s4179_s7 + $0x15e8] sm:$0xff]  ;;  %v356_v59 = vld [vmem:[%s4179_s7 + $0x16b0] sm:$0xff] }
  0x4f   : >> { %351 = vst [vmem:[%s4175_s6 + $0x620] sm:$0xff] %v350_v56  ;;  %v354_v58 = vld [vmem:[%s4179_s7 + $0x16a8] sm:$0xff]  ;;  %353 = vst [vmem:[%s4175_s6 + $0x628] sm:$0xff] %v352_v57  ;;  %v358_v60 = vld [vmem:[%s4179_s7 + $0x1770] sm:$0xff] }
  0x50   : >> { %355 = vst [vmem:[%s4175_s6 + $0x658] sm:$0xff] %v354_v58  ;;  %357 = vst [vmem:[%s4175_s6 + $0x660] sm:$0xff] %v356_v59  ;;  %v360_v61 = vld [vmem:[%s4179_s7 + $0x1778] sm:$0xff]  ;;  %v364_v63 = vld [vmem:[%s4179_s7 + $0x1840] sm:$0xff] }
  0x51   : >> { %v362_v62 = vld [vmem:[%s4179_s7 + $0x1838] sm:$0xff]  ;;  %359 = vst [vmem:[%s4175_s6 + $0x690] sm:$0xff] %v358_v60  ;;  %361 = vst [vmem:[%s4175_s6 + $0x698] sm:$0xff] %v360_v61  ;;  %s6880_s7 = smov %s4450_s20 }
  0x52   : >> { %363 = vst [vmem:[%s4175_s6 + $0x6c8] sm:$0xff] %v362_v62  ;;  %365 = vst [vmem:[%s4175_s6 + $0x6d0] sm:$0xff] %v364_v63  ;;  %s6879_s6 = smov %s4453_s21 }
  0x53   : > { %3319 = sbr.rel (%p3457_p1) target bundleno = 107 (0x6b), region = 236  ;;  %s6882_s28 = smov (!%p3457_p1), %s4566_s26 }
  0x54   : > { %s6883_s6 = smov (!%p3457_p1), %s4563_s25  ;;  %s4575_s7 = smov (!%p3457_p1), 0  }
  0x55   : > { %s4577_s8 = smov (!%p3457_p1), 0  }
  0x5a LB: >> { %v393_v0 = vld [vmem:[%s4195_s6] sm:$0xff]  ;;  %v395_v1 = vld [vmem:[%s4195_s6 + $0xc8] sm:$0xff]  ;;  %v397_v2 = vld [vmem:[%s4195_s6 + $0x190] sm:$0xff]  ;;  %s457_s4 = sadd.s32 1, %s4199_s7  ;;  %s387_s8 = sadd.s32 1, %s4203_s8   ;;  %s4203_s8 = sphi %s4577_s8, %s387_s8   ;;  %s4199_s7 = sphi %s4575_s7, %s6886_s7   ;;  %s4195_s6 = sphi %s6883_s6, %s6885_s6   ;;  %s4191_s28 = sphi %s6882_s28, %s6884_s28  }
  0x5b   : >> { %394 = vst [vmem:[%s4191_s28] sm:$0xff] %v393_v0  ;;  %396 = vst [vmem:[%s4191_s28 + $0x38] sm:$0xff] %v395_v1  ;;  %v399_v3 = vld [vmem:[%s4195_s6 + $0x258] sm:$0xff]  ;;  %v401_v4 = vld [vmem:[%s4195_s6 + $0x320] sm:$0xff]  ;;  %p458_p2 = scmp.ge.s32.totalorder %s457_s4, %s4559_s22  ;;  %p386_p3 = scmp.ge.s32.totalorder %s387_s8, %s4559_s22 }
  0x5c   : >> { %398 = vst [vmem:[%s4191_s28 + $0x70] sm:$0xff] %v397_v2  ;;  %v403_v5 = vld [vmem:[%s4195_s6 + $0x3e8] sm:$0xff]  ;;  %400 = vst [vmem:[%s4191_s28 + $0xa8] sm:$0xff] %v399_v3  ;;  %v405_v6 = vld [vmem:[%s4195_s6 + $0x4b0] sm:$0xff] }
  0x5d   : >> { %402 = vst [vmem:[%s4191_s28 + $0xe0] sm:$0xff] %v401_v4  ;;  %404 = vst [vmem:[%s4191_s28 + $0x118] sm:$0xff] %v403_v5  ;;  %v407_v7 = vld [vmem:[%s4195_s6 + $0x578] sm:$0xff]  ;;  %v409_v8 = vld [vmem:[%s4195_s6 + $0x640] sm:$0xff]  ;;  %s6928_s4 = smov (%p458_p2, %s457_s4), 0 }
  0x5e   : >> { %406 = vst [vmem:[%s4191_s28 + $0x150] sm:$0xff] %v405_v6  ;;  %408 = vst [vmem:[%s4191_s28 + $0x188] sm:$0xff] %v407_v7  ;;  %v411_v9 = vld [vmem:[%s4195_s6 + $0x708] sm:$0xff]  ;;  %v413_v10 = vld [vmem:[%s4195_s6 + $0x7d0] sm:$0xff]  ;;  %s3458_s5 = sshll.u32 %s6928_s4, 3  ;;  %s6886_s7 = smov %s6928_s4 }
  0x5f   : >> { %410 = vst [vmem:[%s4191_s28 + $0x1c0] sm:$0xff] %v409_v8  ;;  %v415_v11 = vld [vmem:[%s4195_s6 + $0x898] sm:$0xff]  ;;  %412 = vst [vmem:[%s4191_s28 + $0x1f8] sm:$0xff] %v411_v9  ;;  %v417_v12 = vld [vmem:[%s4195_s6 + $0x960] sm:$0xff]  ;;  %s4633_s15 = scalar_lea.vmem %s4563_s25, %s3458_s5   ;;  %s463_s16 = scalar_lea.vmem %s4566_s26, %s3458_s5 [#allocation2]  }
  0x60   : >> { %414 = vst [vmem:[%s4191_s28 + $0x230] sm:$0xff] %v413_v10  ;;  %416 = vst [vmem:[%s4191_s28 + $0x268] sm:$0xff] %v415_v11  ;;  %v419_v13 = vld [vmem:[%s4195_s6 + $0xa28] sm:$0xff]  ;;  %v421_v14 = vld [vmem:[%s4195_s6 + $0xaf0] sm:$0xff] }
  0x61   : >> { %418 = vst [vmem:[%s4191_s28 + $0x2a0] sm:$0xff] %v417_v12  ;;  %420 = vst [vmem:[%s4191_s28 + $0x2d8] sm:$0xff] %v419_v13  ;;  %v423_v15 = vld [vmem:[%s4195_s6 + $0xbb8] sm:$0xff]  ;;  %v425_v16 = vld [vmem:[%s4195_s6 + $0xc80] sm:$0xff] }
  0x62   : >> { %422 = vst [vmem:[%s4191_s28 + $0x310] sm:$0xff] %v421_v14  ;;  %v427_v17 = vld [vmem:[%s4195_s6 + $0xd48] sm:$0xff]  ;;  %424 = vst [vmem:[%s4191_s28 + $0x348] sm:$0xff] %v423_v15  ;;  %v429_v18 = vld [vmem:[%s4195_s6 + $0xe10] sm:$0xff] }
  0x63   : >> { %426 = vst [vmem:[%s4191_s28 + $0x380] sm:$0xff] %v425_v16  ;;  %428 = vst [vmem:[%s4191_s28 + $0x3b8] sm:$0xff] %v427_v17  ;;  %v431_v19 = vld [vmem:[%s4195_s6 + $0xed8] sm:$0xff]  ;;  %v433_v20 = vld [vmem:[%s4195_s6 + $0xfa0] sm:$0xff] }
  0x64   : >> { %430 = vst [vmem:[%s4191_s28 + $0x3f0] sm:$0xff] %v429_v18  ;;  %432 = vst [vmem:[%s4191_s28 + $0x428] sm:$0xff] %v431_v19  ;;  %v435_v21 = vld [vmem:[%s4195_s6 + $0x1068] sm:$0xff]  ;;  %v437_v22 = vld [vmem:[%s4195_s6 + $0x1130] sm:$0xff]  ;;  %389 = sbr.rel (!%p386_p3) target bundleno = 90 (0x5a), region = 242 }
  0x65   : >> { %434 = vst [vmem:[%s4191_s28 + $0x460] sm:$0xff] %v433_v20  ;;  %v439_v23 = vld [vmem:[%s4195_s6 + $0x11f8] sm:$0xff]  ;;  %436 = vst [vmem:[%s4191_s28 + $0x498] sm:$0xff] %v435_v21  ;;  %v441_v24 = vld [vmem:[%s4195_s6 + $0x12c0] sm:$0xff] }
  0x66   : >> { %438 = vst [vmem:[%s4191_s28 + $0x4d0] sm:$0xff] %v437_v22  ;;  %440 = vst [vmem:[%s4191_s28 + $0x508] sm:$0xff] %v439_v23  ;;  %v443_v25 = vld [vmem:[%s4195_s6 + $0x1388] sm:$0xff]  ;;  %v445_v26 = vld [vmem:[%s4195_s6 + $0x1450] sm:$0xff] }
  0x67   : >> { %442 = vst [vmem:[%s4191_s28 + $0x540] sm:$0xff] %v441_v24  ;;  %444 = vst [vmem:[%s4191_s28 + $0x578] sm:$0xff] %v443_v25  ;;  %v447_v27 = vld [vmem:[%s4195_s6 + $0x1518] sm:$0xff]  ;;  %v449_v28 = vld [vmem:[%s4195_s6 + $0x15e0] sm:$0xff] }
  0x68   : >> { %446 = vst [vmem:[%s4191_s28 + $0x5b0] sm:$0xff] %v445_v26  ;;  %v451_v29 = vld [vmem:[%s4195_s6 + $0x16a8] sm:$0xff]  ;;  %448 = vst [vmem:[%s4191_s28 + $0x5e8] sm:$0xff] %v447_v27  ;;  %v453_v30 = vld [vmem:[%s4195_s6 + $0x1770] sm:$0xff] }
  0x69   : >> { %450 = vst [vmem:[%s4191_s28 + $0x620] sm:$0xff] %v449_v28  ;;  %452 = vst [vmem:[%s4191_s28 + $0x658] sm:$0xff] %v451_v29  ;;  %v455_v31 = vld [vmem:[%s4195_s6 + $0x1838] sm:$0xff]  ;;  %s6885_s6 = smov %s4633_s15 }
  0x6a   : >> { %454 = vst [vmem:[%s4191_s28 + $0x690] sm:$0xff] %v453_v30  ;;  %456 = vst [vmem:[%s4191_s28 + $0x6c8] sm:$0xff] %v455_v31  ;;  %s6884_s28 = smov %s463_s16 }
  0x6b PF: > { %466 = sbr.rel (%p221_p11) target bundleno = 205 (0xcd), region = 65  ;;  %s468_s17 = ssub.s32 (!%p221_p11), %s4371_s29, %s4377_s3 }
  0x6c   : > { %s472_s20 = sshrl.u32 (!%p221_p11), %s4371_s29, 3  ;;  %s4679_s21 = scalar_lea.vmem (!%p221_p11), %s4369_s27, %s468_s17 }
  0x6d   : > { %s4682_s23 = scalar_lea.vmem (!%p221_p11), %s4373_s30, %s468_s17 [#allocation2]  ;;  %s4686_s24 = sshrl.u32 (!%p221_p11), %s472_s20, 1 }
  0x6e   : > { %s6887_s22 = smov (!%p221_p11), %s4373_s30  ;;  %s6888_s25 = smov (!%p221_p11), %s4369_s27 }
  0x6f   : > { %s4694_s26 = smov (!%p221_p11), 0   ;;  %s4696_s28 = smov (!%p221_p11), 0  }
  0x72 LB: >> { %v485_v32 = vld [vmem:[%s4211_s25] sm:$0xff]  ;;  %v487_v33 = vld [vmem:[%s4211_s25 + $0x8] sm:$0xff]  ;;  %s613_s6 = sadd.s32 1, %s4215_s26  ;;  %v491_v35 = vld [vmem:[%s4211_s25 + $0xd0] sm:$0xff]  ;;  %s479_s28 = sadd.s32 1, %s4219_s28   ;;  %s4219_s28 = sphi %s4696_s28, %s479_s28   ;;  %s4215_s26 = sphi %s4694_s26, %s6891_s26   ;;  %s4211_s25 = sphi %s6888_s25, %s6890_s25   ;;  %s4207_s22 = sphi %s6887_s22, %s6889_s22  }
  0x73   : >> { %v489_v34 = vld [vmem:[%s4211_s25 + $0xc8] sm:$0xff]  ;;  %486 = vst [vmem:[%s4207_s22] sm:$0xff] %v485_v32  ;;  %488 = vst [vmem:[%s4207_s22 + $0x8] sm:$0xff] %v487_v33  ;;  %v493_v36 = vld [vmem:[%s4211_s25 + $0x190] sm:$0xff]  ;;  %p614_p4 = scmp.ge.s32.totalorder %s613_s6, %s4686_s24  ;;  %p478_p5 = scmp.ge.s32.totalorder %s479_s28, %s4686_s24 }
  0x74   : >> { %490 = vst [vmem:[%s4207_s22 + $0x38] sm:$0xff] %v489_v34  ;;  %v495_v37 = vld [vmem:[%s4211_s25 + $0x198] sm:$0xff]  ;;  %492 = vst [vmem:[%s4207_s22 + $0x40] sm:$0xff] %v491_v35  ;;  %v499_v39 = vld [vmem:[%s4211_s25 + $0x260] sm:$0xff]  ;;  %s4861_s5 = sand.u32 (%p478_p5), 1, %s472_s20   ;;  %s3533_s15 = sshll.u32 (%p478_p5), %s4686_s24, 8 }
  0x75   : >> { %494 = vst [vmem:[%s4207_s22 + $0x70] sm:$0xff] %v493_v36  ;;  %496 = vst [vmem:[%s4207_s22 + $0x78] sm:$0xff] %v495_v37  ;;  %v497_v38 = vld [vmem:[%s4211_s25 + $0x258] sm:$0xff]  ;;  %v501_v40 = vld [vmem:[%s4211_s25 + $0x320] sm:$0xff]  ;;  %s6930_s6 = smov (%p614_p4, %s613_s6), 0  ;;  %s624_s16 = sshra.s32 (%p478_p5), %s3533_s15, 4 }
  0x76   : >> { %498 = vst [vmem:[%s4207_s22 + $0xa8] sm:$0xff] %v497_v38  ;;  %500 = vst [vmem:[%s4207_s22 + $0xb0] sm:$0xff] %v499_v39  ;;  %v503_v41 = vld [vmem:[%s4211_s25 + $0x328] sm:$0xff]  ;;  %v507_v43 = vld [vmem:[%s4211_s25 + $0x3f0] sm:$0xff]  ;;  %s3461_s7 = sshll.u32 %s6930_s6, 4  ;;  %s6891_s26 = smov %s6930_s6 }
  0x77   : >> { %502 = vst [vmem:[%s4207_s22 + $0xe0] sm:$0xff] %v501_v40  ;;  %v505_v42 = vld [vmem:[%s4211_s25 + $0x3e8] sm:$0xff]  ;;  %504 = vst [vmem:[%s4207_s22 + $0xe8] sm:$0xff] %v503_v41  ;;  %v509_v44 = vld [vmem:[%s4211_s25 + $0x4b0] sm:$0xff]  ;;  %s4752_s8 = scalar_lea.vmem %s4369_s27, %s3461_s7   ;;  %s4755_s4 = scalar_lea.vmem %s4373_s30, %s3461_s7 [#allocation2]  }
  0x78   : >> { %506 = vst [vmem:[%s4207_s22 + $0x118] sm:$0xff] %v505_v42  ;;  %508 = vst [vmem:[%s4207_s22 + $0x120] sm:$0xff] %v507_v43  ;;  %v511_v45 = vld [vmem:[%s4211_s25 + $0x4b8] sm:$0xff]  ;;  %v515_v47 = vld [vmem:[%s4211_s25 + $0x580] sm:$0xff]  ;;  %s4865_s17 = scalar_lea.vmem (%p478_p5), %s4369_s27, %s624_s16   ;;  %s4868_s7 = scalar_lea.vmem (%p478_p5), %s4373_s30, %s624_s16 [#allocation2]  }
  0x79   : >> { %v513_v46 = vld [vmem:[%s4211_s25 + $0x578] sm:$0xff]  ;;  %510 = vst [vmem:[%s4207_s22 + $0x150] sm:$0xff] %v509_v44  ;;  %512 = vst [vmem:[%s4207_s22 + $0x158] sm:$0xff] %v511_v45  ;;  %v517_v48 = vld [vmem:[%s4211_s25 + $0x640] sm:$0xff]  ;;  %p3466_p7 = scmp.le.s32.totalorder (%p478_p5), %s4861_s5, 0 }
  0x7a   : >> { %514 = vst [vmem:[%s4207_s22 + $0x188] sm:$0xff] %v513_v46  ;;  %v519_v49 = vld [vmem:[%s4211_s25 + $0x648] sm:$0xff]  ;;  %516 = vst [vmem:[%s4207_s22 + $0x190] sm:$0xff] %v515_v47  ;;  %v523_v51 = vld [vmem:[%s4211_s25 + $0x710] sm:$0xff] }
  0x7b   : >> { %518 = vst [vmem:[%s4207_s22 + $0x1c0] sm:$0xff] %v517_v48  ;;  %520 = vst [vmem:[%s4207_s22 + $0x1c8] sm:$0xff] %v519_v49  ;;  %v521_v50 = vld [vmem:[%s4211_s25 + $0x708] sm:$0xff]  ;;  %v525_v52 = vld [vmem:[%s4211_s25 + $0x7d0] sm:$0xff] }
  0x7c   : >> { %522 = vst [vmem:[%s4207_s22 + $0x1f8] sm:$0xff] %v521_v50  ;;  %524 = vst [vmem:[%s4207_s22 + $0x200] sm:$0xff] %v523_v51  ;;  %v527_v53 = vld [vmem:[%s4211_s25 + $0x7d8] sm:$0xff]  ;;  %v531_v55 = vld [vmem:[%s4211_s25 + $0x8a0] sm:$0xff] }
  0x7d   : >> { %526 = vst [vmem:[%s4207_s22 + $0x230] sm:$0xff] %v525_v52  ;;  %v529_v54 = vld [vmem:[%s4211_s25 + $0x898] sm:$0xff]  ;;  %528 = vst [vmem:[%s4207_s22 + $0x238] sm:$0xff] %v527_v53  ;;  %v533_v56 = vld [vmem:[%s4211_s25 + $0x960] sm:$0xff] }
  0x7e   : >> { %530 = vst [vmem:[%s4207_s22 + $0x268] sm:$0xff] %v529_v54  ;;  %532 = vst [vmem:[%s4207_s22 + $0x270] sm:$0xff] %v531_v55  ;;  %v535_v57 = vld [vmem:[%s4211_s25 + $0x968] sm:$0xff]  ;;  %v539_v59 = vld [vmem:[%s4211_s25 + $0xa30] sm:$0xff] }
  0x7f   : >> { %v537_v58 = vld [vmem:[%s4211_s25 + $0xa28] sm:$0xff]  ;;  %534 = vst [vmem:[%s4207_s22 + $0x2a0] sm:$0xff] %v533_v56  ;;  %536 = vst [vmem:[%s4207_s22 + $0x2a8] sm:$0xff] %v535_v57  ;;  %v541_v60 = vld [vmem:[%s4211_s25 + $0xaf0] sm:$0xff] }
  0x80   : >> { %538 = vst [vmem:[%s4207_s22 + $0x2d8] sm:$0xff] %v537_v58  ;;  %v543_v61 = vld [vmem:[%s4211_s25 + $0xaf8] sm:$0xff]  ;;  %540 = vst [vmem:[%s4207_s22 + $0x2e0] sm:$0xff] %v539_v59  ;;  %v547_v63 = vld [vmem:[%s4211_s25 + $0xbc0] sm:$0xff] }
  0x81   : >> { %542 = vst [vmem:[%s4207_s22 + $0x310] sm:$0xff] %v541_v60  ;;  %544 = vst [vmem:[%s4207_s22 + $0x318] sm:$0xff] %v543_v61  ;;  %v545_v62 = vld [vmem:[%s4211_s25 + $0xbb8] sm:$0xff]  ;;  %v549_v0 = vld [vmem:[%s4211_s25 + $0xc80] sm:$0xff] }
  0x82   : >> { %546 = vst [vmem:[%s4207_s22 + $0x348] sm:$0xff] %v545_v62  ;;  %548 = vst [vmem:[%s4207_s22 + $0x350] sm:$0xff] %v547_v63  ;;  %v551_v1 = vld [vmem:[%s4211_s25 + $0xc88] sm:$0xff]  ;;  %v555_v3 = vld [vmem:[%s4211_s25 + $0xd50] sm:$0xff] }
  0x83   : >> { %550 = vst [vmem:[%s4207_s22 + $0x380] sm:$0xff] %v549_v0  ;;  %v553_v2 = vld [vmem:[%s4211_s25 + $0xd48] sm:$0xff]  ;;  %552 = vst [vmem:[%s4207_s22 + $0x388] sm:$0xff] %v551_v1  ;;  %v557_v4 = vld [vmem:[%s4211_s25 + $0xe10] sm:$0xff] }
  0x84   : >> { %554 = vst [vmem:[%s4207_s22 + $0x3b8] sm:$0xff] %v553_v2  ;;  %556 = vst [vmem:[%s4207_s22 + $0x3c0] sm:$0xff] %v555_v3  ;;  %v559_v5 = vld [vmem:[%s4211_s25 + $0xe18] sm:$0xff]  ;;  %v563_v7 = vld [vmem:[%s4211_s25 + $0xee0] sm:$0xff] }
  0x85   : >> { %v561_v6 = vld [vmem:[%s4211_s25 + $0xed8] sm:$0xff]  ;;  %558 = vst [vmem:[%s4207_s22 + $0x3f0] sm:$0xff] %v557_v4  ;;  %560 = vst [vmem:[%s4207_s22 + $0x3f8] sm:$0xff] %v559_v5  ;;  %v565_v8 = vld [vmem:[%s4211_s25 + $0xfa0] sm:$0xff] }
  0x86   : >> { %562 = vst [vmem:[%s4207_s22 + $0x428] sm:$0xff] %v561_v6  ;;  %v567_v9 = vld [vmem:[%s4211_s25 + $0xfa8] sm:$0xff]  ;;  %564 = vst [vmem:[%s4207_s22 + $0x430] sm:$0xff] %v563_v7  ;;  %v571_v11 = vld [vmem:[%s4211_s25 + $0x1070] sm:$0xff] }
  0x87   : >> { %566 = vst [vmem:[%s4207_s22 + $0x460] sm:$0xff] %v565_v8  ;;  %568 = vst [vmem:[%s4207_s22 + $0x468] sm:$0xff] %v567_v9  ;;  %v569_v10 = vld [vmem:[%s4211_s25 + $0x1068] sm:$0xff]  ;;  %v573_v12 = vld [vmem:[%s4211_s25 + $0x1130] sm:$0xff] }
  0x88   : >> { %570 = vst [vmem:[%s4207_s22 + $0x498] sm:$0xff] %v569_v10  ;;  %572 = vst [vmem:[%s4207_s22 + $0x4a0] sm:$0xff] %v571_v11  ;;  %v575_v13 = vld [vmem:[%s4211_s25 + $0x1138] sm:$0xff]  ;;  %v579_v15 = vld [vmem:[%s4211_s25 + $0x1200] sm:$0xff] }
  0x89   : >> { %574 = vst [vmem:[%s4207_s22 + $0x4d0] sm:$0xff] %v573_v12  ;;  %v577_v14 = vld [vmem:[%s4211_s25 + $0x11f8] sm:$0xff]  ;;  %576 = vst [vmem:[%s4207_s22 + $0x4d8] sm:$0xff] %v575_v13  ;;  %v581_v16 = vld [vmem:[%s4211_s25 + $0x12c0] sm:$0xff] }
  0x8a   : >> { %578 = vst [vmem:[%s4207_s22 + $0x508] sm:$0xff] %v577_v14  ;;  %580 = vst [vmem:[%s4207_s22 + $0x510] sm:$0xff] %v579_v15  ;;  %v583_v17 = vld [vmem:[%s4211_s25 + $0x12c8] sm:$0xff]  ;;  %v587_v19 = vld [vmem:[%s4211_s25 + $0x1390] sm:$0xff] }
  0x8b   : >> { %v585_v18 = vld [vmem:[%s4211_s25 + $0x1388] sm:$0xff]  ;;  %582 = vst [vmem:[%s4207_s22 + $0x540] sm:$0xff] %v581_v16  ;;  %584 = vst [vmem:[%s4207_s22 + $0x548] sm:$0xff] %v583_v17  ;;  %v589_v20 = vld [vmem:[%s4211_s25 + $0x1450] sm:$0xff] }
  0x8c   : >> { %586 = vst [vmem:[%s4207_s22 + $0x578] sm:$0xff] %v585_v18  ;;  %v591_v21 = vld [vmem:[%s4211_s25 + $0x1458] sm:$0xff]  ;;  %588 = vst [vmem:[%s4207_s22 + $0x580] sm:$0xff] %v587_v19  ;;  %v595_v23 = vld [vmem:[%s4211_s25 + $0x1520] sm:$0xff]  ;;  %481 = sbr.rel (!%p478_p5) target bundleno = 114 (0x72), region = 253 }
  0x8d   : >> { %590 = vst [vmem:[%s4207_s22 + $0x5b0] sm:$0xff] %v589_v20  ;;  %592 = vst [vmem:[%s4207_s22 + $0x5b8] sm:$0xff] %v591_v21  ;;  %v593_v22 = vld [vmem:[%s4211_s25 + $0x1518] sm:$0xff]  ;;  %v597_v24 = vld [vmem:[%s4211_s25 + $0x15e0] sm:$0xff] }
  0x8e   : >> { %594 = vst [vmem:[%s4207_s22 + $0x5e8] sm:$0xff] %v593_v22  ;;  %596 = vst [vmem:[%s4207_s22 + $0x5f0] sm:$0xff] %v595_v23  ;;  %v599_v25 = vld [vmem:[%s4211_s25 + $0x15e8] sm:$0xff]  ;;  %v603_v27 = vld [vmem:[%s4211_s25 + $0x16b0] sm:$0xff] }
  0x8f   : >> { %598 = vst [vmem:[%s4207_s22 + $0x620] sm:$0xff] %v597_v24  ;;  %v601_v26 = vld [vmem:[%s4211_s25 + $0x16a8] sm:$0xff]  ;;  %600 = vst [vmem:[%s4207_s22 + $0x628] sm:$0xff] %v599_v25  ;;  %v605_v28 = vld [vmem:[%s4211_s25 + $0x1770] sm:$0xff] }
  0x90   : >> { %602 = vst [vmem:[%s4207_s22 + $0x658] sm:$0xff] %v601_v26  ;;  %604 = vst [vmem:[%s4207_s22 + $0x660] sm:$0xff] %v603_v27  ;;  %v607_v29 = vld [vmem:[%s4211_s25 + $0x1778] sm:$0xff]  ;;  %v611_v31 = vld [vmem:[%s4211_s25 + $0x1840] sm:$0xff] }
  0x91   : >> { %v609_v30 = vld [vmem:[%s4211_s25 + $0x1838] sm:$0xff]  ;;  %606 = vst [vmem:[%s4207_s22 + $0x690] sm:$0xff] %v605_v28  ;;  %608 = vst [vmem:[%s4207_s22 + $0x698] sm:$0xff] %v607_v29  ;;  %s6890_s25 = smov %s4752_s8 }
  0x92   : >> { %610 = vst [vmem:[%s4207_s22 + $0x6c8] sm:$0xff] %v609_v30  ;;  %612 = vst [vmem:[%s4207_s22 + $0x6d0] sm:$0xff] %v611_v31  ;;  %s6889_s22 = smov %s4755_s4 }
  0x93   : > { %3347 = sbr.rel (%p3466_p7) target bundleno = 171 (0xab), region = 258  ;;  %s6892_s28 = smov (!%p3466_p7), %s4868_s7 }
  0x94   : > { %s6893_s22 = smov (!%p3466_p7), %s4865_s17  ;;  %s4877_s25 = smov (!%p3466_p7), 0  }
  0x95   : > { %s4879_s26 = smov (!%p3466_p7), 0  }
  0x9a LB: >> { %v640_v32 = vld [vmem:[%s4227_s22] sm:$0xff]  ;;  %v642_v33 = vld [vmem:[%s4227_s22 + $0xc8] sm:$0xff]  ;;  %v644_v34 = vld [vmem:[%s4227_s22 + $0x190] sm:$0xff]  ;;  %s704_s20 = sadd.s32 1, %s4231_s25  ;;  %s634_s26 = sadd.s32 1, %s4235_s26   ;;  %s4235_s26 = sphi %s4879_s26, %s634_s26   ;;  %s4231_s25 = sphi %s4877_s25, %s6896_s25   ;;  %s4227_s22 = sphi %s6893_s22, %s6895_s22   ;;  %s4223_s28 = sphi %s6892_s28, %s6894_s28  }
  0x9b   : >> { %641 = vst [vmem:[%s4223_s28] sm:$0xff] %v640_v32  ;;  %643 = vst [vmem:[%s4223_s28 + $0x38] sm:$0xff] %v642_v33  ;;  %v646_v35 = vld [vmem:[%s4227_s22 + $0x258] sm:$0xff]  ;;  %v648_v36 = vld [vmem:[%s4227_s22 + $0x320] sm:$0xff]  ;;  %p705_p8 = scmp.ge.s32.totalorder %s704_s20, %s4861_s5  ;;  %p633_p9 = scmp.ge.s32.totalorder %s634_s26, %s4861_s5 }
  0x9c   : >> { %645 = vst [vmem:[%s4223_s28 + $0x70] sm:$0xff] %v644_v34  ;;  %v650_v37 = vld [vmem:[%s4227_s22 + $0x3e8] sm:$0xff]  ;;  %647 = vst [vmem:[%s4223_s28 + $0xa8] sm:$0xff] %v646_v35  ;;  %v652_v38 = vld [vmem:[%s4227_s22 + $0x4b0] sm:$0xff] }
  0x9d   : >> { %649 = vst [vmem:[%s4223_s28 + $0xe0] sm:$0xff] %v648_v36  ;;  %651 = vst [vmem:[%s4223_s28 + $0x118] sm:$0xff] %v650_v37  ;;  %v654_v39 = vld [vmem:[%s4227_s22 + $0x578] sm:$0xff]  ;;  %v656_v40 = vld [vmem:[%s4227_s22 + $0x640] sm:$0xff]  ;;  %s6932_s20 = smov (%p705_p8, %s704_s20), 0 }
  0x9e   : >> { %653 = vst [vmem:[%s4223_s28 + $0x150] sm:$0xff] %v652_v38  ;;  %655 = vst [vmem:[%s4223_s28 + $0x188] sm:$0xff] %v654_v39  ;;  %v658_v41 = vld [vmem:[%s4227_s22 + $0x708] sm:$0xff]  ;;  %v660_v42 = vld [vmem:[%s4227_s22 + $0x7d0] sm:$0xff]  ;;  %s3467_s24 = sshll.u32 %s6932_s20, 3  ;;  %s6896_s25 = smov %s6932_s20 }
  0x9f   : >> { %657 = vst [vmem:[%s4223_s28 + $0x1c0] sm:$0xff] %v656_v40  ;;  %v662_v43 = vld [vmem:[%s4227_s22 + $0x898] sm:$0xff]  ;;  %659 = vst [vmem:[%s4223_s28 + $0x1f8] sm:$0xff] %v658_v41  ;;  %v664_v44 = vld [vmem:[%s4227_s22 + $0x960] sm:$0xff]  ;;  %s4935_s6 = scalar_lea.vmem %s4865_s17, %s3467_s24   ;;  %s710_s8 = scalar_lea.vmem %s4868_s7, %s3467_s24 [#allocation2]  }
  0xa0   : >> { %661 = vst [vmem:[%s4223_s28 + $0x230] sm:$0xff] %v660_v42  ;;  %663 = vst [vmem:[%s4223_s28 + $0x268] sm:$0xff] %v662_v43  ;;  %v666_v45 = vld [vmem:[%s4227_s22 + $0xa28] sm:$0xff]  ;;  %v668_v46 = vld [vmem:[%s4227_s22 + $0xaf0] sm:$0xff] }
  0xa1   : >> { %665 = vst [vmem:[%s4223_s28 + $0x2a0] sm:$0xff] %v664_v44  ;;  %667 = vst [vmem:[%s4223_s28 + $0x2d8] sm:$0xff] %v666_v45  ;;  %v670_v47 = vld [vmem:[%s4227_s22 + $0xbb8] sm:$0xff]  ;;  %v672_v48 = vld [vmem:[%s4227_s22 + $0xc80] sm:$0xff] }
  0xa2   : >> { %669 = vst [vmem:[%s4223_s28 + $0x310] sm:$0xff] %v668_v46  ;;  %v674_v49 = vld [vmem:[%s4227_s22 + $0xd48] sm:$0xff]  ;;  %671 = vst [vmem:[%s4223_s28 + $0x348] sm:$0xff] %v670_v47  ;;  %v676_v50 = vld [vmem:[%s4227_s22 + $0xe10] sm:$0xff] }
  0xa3   : >> { %673 = vst [vmem:[%s4223_s28 + $0x380] sm:$0xff] %v672_v48  ;;  %675 = vst [vmem:[%s4223_s28 + $0x3b8] sm:$0xff] %v674_v49  ;;  %v678_v51 = vld [vmem:[%s4227_s22 + $0xed8] sm:$0xff]  ;;  %v680_v52 = vld [vmem:[%s4227_s22 + $0xfa0] sm:$0xff] }
  0xa4   : >> { %677 = vst [vmem:[%s4223_s28 + $0x3f0] sm:$0xff] %v676_v50  ;;  %679 = vst [vmem:[%s4223_s28 + $0x428] sm:$0xff] %v678_v51  ;;  %v682_v53 = vld [vmem:[%s4227_s22 + $0x1068] sm:$0xff]  ;;  %v684_v54 = vld [vmem:[%s4227_s22 + $0x1130] sm:$0xff]  ;;  %636 = sbr.rel (!%p633_p9) target bundleno = 154 (0x9a), region = 264 }
  0xa5   : >> { %681 = vst [vmem:[%s4223_s28 + $0x460] sm:$0xff] %v680_v52  ;;  %v686_v55 = vld [vmem:[%s4227_s22 + $0x11f8] sm:$0xff]  ;;  %683 = vst [vmem:[%s4223_s28 + $0x498] sm:$0xff] %v682_v53  ;;  %v688_v56 = vld [vmem:[%s4227_s22 + $0x12c0] sm:$0xff] }
  0xa6   : >> { %685 = vst [vmem:[%s4223_s28 + $0x4d0] sm:$0xff] %v684_v54  ;;  %687 = vst [vmem:[%s4223_s28 + $0x508] sm:$0xff] %v686_v55  ;;  %v690_v57 = vld [vmem:[%s4227_s22 + $0x1388] sm:$0xff]  ;;  %v692_v58 = vld [vmem:[%s4227_s22 + $0x1450] sm:$0xff] }
  0xa7   : >> { %689 = vst [vmem:[%s4223_s28 + $0x540] sm:$0xff] %v688_v56  ;;  %691 = vst [vmem:[%s4223_s28 + $0x578] sm:$0xff] %v690_v57  ;;  %v694_v59 = vld [vmem:[%s4227_s22 + $0x1518] sm:$0xff]  ;;  %v696_v60 = vld [vmem:[%s4227_s22 + $0x15e0] sm:$0xff] }
  0xa8   : >> { %693 = vst [vmem:[%s4223_s28 + $0x5b0] sm:$0xff] %v692_v58  ;;  %v698_v61 = vld [vmem:[%s4227_s22 + $0x16a8] sm:$0xff]  ;;  %695 = vst [vmem:[%s4223_s28 + $0x5e8] sm:$0xff] %v694_v59  ;;  %v700_v62 = vld [vmem:[%s4227_s22 + $0x1770] sm:$0xff] }
  0xa9   : >> { %697 = vst [vmem:[%s4223_s28 + $0x620] sm:$0xff] %v696_v60  ;;  %699 = vst [vmem:[%s4223_s28 + $0x658] sm:$0xff] %v698_v61  ;;  %v702_v63 = vld [vmem:[%s4227_s22 + $0x1838] sm:$0xff]  ;;  %s6895_s22 = smov %s4935_s6 }
  0xaa   : >> { %701 = vst [vmem:[%s4223_s28 + $0x690] sm:$0xff] %v700_v62  ;;  %703 = vst [vmem:[%s4223_s28 + $0x6c8] sm:$0xff] %v702_v63  ;;  %s6894_s28 = smov %s710_s8 }
  0xab PF: > { %s4301_s4 = smov 0  }
  0xac   : > { %s4976_s15 = sshllo.u32 %s4301_s4, %s4377_s3 }
  0xad   : > { %v720_v0 = vld [vmem:[%s4679_s21] sm:%s4976_s15]  ;;  %v722_v1 = vld [vmem:[%s4679_s21 + $0xc8] sm:%s4976_s15] }
  0xae   : > { %721 = vst [vmem:[%s4682_s23] sm:%s4976_s15] %v720_v0  ;;  %723 = vst [vmem:[%s4682_s23 + $0x38] sm:%s4976_s15] %v722_v1 }
  0xaf   : > { %v724_v2 = vld [vmem:[%s4679_s21 + $0x190] sm:%s4976_s15]  ;;  %v726_v3 = vld [vmem:[%s4679_s21 + $0x258] sm:%s4976_s15] }
  0xb0   : > { %725 = vst [vmem:[%s4682_s23 + $0x70] sm:%s4976_s15] %v724_v2  ;;  %727 = vst [vmem:[%s4682_s23 + $0xa8] sm:%s4976_s15] %v726_v3 }
  0xb1   : > { %v728_v4 = vld [vmem:[%s4679_s21 + $0x320] sm:%s4976_s15]  ;;  %v730_v5 = vld [vmem:[%s4679_s21 + $0x3e8] sm:%s4976_s15] }
  0xb2   : > { %729 = vst [vmem:[%s4682_s23 + $0xe0] sm:%s4976_s15] %v728_v4  ;;  %731 = vst [vmem:[%s4682_s23 + $0x118] sm:%s4976_s15] %v730_v5 }
  0xb3   : > { %v732_v6 = vld [vmem:[%s4679_s21 + $0x4b0] sm:%s4976_s15]  ;;  %v734_v7 = vld [vmem:[%s4679_s21 + $0x578] sm:%s4976_s15] }
  0xb4   : > { %733 = vst [vmem:[%s4682_s23 + $0x150] sm:%s4976_s15] %v732_v6  ;;  %735 = vst [vmem:[%s4682_s23 + $0x188] sm:%s4976_s15] %v734_v7 }
  0xb5   : > { %v736_v8 = vld [vmem:[%s4679_s21 + $0x640] sm:%s4976_s15]  ;;  %v738_v9 = vld [vmem:[%s4679_s21 + $0x708] sm:%s4976_s15] }
  0xb6   : > { %737 = vst [vmem:[%s4682_s23 + $0x1c0] sm:%s4976_s15] %v736_v8  ;;  %739 = vst [vmem:[%s4682_s23 + $0x1f8] sm:%s4976_s15] %v738_v9 }
  0xb7   : > { %v740_v10 = vld [vmem:[%s4679_s21 + $0x7d0] sm:%s4976_s15]  ;;  %v742_v11 = vld [vmem:[%s4679_s21 + $0x898] sm:%s4976_s15] }
  0xb8   : > { %741 = vst [vmem:[%s4682_s23 + $0x230] sm:%s4976_s15] %v740_v10  ;;  %743 = vst [vmem:[%s4682_s23 + $0x268] sm:%s4976_s15] %v742_v11 }
  0xb9   : > { %v744_v12 = vld [vmem:[%s4679_s21 + $0x960] sm:%s4976_s15]  ;;  %v746_v13 = vld [vmem:[%s4679_s21 + $0xa28] sm:%s4976_s15] }
  0xba   : > { %745 = vst [vmem:[%s4682_s23 + $0x2a0] sm:%s4976_s15] %v744_v12  ;;  %747 = vst [vmem:[%s4682_s23 + $0x2d8] sm:%s4976_s15] %v746_v13 }
  0xbb   : > { %v748_v14 = vld [vmem:[%s4679_s21 + $0xaf0] sm:%s4976_s15]  ;;  %v750_v15 = vld [vmem:[%s4679_s21 + $0xbb8] sm:%s4976_s15] }
  0xbc   : > { %749 = vst [vmem:[%s4682_s23 + $0x310] sm:%s4976_s15] %v748_v14  ;;  %751 = vst [vmem:[%s4682_s23 + $0x348] sm:%s4976_s15] %v750_v15 }
  0xbd   : > { %v752_v16 = vld [vmem:[%s4679_s21 + $0xc80] sm:%s4976_s15]  ;;  %v754_v17 = vld [vmem:[%s4679_s21 + $0xd48] sm:%s4976_s15] }
  0xbe   : > { %753 = vst [vmem:[%s4682_s23 + $0x380] sm:%s4976_s15] %v752_v16  ;;  %755 = vst [vmem:[%s4682_s23 + $0x3b8] sm:%s4976_s15] %v754_v17 }
  0xbf   : > { %v756_v18 = vld [vmem:[%s4679_s21 + $0xe10] sm:%s4976_s15]  ;;  %v758_v19 = vld [vmem:[%s4679_s21 + $0xed8] sm:%s4976_s15] }
  0xc0   : > { %757 = vst [vmem:[%s4682_s23 + $0x3f0] sm:%s4976_s15] %v756_v18  ;;  %759 = vst [vmem:[%s4682_s23 + $0x428] sm:%s4976_s15] %v758_v19 }
  0xc1   : > { %v760_v20 = vld [vmem:[%s4679_s21 + $0xfa0] sm:%s4976_s15]  ;;  %v762_v21 = vld [vmem:[%s4679_s21 + $0x1068] sm:%s4976_s15] }
  0xc2   : > { %761 = vst [vmem:[%s4682_s23 + $0x460] sm:%s4976_s15] %v760_v20  ;;  %763 = vst [vmem:[%s4682_s23 + $0x498] sm:%s4976_s15] %v762_v21 }
  0xc3   : > { %v764_v22 = vld [vmem:[%s4679_s21 + $0x1130] sm:%s4976_s15]  ;;  %v766_v23 = vld [vmem:[%s4679_s21 + $0x11f8] sm:%s4976_s15] }
  0xc4   : > { %765 = vst [vmem:[%s4682_s23 + $0x4d0] sm:%s4976_s15] %v764_v22  ;;  %767 = vst [vmem:[%s4682_s23 + $0x508] sm:%s4976_s15] %v766_v23 }
  0xc5   : > { %v768_v24 = vld [vmem:[%s4679_s21 + $0x12c0] sm:%s4976_s15]  ;;  %v770_v25 = vld [vmem:[%s4679_s21 + $0x1388] sm:%s4976_s15] }
  0xc6   : > { %769 = vst [vmem:[%s4682_s23 + $0x540] sm:%s4976_s15] %v768_v24  ;;  %771 = vst [vmem:[%s4682_s23 + $0x578] sm:%s4976_s15] %v770_v25 }
  0xc7   : > { %v772_v26 = vld [vmem:[%s4679_s21 + $0x1450] sm:%s4976_s15]  ;;  %v774_v27 = vld [vmem:[%s4679_s21 + $0x1518] sm:%s4976_s15] }
  0xc8   : > { %773 = vst [vmem:[%s4682_s23 + $0x5b0] sm:%s4976_s15] %v772_v26  ;;  %775 = vst [vmem:[%s4682_s23 + $0x5e8] sm:%s4976_s15] %v774_v27 }
  0xc9   : > { %v776_v28 = vld [vmem:[%s4679_s21 + $0x15e0] sm:%s4976_s15]  ;;  %v778_v29 = vld [vmem:[%s4679_s21 + $0x16a8] sm:%s4976_s15] }
  0xca   : > { %777 = vst [vmem:[%s4682_s23 + $0x620] sm:%s4976_s15] %v776_v28  ;;  %779 = vst [vmem:[%s4682_s23 + $0x658] sm:%s4976_s15] %v778_v29 }
  0xcb   : > { %v780_v30 = vld [vmem:[%s4679_s21 + $0x1770] sm:%s4976_s15]  ;;  %v782_v31 = vld [vmem:[%s4679_s21 + $0x1838] sm:%s4976_s15] }
  0xcc   : > { %781 = vst [vmem:[%s4682_s23 + $0x690] sm:%s4976_s15] %v780_v30  ;;  %783 = vst [vmem:[%s4682_s23 + $0x6c8] sm:%s4976_s15] %v782_v31 }
  0xcd PF: > { %p3469_p10 = scmp.ge.u32.totalorder %s4371_s29, 8 }
  0xce   : > { %s4302_s3 = smov (!%p3469_p10), 0  }
  0xcf   : > { %146 = sbr.rel (%p3469_p10) target bundleno = 240 (0xf0), region = 36  ;;  %s5108_s21 = sshllo.u32 (!%p3469_p10), %s4302_s3, %s4371_s29 }
  0xd0   : > { %v156_v32 = vld [vmem:[%s4369_s27] sm:%s5108_s21] (!%p3469_p10)  ;;  %v158_v33 = vld [vmem:[%s4369_s27 + $0xc8] sm:%s5108_s21] (!%p3469_p10) }
  0xd1   : > { %157 = vst [vmem:[%s4373_s30] sm:%s5108_s21] (!%p3469_p10), %v156_v32  ;;  %159 = vst [vmem:[%s4373_s30 + $0x38] sm:%s5108_s21] (!%p3469_p10), %v158_v33 }
  0xd2   : > { %v160_v34 = vld [vmem:[%s4369_s27 + $0x190] sm:%s5108_s21] (!%p3469_p10)  ;;  %v162_v35 = vld [vmem:[%s4369_s27 + $0x258] sm:%s5108_s21] (!%p3469_p10) }
  0xd3   : > { %161 = vst [vmem:[%s4373_s30 + $0x70] sm:%s5108_s21] (!%p3469_p10), %v160_v34  ;;  %163 = vst [vmem:[%s4373_s30 + $0xa8] sm:%s5108_s21] (!%p3469_p10), %v162_v35 }
  0xd4   : > { %v164_v36 = vld [vmem:[%s4369_s27 + $0x320] sm:%s5108_s21] (!%p3469_p10)  ;;  %v166_v37 = vld [vmem:[%s4369_s27 + $0x3e8] sm:%s5108_s21] (!%p3469_p10) }
  0xd5   : > { %165 = vst [vmem:[%s4373_s30 + $0xe0] sm:%s5108_s21] (!%p3469_p10), %v164_v36  ;;  %167 = vst [vmem:[%s4373_s30 + $0x118] sm:%s5108_s21] (!%p3469_p10), %v166_v37 }
  0xd6   : > { %v168_v38 = vld [vmem:[%s4369_s27 + $0x4b0] sm:%s5108_s21]  ;;  %v170_v39 = vld [vmem:[%s4369_s27 + $0x578] sm:%s5108_s21] }
  0xd7   : > { %169 = vst [vmem:[%s4373_s30 + $0x150] sm:%s5108_s21] %v168_v38  ;;  %171 = vst [vmem:[%s4373_s30 + $0x188] sm:%s5108_s21] %v170_v39 }
  0xd8   : > { %v172_v40 = vld [vmem:[%s4369_s27 + $0x640] sm:%s5108_s21]  ;;  %v174_v41 = vld [vmem:[%s4369_s27 + $0x708] sm:%s5108_s21] }
  0xd9   : > { %173 = vst [vmem:[%s4373_s30 + $0x1c0] sm:%s5108_s21] %v172_v40  ;;  %175 = vst [vmem:[%s4373_s30 + $0x1f8] sm:%s5108_s21] %v174_v41 }
  0xda   : > { %v176_v42 = vld [vmem:[%s4369_s27 + $0x7d0] sm:%s5108_s21]  ;;  %v178_v43 = vld [vmem:[%s4369_s27 + $0x898] sm:%s5108_s21] }
  0xdb   : > { %177 = vst [vmem:[%s4373_s30 + $0x230] sm:%s5108_s21] %v176_v42  ;;  %179 = vst [vmem:[%s4373_s30 + $0x268] sm:%s5108_s21] %v178_v43 }
  0xdc   : > { %v180_v44 = vld [vmem:[%s4369_s27 + $0x960] sm:%s5108_s21]  ;;  %v182_v45 = vld [vmem:[%s4369_s27 + $0xa28] sm:%s5108_s21] }
  0xdd   : > { %181 = vst [vmem:[%s4373_s30 + $0x2a0] sm:%s5108_s21] %v180_v44  ;;  %183 = vst [vmem:[%s4373_s30 + $0x2d8] sm:%s5108_s21] %v182_v45 }
  0xde   : > { %v184_v46 = vld [vmem:[%s4369_s27 + $0xaf0] sm:%s5108_s21]  ;;  %v186_v47 = vld [vmem:[%s4369_s27 + $0xbb8] sm:%s5108_s21] }
  0xdf   : > { %185 = vst [vmem:[%s4373_s30 + $0x310] sm:%s5108_s21] %v184_v46  ;;  %187 = vst [vmem:[%s4373_s30 + $0x348] sm:%s5108_s21] %v186_v47 }
  0xe0   : > { %v188_v48 = vld [vmem:[%s4369_s27 + $0xc80] sm:%s5108_s21]  ;;  %v190_v49 = vld [vmem:[%s4369_s27 + $0xd48] sm:%s5108_s21] }
  0xe1   : > { %189 = vst [vmem:[%s4373_s30 + $0x380] sm:%s5108_s21] %v188_v48  ;;  %191 = vst [vmem:[%s4373_s30 + $0x3b8] sm:%s5108_s21] %v190_v49 }
  0xe2   : > { %v192_v50 = vld [vmem:[%s4369_s27 + $0xe10] sm:%s5108_s21]  ;;  %v194_v51 = vld [vmem:[%s4369_s27 + $0xed8] sm:%s5108_s21] }
  0xe3   : > { %193 = vst [vmem:[%s4373_s30 + $0x3f0] sm:%s5108_s21] %v192_v50  ;;  %195 = vst [vmem:[%s4373_s30 + $0x428] sm:%s5108_s21] %v194_v51 }
  0xe4   : > { %v196_v52 = vld [vmem:[%s4369_s27 + $0xfa0] sm:%s5108_s21]  ;;  %v198_v53 = vld [vmem:[%s4369_s27 + $0x1068] sm:%s5108_s21] }
  0xe5   : > { %197 = vst [vmem:[%s4373_s30 + $0x460] sm:%s5108_s21] %v196_v52  ;;  %199 = vst [vmem:[%s4373_s30 + $0x498] sm:%s5108_s21] %v198_v53 }
  0xe6   : > { %v200_v54 = vld [vmem:[%s4369_s27 + $0x1130] sm:%s5108_s21]  ;;  %v202_v55 = vld [vmem:[%s4369_s27 + $0x11f8] sm:%s5108_s21] }
  0xe7   : > { %201 = vst [vmem:[%s4373_s30 + $0x4d0] sm:%s5108_s21] %v200_v54  ;;  %203 = vst [vmem:[%s4373_s30 + $0x508] sm:%s5108_s21] %v202_v55 }
  0xe8   : > { %v204_v56 = vld [vmem:[%s4369_s27 + $0x12c0] sm:%s5108_s21]  ;;  %v206_v57 = vld [vmem:[%s4369_s27 + $0x1388] sm:%s5108_s21] }
  0xe9   : > { %205 = vst [vmem:[%s4373_s30 + $0x540] sm:%s5108_s21] %v204_v56  ;;  %207 = vst [vmem:[%s4373_s30 + $0x578] sm:%s5108_s21] %v206_v57 }
  0xea   : > { %v208_v58 = vld [vmem:[%s4369_s27 + $0x1450] sm:%s5108_s21]  ;;  %v210_v59 = vld [vmem:[%s4369_s27 + $0x1518] sm:%s5108_s21] }
  0xeb   : > { %209 = vst [vmem:[%s4373_s30 + $0x5b0] sm:%s5108_s21] %v208_v58  ;;  %211 = vst [vmem:[%s4373_s30 + $0x5e8] sm:%s5108_s21] %v210_v59 }
  0xec   : > { %v212_v60 = vld [vmem:[%s4369_s27 + $0x15e0] sm:%s5108_s21]  ;;  %v214_v61 = vld [vmem:[%s4369_s27 + $0x16a8] sm:%s5108_s21] }
  0xed   : > { %213 = vst [vmem:[%s4373_s30 + $0x620] sm:%s5108_s21] %v212_v60  ;;  %215 = vst [vmem:[%s4373_s30 + $0x658] sm:%s5108_s21] %v214_v61 }
  0xee   : > { %v216_v62 = vld [vmem:[%s4369_s27 + $0x1770] sm:%s5108_s21]  ;;  %v218_v63 = vld [vmem:[%s4369_s27 + $0x1838] sm:%s5108_s21] }
  0xef   : > { %217 = vst [vmem:[%s4373_s30 + $0x690] sm:%s5108_s21] %v216_v62  ;;  %219 = vst [vmem:[%s4373_s30 + $0x6c8] sm:%s5108_s21] %v218_v63 }
  0xf0 PF: > { %p3470_p11 = scmp.ge.s32.totalorder %s4171_s13, 1  ;;  %p786_p12 = scmp.lt.s32.totalorder %s4171_s13, 5 }
  0xf2   : > { %p787_p13 = pnand %p3470_p11, %p786_p12 }
  0xf3   : > { %s793_s29 = sand.u32 (!%p787_p13), 1, %s4155_s9   ;;  %v3954_v0 = vld [vmem:[%s6874_s1 + $0x4] ss:$8 sps:$4 sm:$0xff] (!%p787_p13)  }
  0xf4   : > { %790 = sbr.rel (%p787_p13) target bundleno = 1019 (0x3fb), region = 90  ;;  %1608 = vmatprep.mubr.bf16.mxu0 (!%p787_p13), %v3954_v0  ;;  %1801 = vmatprep.mubr.bf16.mxu1 (!%p787_p13), %v3954_v0 }
  0xf5   : > { %s5244_s16 = smul.u32 (!%p787_p13), 1792, %s793_s29 }
  0xf7   : > { %s5247_s27 = scalar_lea.vmem (!%p787_p13), [#allocation2], %s5244_s16  ;;  %s5738_s22 = scalar_lea.vmem (!%p787_p13), [#allocation3], %s5244_s16  }
  0xf8   : > { %v825_v1 = vld [vmem:[%s5247_s27 + $0x8] sm:$0xff] (!%p787_p13)  ;;  %v832_v2 = vld [vmem:[%s5247_s27 + $0x40] sm:$0xff] (!%p787_p13)  ;;  %v827_v3 = vld [vmem:[%s5247_s27 + $0x18] sm:$0xff] (!%p787_p13) }
  0xf9   : > { %v1049_v4 = vmax.f32 (!%p787_p13), %v825_v1, 0.0  ;;  %v1056_v5 = vmax.f32 (!%p787_p13), %v832_v2, 0.0  ;;  %v834_v6 = vld [vmem:[%s5247_s27 + $0x50] sm:$0xff] (!%p787_p13)  ;;  %v1051_v7 = vmax.f32 (!%p787_p13), %v827_v3, 0.0  ;;  %v824_v8 = vld [vmem:[%s5247_s27] sm:$0xff] (!%p787_p13)  ;;  %v831_v9 = vld [vmem:[%s5247_s27 + $0x38] sm:$0xff] (!%p787_p13) }
  0xfa   : > { %v1058_v10 = vmax.f32 (!%p787_p13), %v834_v6, 0.0  ;;  %v1048_v11 = vmax.f32 (!%p787_p13), %v824_v8, 0.0  ;;  %v1055_v12 = vmax.f32 (!%p787_p13), %v831_v9, 0.0  ;;  %v826_v13 = vld [vmem:[%s5247_s27 + $0x10] sm:$0xff] (!%p787_p13)  ;;  %v833_v14 = vld [vmem:[%s5247_s27 + $0x48] sm:$0xff] (!%p787_p13)  ;;  %v839_v15 = vld [vmem:[%s5247_s27 + $0x78] sm:$0xff] (!%p787_p13) }
  0xfb   : > { %v1305_v16 = vpack.c.bf16 %v1056_v5, %v1049_v4  ;;  %v1050_v17 = vmax.f32 %v826_v13, 0.0  ;;  %v1057_v18 = vmax.f32 %v833_v14, 0.0  ;;  %v846_v19 = vld [vmem:[%s5247_s27 + $0xb0] sm:$0xff]  ;;  %v1063_v20 = vmax.f32 %v839_v15, 0.0  ;;  %v841_v21 = vld [vmem:[%s5247_s27 + $0x88] sm:$0xff]  ;;  %v848_v22 = vld [vmem:[%s5247_s27 + $0xc0] sm:$0xff] }
  0xfc   : > { %v1307_v23 = vpack.c.bf16 %v1058_v10, %v1051_v7  ;;  %v1304_v24 = vpack.c.bf16 %v1055_v12, %v1048_v11  ;;  %v1070_v25 = vmax.f32 %v846_v19, 0.0  ;;  %v1065_v26 = vmax.f32 %v841_v21, 0.0  ;;  %v838_v27 = vld [vmem:[%s5247_s27 + $0x70] sm:$0xff]  ;;  %v845_v28 = vld [vmem:[%s5247_s27 + $0xa8] sm:$0xff]  ;;  %v840_v29 = vld [vmem:[%s5247_s27 + $0x80] sm:$0xff]  ;;  %s2547_s16 = smul.u32 (%p4355_p6), 7, %s4163_s11 }
  0xfd   : > { %1576 = vmatprep.subr.bf16.mxu0 %v1305_v16  ;;  %v1306_v30 = vpack.c.bf16 %v1057_v18, %v1050_v17  ;;  %v1072_v31 = vmax.f32 %v848_v22, 0.0  ;;  %v1062_v32 = vmax.f32 %v838_v27, 0.0  ;;  %v1069_v33 = vmax.f32 %v845_v28, 0.0  ;;  %v847_v34 = vld [vmem:[%s5247_s27 + $0xb8] sm:$0xff]  ;;  %v853_v35 = vld [vmem:[%s5247_s27 + $0xe8] sm:$0xff]  ;;  %v860_v36 = vld [vmem:[%s5247_s27 + $0x120] sm:$0xff] }
  0xfe   : > { %1769 = vmatprep.subr.bf16.mxu1 %v1307_v23  ;;  %1577 = vmatpush1.bf16.msra.mxu0 %v1304_v24  ;;  %v1312_v37 = vpack.c.bf16 %v1070_v25, %v1063_v20  ;;  %v1064_v38 = vmax.f32 %v840_v29, 0.0  ;;  %v1071_v39 = vmax.f32 %v847_v34, 0.0  ;;  %v1077_v40 = vmax.f32 %v853_v35, 0.0  ;;  %v855_v41 = vld [vmem:[%s5247_s27 + $0xf8] sm:$0xff]  ;;  %v862_v42 = vld [vmem:[%s5247_s27 + $0x130] sm:$0xff]  ;;  %v852_v43 = vld [vmem:[%s5247_s27 + $0xe0] sm:$0xff] }
  0xff   : > { %1770 = vmatpush1.bf16.msra.mxu1 %v1306_v30  ;;  %v1314_v44 = vpack.c.bf16 %v1072_v31, %v1065_v26  ;;  %v1311_v45 = vpack.c.bf16 %v1069_v33, %v1062_v32  ;;  %v1084_v46 = vmax.f32 %v860_v36, 0.0  ;;  %v1079_v47 = vmax.f32 %v855_v41, 0.0  ;;  %v859_v48 = vld [vmem:[%s5247_s27 + $0x118] sm:$0xff]  ;;  %v854_v49 = vld [vmem:[%s5247_s27 + $0xf0] sm:$0xff]  ;;  %v861_v50 = vld [vmem:[%s5247_s27 + $0x128] sm:$0xff]  ;;  %s3535_s25 = smul.u32 (%p4355_p6), 56, %s4163_s11 }
 0x100   : > { %1578 = vmatprep.subr.bf16.mxu0 %v1312_v37  ;;  %v1313_v51 = vpack.c.bf16 %v1071_v39, %v1064_v38  ;;  %v1086_v52 = vmax.f32 %v862_v42, 0.0  ;;  %v1076_v53 = vmax.f32 %v852_v43, 0.0  ;;  %v1083_v54 = vmax.f32 %v859_v48, 0.0  ;;  %v867_v55 = vld [vmem:[%s5247_s27 + $0x158] sm:$0xff]  ;;  %v874_v56 = vld [vmem:[%s5247_s27 + $0x190] sm:$0xff]  ;;  %v869_v57 = vld [vmem:[%s5247_s27 + $0x168] sm:$0xff] }
 0x101   : > { %1771 = vmatprep.subr.bf16.mxu1 %v1314_v44  ;;  %v1319_v58 = vpack.c.bf16 %v1084_v46, %v1077_v40  ;;  %v1078_v59 = vmax.f32 %v854_v49, 0.0  ;;  %v1085_v60 = vmax.f32 %v861_v50, 0.0  ;;  %v1091_v61 = vmax.f32 %v867_v55, 0.0  ;;  %v876_v62 = vld [vmem:[%s5247_s27 + $0x1a0] sm:$0xff]  ;;  %v866_v63 = vld [vmem:[%s5247_s27 + $0x150] sm:$0xff]  ;;  %v873_v0 = vld [vmem:[%s5247_s27 + $0x188] sm:$0xff]  ;;  %s5989_s6 = scalar_lea.vmem (%p4355_p6), %s6875_s2, %s3535_s25  }
 0x102   : > { %1579 = vmatpush1.bf16.msra.mxu0 %v1311_v45  ;;  %v1321_v1 = vpack.c.bf16 %v1086_v52, %v1079_v47  ;;  %v1318_v2 = vpack.c.bf16 %v1083_v54, %v1076_v53  ;;  %v1098_v3 = vmax.f32 %v874_v56, 0.0  ;;  %v1093_v4 = vmax.f32 %v869_v57, 0.0  ;;  %v868_v5 = vld [vmem:[%s5247_s27 + $0x160] sm:$0xff]  ;;  %v875_v6 = vld [vmem:[%s5247_s27 + $0x198] sm:$0xff]  ;;  %v881_v7 = vld [vmem:[%s5247_s27 + $0x1c8] sm:$0xff]  ;;  %s2548_s26 = ssub.s32 (%p4355_p6), 25, %s2547_s16 }
 0x103   : > { %1772 = vmatpush1.bf16.msra.mxu1 %v1313_v51  ;;  %1580 = vmatprep.subr.bf16.mxu0 %v1319_v58  ;;  %v1320_v8 = vpack.c.bf16 %v1085_v60, %v1078_v59  ;;  %v1100_v9 = vmax.f32 %v876_v62, 0.0  ;;  %v1090_v10 = vmax.f32 %v866_v63, 0.0  ;;  %v1097_v11 = vmax.f32 %v873_v0, 0.0  ;;  %v888_v12 = vld [vmem:[%s5247_s27 + $0x200] sm:$0xff]  ;;  %v883_v13 = vld [vmem:[%s5247_s27 + $0x1d8] sm:$0xff]  ;;  %v890_v14 = vld [vmem:[%s5247_s27 + $0x210] sm:$0xff] }
 0x104   : > { %1773 = vmatprep.subr.bf16.mxu1 %v1321_v1  ;;  %v1326_v15 = vpack.c.bf16 %v1098_v3, %v1091_v61  ;;  %v1092_v16 = vmax.f32 %v868_v5, 0.0  ;;  %v1099_v17 = vmax.f32 %v875_v6, 0.0  ;;  %v1105_v18 = vmax.f32 %v881_v7, 0.0  ;;  %v880_v19 = vld [vmem:[%s5247_s27 + $0x1c0] sm:$0xff]  ;;  %v887_v20 = vld [vmem:[%s5247_s27 + $0x1f8] sm:$0xff]  ;;  %v882_v21 = vld [vmem:[%s5247_s27 + $0x1d0] sm:$0xff] }
 0x105   : > { %v1328_v22 = vpack.c.bf16 %v1100_v9, %v1093_v4  ;;  %v1325_v23 = vpack.c.bf16 %v1097_v11, %v1090_v10  ;;  %v1112_v24 = vmax.f32 %v888_v12, 0.0  ;;  %v1107_v25 = vmax.f32 %v883_v13, 0.0  ;;  %v889_v26 = vld [vmem:[%s5247_s27 + $0x208] sm:$0xff]  ;;  %v895_v27 = vld [vmem:[%s5247_s27 + $0x238] sm:$0xff]  ;;  %v902_v28 = vld [vmem:[%s5247_s27 + $0x270] sm:$0xff]  ;;  %p2549_p0 = scmp.lt.s32.totalorder (%p4355_p6), %s2548_s26, 7 }
 0x106   : > { %1581 = vmatpush1.bf16.msra.mxu0 %v1318_v2  ;;  %v1327_v29 = vpack.c.bf16 %v1099_v17, %v1092_v16  ;;  %v1114_v30 = vmax.f32 %v890_v14, 0.0  ;;  %v1104_v31 = vmax.f32 %v880_v19, 0.0  ;;  %v1111_v32 = vmax.f32 %v887_v20, 0.0  ;;  %v897_v33 = vld [vmem:[%s5247_s27 + $0x248] sm:$0xff]  ;;  %v904_v34 = vld [vmem:[%s5247_s27 + $0x280] sm:$0xff]  ;;  %v894_v35 = vld [vmem:[%s5247_s27 + $0x230] sm:$0xff] }
 0x107   : > { %1774 = vmatpush1.bf16.msra.mxu1 %v1320_v8  ;;  %1582 = vmatprep.subr.bf16.mxu0 %v1326_v15  ;;  %v1333_v36 = vpack.c.bf16 %v1112_v24, %v1105_v18  ;;  %v1106_v37 = vmax.f32 %v882_v21, 0.0  ;;  %v1113_v38 = vmax.f32 %v889_v26, 0.0  ;;  %v1119_v39 = vmax.f32 %v895_v27, 0.0  ;;  %v901_v40 = vld [vmem:[%s5247_s27 + $0x268] sm:$0xff]  ;;  %v896_v41 = vld [vmem:[%s5247_s27 + $0x240] sm:$0xff]  ;;  %v903_v45 = vld [vmem:[%s5247_s27 + $0x278] sm:$0xff] }
 0x108   : > { %1775 = vmatprep.subr.bf16.mxu1 %v1328_v22  ;;  %v1335_v42 = vpack.c.bf16 %v1114_v30, %v1107_v25  ;;  %v1126_v43 = vmax.f32 %v902_v28, 0.0  ;;  %v1121_v44 = vmax.f32 %v897_v33, 0.0  ;;  %v909_v46 = vld [vmem:[%s5247_s27 + $0x2a8] sm:$0xff]  ;;  %v916_v47 = vld [vmem:[%s5247_s27 + $0x2e0] sm:$0xff]  ;;  %v1128_v48 = vmax.f32 %v904_v34, 0.0  ;;  %v911_v51 = vld [vmem:[%s5247_s27 + $0x2b8] sm:$0xff] }
 0x109   : > { %v1118_v49 = vmax.f32 %v894_v35, 0.0  ;;  %v1125_v50 = vmax.f32 %v901_v40, 0.0  ;;  %v918_v52 = vld [vmem:[%s5247_s27 + $0x2f0] sm:$0xff]  ;;  %v1332_v53 = vpack.c.bf16 %v1111_v32, %v1104_v31  ;;  %v1334_v54 = vpack.c.bf16 %v1113_v38, %v1106_v37  ;;  %v908_v56 = vld [vmem:[%s5247_s27 + $0x2a0] sm:$0xff]  ;;  %v915_v57 = vld [vmem:[%s5247_s27 + $0x2d8] sm:$0xff] }
 0x10a   : > { %1583 = vmatpush1.bf16.msra.mxu0 %v1325_v23  ;;  %v1120_v55 = vmax.f32 %v896_v41, 0.0  ;;  %v910_v58 = vld [vmem:[%s5247_s27 + $0x2b0] sm:$0xff]  ;;  %v1340_v59 = vpack.c.bf16 %v1126_v43, %v1119_v39  ;;  %v1127_v60 = vmax.f32 %v903_v45, 0.0  ;;  %v1133_v61 = vmax.f32 %v909_v46, 0.0  ;;  %v917_v63 = vld [vmem:[%s5247_s27 + $0x2e8] sm:$0xff]  ;;  %v923_v0 = vld [vmem:[%s5247_s27 + $0x318] sm:$0xff] }
 0x10b   : > { %1776 = vmatpush1.bf16.msra.mxu1 %v1327_v29  ;;  %1584 = vmatprep.subr.bf16.mxu0 %v1333_v36  ;;  %v1140_v62 = vmax.f32 %v916_v47, 0.0  ;;  %v930_v1 = vld [vmem:[%s5247_s27 + $0x350] sm:$0xff]  ;;  %v1342_v2 = vpack.c.bf16 %v1128_v48, %v1121_v44  ;;  %v1135_v3 = vmax.f32 %v911_v51, 0.0  ;;  %v1142_v4 = vmax.f32 %v918_v52, 0.0  ;;  %v925_v8 = vld [vmem:[%s5247_s27 + $0x328] sm:$0xff]  ;;  %v932_v9 = vld [vmem:[%s5247_s27 + $0x360] sm:$0xff] }
 0x10c   : > { %1777 = vmatprep.subr.bf16.mxu1 %v1335_v42  ;;  %v1339_v5 = vpack.c.bf16 %v1125_v50, %v1118_v49  ;;  %v1132_v6 = vmax.f32 %v908_v56, 0.0  ;;  %v1139_v7 = vmax.f32 %v915_v57, 0.0  ;;  %v1134_v10 = vmax.f32 %v910_v58, 0.0  ;;  %v922_v14 = vld [vmem:[%s5247_s27 + $0x310] sm:$0xff]  ;;  %v929_v15 = vld [vmem:[%s5247_s27 + $0x348] sm:$0xff]  ;;  %v924_v18 = vld [vmem:[%s5247_s27 + $0x320] sm:$0xff] }
 0x10d   : > { %v1141_v11 = vmax.f32 %v917_v63, 0.0  ;;  %v1147_v12 = vmax.f32 %v923_v0, 0.0  ;;  %v1154_v13 = vmax.f32 %v930_v1, 0.0  ;;  %v1341_v16 = vpack.c.bf16 %v1127_v60, %v1120_v55  ;;  %v931_v22 = vld [vmem:[%s5247_s27 + $0x358] sm:$0xff]  ;;  %v937_v23 = vld [vmem:[%s5247_s27 + $0x388] sm:$0xff]  ;;  %v944_v24 = vld [vmem:[%s5247_s27 + $0x3c0] sm:$0xff] }
 0x10e   : > { %1585 = vmatpush1.bf16.msra.mxu0 %v1332_v53  ;;  %v1347_v17 = vpack.c.bf16 %v1140_v62, %v1133_v61  ;;  %v1349_v19 = vpack.c.bf16 %v1142_v4, %v1135_v3  ;;  %v1149_v20 = vmax.f32 %v925_v8, 0.0  ;;  %v1156_v21 = vmax.f32 %v932_v9, 0.0  ;;  %v939_v27 = vld [vmem:[%s5247_s27 + $0x398] sm:$0xff]  ;;  %v946_v28 = vld [vmem:[%s5247_s27 + $0x3d0] sm:$0xff]  ;;  %v936_v29 = vld [vmem:[%s5247_s27 + $0x380] sm:$0xff] }
 0x10f   : > { %1778 = vmatpush1.bf16.msra.mxu1 %v1334_v54  ;;  %1586 = vmatprep.subr.bf16.mxu0 %v1340_v59  ;;  %v1146_v25 = vmax.f32 %v922_v14, 0.0  ;;  %v1153_v26 = vmax.f32 %v929_v15, 0.0  ;;  %v1346_v30 = vpack.c.bf16 %v1139_v7, %v1132_v6  ;;  %v1348_v31 = vpack.c.bf16 %v1141_v11, %v1134_v10  ;;  %v943_v33 = vld [vmem:[%s5247_s27 + $0x3b8] sm:$0xff]  ;;  %v938_v34 = vld [vmem:[%s5247_s27 + $0x390] sm:$0xff]  ;;  %v945_v35 = vld [vmem:[%s5247_s27 + $0x3c8] sm:$0xff] }
 0x110   : > { %1779 = vmatprep.subr.bf16.mxu1 %v1342_v2  ;;  %v1354_v32 = vpack.c.bf16 %v1154_v13, %v1147_v12  ;;  %v1148_v36 = vmax.f32 %v924_v18, 0.0  ;;  %v1155_v37 = vmax.f32 %v931_v22, 0.0  ;;  %v1161_v38 = vmax.f32 %v937_v23, 0.0  ;;  %v951_v40 = vld [vmem:[%s5247_s27 + $0x3f8] sm:$0xff]  ;;  %v958_v41 = vld [vmem:[%s5247_s27 + $0x430] sm:$0xff]  ;;  %v953_v48 = vld [vmem:[%s5247_s27 + $0x408] sm:$0xff] }
 0x111   : > { %v1168_v39 = vmax.f32 %v944_v24, 0.0  ;;  %v1356_v42 = vpack.c.bf16 %v1156_v21, %v1149_v20  ;;  %v1163_v43 = vmax.f32 %v939_v27, 0.0  ;;  %v1170_v44 = vmax.f32 %v946_v28, 0.0  ;;  %v960_v49 = vld [vmem:[%s5247_s27 + $0x440] sm:$0xff]  ;;  %v950_v54 = vld [vmem:[%s5247_s27 + $0x3f0] sm:$0xff]  ;;  %v957_v55 = vld [vmem:[%s5247_s27 + $0x428] sm:$0xff] }
 0x112   : > { %1587 = vmatpush1.bf16.msra.mxu0 %v1339_v5  ;;  %v1353_v45 = vpack.c.bf16 %v1153_v26, %v1146_v25  ;;  %v1160_v46 = vmax.f32 %v936_v29, 0.0  ;;  %v1167_v47 = vmax.f32 %v943_v33, 0.0  ;;  %v1162_v50 = vmax.f32 %v938_v34, 0.0  ;;  %v952_v58 = vld [vmem:[%s5247_s27 + $0x400] sm:$0xff]  ;;  %v959_v62 = vld [vmem:[%s5247_s27 + $0x438] sm:$0xff]  ;;  %v965_v63 = vld [vmem:[%s5247_s27 + $0x468] sm:$0xff] }
 0x113   : > { %1780 = vmatpush1.bf16.msra.mxu1 %v1341_v16  ;;  %1588 = vmatprep.subr.bf16.mxu0 %v1347_v17  ;;  %v1169_v51 = vmax.f32 %v945_v35, 0.0  ;;  %v1175_v52 = vmax.f32 %v951_v40, 0.0  ;;  %v1182_v53 = vmax.f32 %v958_v41, 0.0  ;;  %v1355_v56 = vpack.c.bf16 %v1155_v37, %v1148_v36  ;;  %v972_v0 = vld [vmem:[%s5247_s27 + $0x4a0] sm:$0xff]  ;;  %v967_v3 = vld [vmem:[%s5247_s27 + $0x478] sm:$0xff]  ;;  %v974_v4 = vld [vmem:[%s5247_s27 + $0x4b0] sm:$0xff] }
 0x114   : > { %1781 = vmatprep.subr.bf16.mxu1 %v1349_v19  ;;  %v1361_v57 = vpack.c.bf16 %v1168_v39, %v1161_v38  ;;  %v1363_v59 = vpack.c.bf16 %v1170_v44, %v1163_v43  ;;  %v1177_v60 = vmax.f32 %v953_v48, 0.0  ;;  %v1184_v61 = vmax.f32 %v960_v49, 0.0  ;;  %v964_v5 = vld [vmem:[%s5247_s27 + $0x460] sm:$0xff]  ;;  %v971_v9 = vld [vmem:[%s5247_s27 + $0x498] sm:$0xff]  ;;  %v966_v10 = vld [vmem:[%s5247_s27 + $0x470] sm:$0xff] }
 0x115   : > { %v1174_v1 = vmax.f32 %v950_v54, 0.0  ;;  %v1181_v2 = vmax.f32 %v957_v55, 0.0  ;;  %v1360_v6 = vpack.c.bf16 %v1167_v47, %v1160_v46  ;;  %v1362_v7 = vpack.c.bf16 %v1169_v51, %v1162_v50  ;;  %v973_v11 = vld [vmem:[%s5247_s27 + $0x4a8] sm:$0xff]  ;;  %v979_v16 = vld [vmem:[%s5247_s27 + $0x4d8] sm:$0xff]  ;;  %v986_v17 = vld [vmem:[%s5247_s27 + $0x510] sm:$0xff] }
 0x116   : > { %1589 = vmatpush1.bf16.msra.mxu0 %v1346_v30  ;;  %v1368_v8 = vpack.c.bf16 %v1182_v53, %v1175_v52  ;;  %v1176_v12 = vmax.f32 %v952_v58, 0.0  ;;  %v1183_v13 = vmax.f32 %v959_v62, 0.0  ;;  %v1189_v14 = vmax.f32 %v965_v63, 0.0  ;;  %v981_v24 = vld [vmem:[%s5247_s27 + $0x4e8] sm:$0xff]  ;;  %v988_v25 = vld [vmem:[%s5247_s27 + $0x520] sm:$0xff]  ;;  %v978_v30 = vld [vmem:[%s5247_s27 + $0x4d0] sm:$0xff] }
 0x117   : > { %1782 = vmatpush1.bf16.msra.mxu1 %v1348_v31  ;;  %1590 = vmatprep.subr.bf16.mxu0 %v1354_v32  ;;  %v1196_v15 = vmax.f32 %v972_v0, 0.0  ;;  %v1370_v18 = vpack.c.bf16 %v1184_v61, %v1177_v60  ;;  %v1191_v19 = vmax.f32 %v967_v3, 0.0  ;;  %v1198_v20 = vmax.f32 %v974_v4, 0.0  ;;  %v985_v31 = vld [vmem:[%s5247_s27 + $0x508] sm:$0xff]  ;;  %v980_v34 = vld [vmem:[%s5247_s27 + $0x4e0] sm:$0xff]  ;;  %v987_v38 = vld [vmem:[%s5247_s27 + $0x518] sm:$0xff] }
 0x118   : > { %1783 = vmatprep.subr.bf16.mxu1 %v1356_v42  ;;  %v1367_v21 = vpack.c.bf16 %v1181_v2, %v1174_v1  ;;  %v1188_v22 = vmax.f32 %v964_v5, 0.0  ;;  %v1195_v23 = vmax.f32 %v971_v9, 0.0  ;;  %v1190_v26 = vmax.f32 %v966_v10, 0.0  ;;  %v993_v39 = vld [vmem:[%s5247_s27 + $0x548] sm:$0xff]  ;;  %v1000_v40 = vld [vmem:[%s5247_s27 + $0x580] sm:$0xff]  ;;  %v995_v43 = vld [vmem:[%s5247_s27 + $0x558] sm:$0xff] }
 0x119   : > { %v1197_v27 = vmax.f32 %v973_v11, 0.0  ;;  %v1203_v28 = vmax.f32 %v979_v16, 0.0  ;;  %v1210_v29 = vmax.f32 %v986_v17, 0.0  ;;  %v1369_v32 = vpack.c.bf16 %v1183_v13, %v1176_v12  ;;  %v1002_v44 = vld [vmem:[%s5247_s27 + $0x590] sm:$0xff]  ;;  %v999_v49 = vld [vmem:[%s5247_s27 + $0x578] sm:$0xff]  ;;  %v1001_v51 = vld [vmem:[%s5247_s27 + $0x588] sm:$0xff] }
 0x11a   : > { %1591 = vmatpush1.bf16.msra.mxu0 %v1353_v45  ;;  %v1375_v33 = vpack.c.bf16 %v1196_v15, %v1189_v14  ;;  %v1377_v35 = vpack.c.bf16 %v1198_v20, %v1191_v19  ;;  %v1205_v36 = vmax.f32 %v981_v24, 0.0  ;;  %v1212_v37 = vmax.f32 %v988_v25, 0.0  ;;  %v992_v45 = vld [vmem:[%s5247_s27 + $0x540] sm:$0xff]  ;;  %v994_v50 = vld [vmem:[%s5247_s27 + $0x550] sm:$0xff]  ;;  %v1009_v0 = vld [vmem:[%s5247_s27 + $0x5c8] sm:$0xff] }
 0x11b   : > { %1784 = vmatpush1.bf16.msra.mxu1 %v1355_v56  ;;  %1592 = vmatprep.subr.bf16.mxu0 %v1361_v57  ;;  %v1202_v41 = vmax.f32 %v978_v30, 0.0  ;;  %v1209_v42 = vmax.f32 %v985_v31, 0.0  ;;  %v1374_v46 = vpack.c.bf16 %v1195_v23, %v1188_v22  ;;  %v1376_v47 = vpack.c.bf16 %v1197_v27, %v1190_v26  ;;  %v1007_v56 = vld [vmem:[%s5247_s27 + $0x5b8] sm:$0xff]  ;;  %v1014_v57 = vld [vmem:[%s5247_s27 + $0x5f0] sm:$0xff]  ;;  %v1016_v1 = vld [vmem:[%s5247_s27 + $0x600] sm:$0xff] }
 0x11c   : > { %1785 = vmatprep.subr.bf16.mxu1 %v1363_v59  ;;  %v1382_v48 = vpack.c.bf16 %v1210_v29, %v1203_v28  ;;  %v1204_v52 = vmax.f32 %v980_v34, 0.0  ;;  %v1211_v53 = vmax.f32 %v987_v38, 0.0  ;;  %v1217_v54 = vmax.f32 %v993_v39, 0.0  ;;  %v1008_v10 = vld [vmem:[%s5247_s27 + $0x5c0] sm:$0xff]  ;;  %v1015_v11 = vld [vmem:[%s5247_s27 + $0x5f8] sm:$0xff]  ;;  %v1021_v12 = vld [vmem:[%s5247_s27 + $0x628] sm:$0xff] }
 0x11d   : > { %v1224_v55 = vmax.f32 %v1000_v40, 0.0  ;;  %v1384_v58 = vpack.c.bf16 %v1212_v37, %v1205_v36  ;;  %v1219_v59 = vmax.f32 %v995_v43, 0.0  ;;  %v1226_v60 = vmax.f32 %v1002_v44, 0.0  ;;  %v1028_v16 = vld [vmem:[%s5247_s27 + $0x660] sm:$0xff]  ;;  %v1023_v17 = vld [vmem:[%s5247_s27 + $0x638] sm:$0xff]  ;;  %v1022_v26 = vld [vmem:[%s5247_s27 + $0x630] sm:$0xff] }
 0x11e   : > { %1593 = vmatpush1.bf16.msra.mxu0 %v1360_v6  ;;  %v1381_v61 = vpack.c.bf16 %v1209_v42, %v1202_v41  ;;  %v1216_v62 = vmax.f32 %v992_v45, 0.0  ;;  %v1223_v63 = vmax.f32 %v999_v49, 0.0  ;;  %v1218_v2 = vmax.f32 %v994_v50, 0.0  ;;  %v1006_v6 = vld [vmem:[%s5247_s27 + $0x5b0] sm:$0xff]  ;;  %v1027_v25 = vld [vmem:[%s5247_s27 + $0x658] sm:$0xff]  ;;  %v1029_v27 = vld [vmem:[%s5247_s27 + $0x668] sm:$0xff] }
 0x11f   : > { %1786 = vmatpush1.bf16.msra.mxu1 %v1362_v7  ;;  %1594 = vmatprep.subr.bf16.mxu0 %v1368_v8  ;;  %v1225_v3 = vmax.f32 %v1001_v51, 0.0  ;;  %v1231_v4 = vmax.f32 %v1007_v56, 0.0  ;;  %v1238_v5 = vmax.f32 %v1014_v57, 0.0  ;;  %v1013_v7 = vld [vmem:[%s5247_s27 + $0x5e8] sm:$0xff]  ;;  %v1383_v8 = vpack.c.bf16 %v1211_v53, %v1204_v52  ;;  %v1044_v41 = vld [vmem:[%s5247_s27 + $0x6e0] sm:$0xff]  ;;  %v1043_v51 = vld [vmem:[%s5247_s27 + $0x6d8] sm:$0xff] }
 0x120   : > { %1787 = vmatprep.subr.bf16.mxu1 %v1370_v18  ;;  %v1389_v9 = vpack.c.bf16 %v1224_v55, %v1217_v54  ;;  %v1391_v13 = vpack.c.bf16 %v1226_v60, %v1219_v59  ;;  %v1233_v14 = vmax.f32 %v1009_v0, 0.0  ;;  %v1240_v15 = vmax.f32 %v1016_v1, 0.0  ;;  %v1030_v18 = vld [vmem:[%s5247_s27 + $0x670] sm:$0xff]  ;;  %v1037_v40 = vld [vmem:[%s5247_s27 + $0x6a8] sm:$0xff]  ;;  %v1036_v50 = vld [vmem:[%s5247_s27 + $0x6a0] sm:$0xff] }
 0x121   : > { %v1230_v19 = vmax.f32 %v1006_v6, 0.0  ;;  %v1237_v20 = vmax.f32 %v1013_v7, 0.0  ;;  %v1388_v22 = vpack.c.bf16 %v1223_v63, %v1216_v62  ;;  %v1390_v23 = vpack.c.bf16 %v1225_v3, %v1218_v2  ;;  %v1041_v49 = vld [vmem:[%s5247_s27 + $0x6c8] sm:$0xff]  ;;  %v942_v55 = vld [vmem:[%s5247_s27 + $0x3b0] sm:$0xff]  ;;  %v836_v57 = vld [vmem:[%s5247_s27 + $0x60] sm:$0xff] }
 0x122   : > { %1595 = vmatpush1.bf16.msra.mxu0 %v1367_v21  ;;  %v1020_v21 = vld [vmem:[%s5247_s27 + $0x620] sm:$0xff]  ;;  %v1396_v24 = vpack.c.bf16 %v1238_v5, %v1231_v4  ;;  %v1232_v28 = vmax.f32 %v1008_v10, 0.0  ;;  %v1239_v29 = vmax.f32 %v1015_v11, 0.0  ;;  %v1245_v30 = vmax.f32 %v1021_v12, 0.0  ;;  %v829_v56 = vld [vmem:[%s5247_s27 + $0x28] sm:$0xff]  ;;  %v830_v0 = vld [vmem:[%s5247_s27 + $0x30] sm:$0xff] }
 0x123   : > { %1788 = vmatpush1.bf16.msra.mxu1 %v1369_v32  ;;  %1596 = vmatprep.subr.bf16.mxu0 %v1375_v33  ;;  %v1252_v31 = vmax.f32 %v1028_v16, 0.0  ;;  %v1035_v32 = vld [vmem:[%s5247_s27 + $0x698] sm:$0xff]  ;;  %v1042_v33 = vld [vmem:[%s5247_s27 + $0x6d0] sm:$0xff]  ;;  %v1398_v34 = vpack.c.bf16 %v1240_v15, %v1233_v14  ;;  %v1254_v36 = vmax.f32 %v1030_v18, 0.0  ;;  %v1395_v37 = vpack.c.bf16 %v1237_v20, %v1230_v19  ;;  %v949_v59 = vld [vmem:[%s5247_s27 + $0x3e8] sm:$0xff] }
 0x124   : > { %1789 = vmatprep.subr.bf16.mxu1 %v1377_v35  ;;  %v1247_v35 = vmax.f32 %v1023_v17, 0.0  ;;  %v1244_v38 = vmax.f32 %v1020_v21, 0.0  ;;  %v1251_v39 = vmax.f32 %v1027_v25, 0.0  ;;  %v1246_v42 = vmax.f32 %v1022_v26, 0.0  ;;  %v828_v5 = vld [vmem:[%s5247_s27 + $0x20] sm:$0xff]  ;;  %v835_v6 = vld [vmem:[%s5247_s27 + $0x58] sm:$0xff] }
 0x125   : > { %v1253_v43 = vmax.f32 %v1029_v27, 0.0  ;;  %v1259_v44 = vmax.f32 %v1035_v32, 0.0  ;;  %v1266_v45 = vmax.f32 %v1042_v33, 0.0  ;;  %v1261_v53 = vmax.f32 %v1037_v40, 0.0  ;;  %v837_v10 = vld [vmem:[%s5247_s27 + $0x68] sm:$0xff]  ;;  %v843_v11 = vld [vmem:[%s5247_s27 + $0x98] sm:$0xff] }
 0x126   : > { %1597 = vmatpush1.bf16.msra.mxu0 %v1374_v46  ;;  %v1034_v46 = vld [vmem:[%s5247_s27 + $0x690] sm:$0xff]  ;;  %v1405_v52 = vpack.c.bf16 %v1254_v36, %v1247_v35  ;;  %v1268_v54 = vmax.f32 %v1044_v41, 0.0  ;;  %v1265_v63 = vmax.f32 %v1041_v49, 0.0  ;;  %v1260_v1 = vmax.f32 %v1036_v50, 0.0  ;;  %v956_v17 = vld [vmem:[%s5247_s27 + $0x420] sm:$0xff]  ;;  %v963_v18 = vld [vmem:[%s5247_s27 + $0x458] sm:$0xff] }
 0x127   : > { %1790 = vmatpush1.bf16.msra.mxu1 %v1376_v47  ;;  %1598 = vmatprep.subr.bf16.mxu0 %v1382_v48  ;;  %v1397_v47 = vpack.c.bf16 %v1239_v29, %v1232_v28  ;;  %v1403_v48 = vpack.c.bf16 %v1252_v31, %v1245_v30  ;;  %v1404_v60 = vpack.c.bf16 %v1253_v43, %v1246_v42  ;;  %v1258_v62 = vmax.f32 %v1034_v46, 0.0  ;;  %v850_v12 = vld [vmem:[%s5247_s27 + $0xd0] sm:$0xff]  ;;  %v5393_v20 = vld [vmem:[%s6874_s1] ss:$8 sps:$4 sm:$0xff]   ;;  %v851_v26 = vld [vmem:[%s5247_s27 + $0xd8] sm:$0xff] }
 0x128   : > { %1791 = vmatprep.subr.bf16.mxu1 %v1384_v58  ;;  %v1402_v58 = vpack.c.bf16 %v1251_v39, %v1244_v38  ;;  %v1267_v2 = vmax.f32 %v1043_v51, 0.0  ;;  %v1053_v3 = vmax.f32 %v829_v56, 0.0  ;;  %v1060_v4 = vmax.f32 %v836_v57, 0.0  ;;  %v842_v16 = vld [vmem:[%s5247_s27 + $0x90] sm:$0xff]  ;;  %v844_v25 = vld [vmem:[%s5247_s27 + $0xa0] sm:$0xff]  ;;  %v857_v30 = vld [vmem:[%s5247_s27 + $0x108] sm:$0xff] }
 0x129   : > { %v1412_v7 = vpack.c.bf16 %v1268_v54, %v1261_v53  ;;  %v1052_v14 = vmax.f32 %v828_v5, 0.0  ;;  %v1059_v15 = vmax.f32 %v835_v6, 0.0  ;;  %v1054_v21 = vmax.f32 %v830_v0, 0.0  ;;  %v864_v31 = vld [vmem:[%s5247_s27 + $0x140] sm:$0xff]  ;;  %v970_v35 = vld [vmem:[%s5247_s27 + $0x490] sm:$0xff]  ;;  %v977_v36 = vld [vmem:[%s5247_s27 + $0x4c8] sm:$0xff] }
 0x12a   : > { %1599 = vmatpush1.bf16.msra.mxu0 %v1381_v61  ;;  %v1410_v61 = vpack.c.bf16 %v1266_v45, %v1259_v44  ;;  %v1411_v19 = vpack.c.bf16 %v1267_v2, %v1260_v1  ;;  %v1067_v28 = vmax.f32 %v843_v11, 0.0  ;;  %v1074_v29 = vmax.f32 %v850_v12, 0.0  ;;  %v5405_v38 = vld [vmem:[%s6874_s1 + $0x14] ss:$8 sps:$4 sm:$0xff]   ;;  %v856_v45 = vld [vmem:[%s5247_s27 + $0x100] sm:$0xff]  ;;  %v865_v54 = vld [vmem:[%s5247_s27 + $0x148] sm:$0xff] }
 0x12b   : > { %1792 = vmatpush1.bf16.msra.mxu1 %v1383_v8  ;;  %1600 = vmatprep.subr.bf16.mxu0 %v1389_v9  ;;  %v1166_v8 = vmax.f32 %v942_v55, 0.0  ;;  %v1173_v9 = vmax.f32 %v949_v59, 0.0  ;;  %v1066_v32 = vmax.f32 %v842_v16, 0.0  ;;  %v1180_v33 = vmax.f32 %v956_v17, 0.0  ;;  %v878_v49 = vld [vmem:[%s5247_s27 + $0x1b0] sm:$0xff]  ;;  %v984_v59 = vld [vmem:[%s5247_s27 + $0x500] sm:$0xff] }
 0x12c   : > { %1793 = vmatprep.subr.bf16.mxu1 %v1391_v13  ;;  %v1409_v13 = vpack.c.bf16 %v1265_v63, %v1258_v62  ;;  %v1068_v40 = vmax.f32 %v844_v25, 0.0  ;;  %v1075_v41 = vmax.f32 %v851_v26, 0.0  ;;  %v1081_v43 = vmax.f32 %v857_v30, 0.0  ;;  %v858_v53 = vld [vmem:[%s5247_s27 + $0x110] sm:$0xff]  ;;  %v877_v2 = vld [vmem:[%s5247_s27 + $0x1a8] sm:$0xff]  ;;  %v872_v11 = vld [vmem:[%s5247_s27 + $0x180] sm:$0xff] }
 0x12d   : > { %v1366_v27 = vpack.c.bf16 %v1173_v9, %v1166_v8  ;;  %v1088_v44 = vmax.f32 %v864_v31, 0.0  ;;  %v1316_v46 = vpack.c.bf16 %v1074_v29, %v1067_v28  ;;  %v1194_v50 = vmax.f32 %v970_v35, 0.0  ;;  %v892_v8 = vld [vmem:[%s5247_s27 + $0x220] sm:$0xff]  ;;  %v879_v12 = vld [vmem:[%s5247_s27 + $0x1b8] sm:$0xff]  ;;  %v1005_v16 = vld [vmem:[%s5247_s27 + $0x5a8] sm:$0xff] }
 0x12e   : > { %1601 = vmatpush1.bf16.msra.mxu0 %v1388_v22  ;;  %v1061_v22 = vmax.f32 %v837_v10, 0.0  ;;  %v1201_v51 = vmax.f32 %v977_v36, 0.0  ;;  %v1317_v56 = vpack.c.bf16 %v1075_v41, %v1068_v40  ;;  %v1080_v57 = vmax.f32 %v856_v45, 0.0  ;;  %v899_v25 = vld [vmem:[%s5247_s27 + $0x258] sm:$0xff]  ;;  %v906_v26 = vld [vmem:[%s5247_s27 + $0x290] sm:$0xff] }
 0x12f   : > { %1794 = vmatpush1.bf16.msra.mxu1 %v1390_v23  ;;  %1602 = vmatprep.subr.bf16.mxu0 %v1396_v24  ;;  %v1309_v23 = vpack.c.bf16 %v1060_v4, %v1053_v3  ;;  %v849_v24 = vld [vmem:[%s5247_s27 + $0xc8] sm:$0xff]  ;;  %v1323_v62 = vpack.c.bf16 %v1088_v44, %v1081_v43  ;;  %v1102_v1 = vmax.f32 %v878_v49, 0.0  ;;  %v1082_v5 = vmax.f32 %v858_v53, 0.0  ;;  %v1019_v36 = vld [vmem:[%s5247_s27 + $0x618] sm:$0xff]  ;;  %v898_v43 = vld [vmem:[%s5247_s27 + $0x250] sm:$0xff] }
 0x130   : > { %1795 = vmatprep.subr.bf16.mxu1 %v1398_v34  ;;  %v1187_v34 = vmax.f32 %v963_v18, 0.0  ;;  %v1073_v39 = vmax.f32 %v849_v24, 0.0  ;;  %v1310_v42 = vpack.c.bf16 %v1061_v22, %v1054_v21  ;;  %v5429_v3 = vld [vmem:[%s6874_s1 + $0x24] ss:$8 sps:$4 sm:$0xff]   ;;  %v1380_v4 = vpack.c.bf16 %v1201_v51, %v1194_v50  ;;  %v891_v24 = vld [vmem:[%s5247_s27 + $0x218] sm:$0xff] }
 0x131   : > { %v1089_v6 = vmax.f32 %v865_v54, 0.0  ;;  %v1208_v9 = vmax.f32 %v984_v59, 0.0  ;;  %v884_v21 = vld [vmem:[%s5247_s27 + $0x1e0] sm:$0xff]  ;;  %v1103_v28 = vmax.f32 %v879_v12, 0.0  ;;  %v1229_v31 = vmax.f32 %v1005_v16, 0.0  ;;  %v905_v44 = vld [vmem:[%s5247_s27 + $0x288] sm:$0xff] }
 0x132   : > { %1603 = vmatpush1.bf16.msra.mxu0 %v1395_v37  ;;  %v1308_v37 = vpack.c.bf16 %v1059_v15, %v1052_v14  ;;  %v1315_v55 = vpack.c.bf16 %v1073_v39, %v1066_v32  ;;  %v1101_v15 = vmax.f32 %v877_v2, 0.0  ;;  %v886_v32 = vld [vmem:[%s5247_s27 + $0x1f0] sm:$0xff]  ;;  %v1108_v39 = vmax.f32 %v884_v21, 0.0  ;;  %v900_v54 = vld [vmem:[%s5247_s27 + $0x260] sm:$0xff]  ;;  %v1033_v59 = vld [vmem:[%s5247_s27 + $0x688] sm:$0xff] }
 0x133   : > { %1796 = vmatpush1.bf16.msra.mxu1 %v1397_v47  ;;  %1604 = vmatprep.subr.bf16.mxu0 %v1403_v48  ;;  %v863_v47 = vld [vmem:[%s5247_s27 + $0x138] sm:$0xff]  ;;  %v1324_v22 = vpack.c.bf16 %v1089_v6, %v1082_v5  ;;  %v1115_v40 = vmax.f32 %v891_v24, 0.0  ;;  %v1123_v41 = vmax.f32 %v899_v25, 0.0  ;;  %v1110_v49 = vmax.f32 %v886_v32, 0.0  ;;  %v934_v6 = vld [vmem:[%s5247_s27 + $0x370] sm:$0xff]  ;;  %v941_v25 = vld [vmem:[%s5247_s27 + $0x3a8] sm:$0xff] }
 0x134   : > { %1797 = vmatprep.subr.bf16.mxu1 %v1405_v52  ;;  %v871_v48 = vld [vmem:[%s5247_s27 + $0x178] sm:$0xff]  ;;  %v1373_v52 = vpack.c.bf16 %v1187_v34, %v1180_v33  ;;  %v1087_v63 = vmax.f32 %v863_v47, 0.0  ;;  %v893_v33 = vld [vmem:[%s5247_s27 + $0x228] sm:$0xff]  ;;  %v1012_v34 = vld [vmem:[%s5247_s27 + $0x5e0] sm:$0xff]  ;;  %v1243_v53 = vmax.f32 %v1019_v36, 0.0  ;;  %v1257_v12 = vmax.f32 %v1033_v59, 0.0 }
 0x135   : > { %v1095_v0 = vmax.f32 %v871_v48, 0.0  ;;  %v913_v47 = vld [vmem:[%s5247_s27 + $0x2c8] sm:$0xff]  ;;  %v920_v48 = vld [vmem:[%s5247_s27 + $0x300] sm:$0xff]  ;;  %v1117_v50 = vmax.f32 %v893_v33, 0.0  ;;  %v919_v2 = vld [vmem:[%s5247_s27 + $0x2f8] sm:$0xff] }
 0x136   : > { %1605 = vmatpush1.bf16.msra.mxu0 %v1402_v58  ;;  %v870_v58 = vld [vmem:[%s5247_s27 + $0x170] sm:$0xff]  ;;  %v1322_v17 = vpack.c.bf16 %v1087_v63, %v1080_v57  ;;  %v1122_v57 = vmax.f32 %v898_v43, 0.0  ;;  %v1129_v63 = vmax.f32 %v905_v44, 0.0  ;;  %v927_v5 = vld [vmem:[%s5247_s27 + $0x338] sm:$0xff]  ;;  %v1143_v16 = vmax.f32 %v919_v2, 0.0  ;;  %v969_v2 = vld [vmem:[%s5247_s27 + $0x488] sm:$0xff] }
 0x137   : > { %1798 = vmatpush1.bf16.msra.mxu1 %v1404_v60  ;;  %1606 = vmatprep.subr.bf16.mxu0 %v1410_v61  ;;  %v991_v60 = vld [vmem:[%s5247_s27 + $0x538] sm:$0xff]  ;;  %v1094_v14 = vmax.f32 %v870_v58, 0.0  ;;  %v1330_v18 = vpack.c.bf16 %v1102_v1, %v1095_v0  ;;  %v1026_v58 = vld [vmem:[%s5247_s27 + $0x650] sm:$0xff]  ;;  %v1137_v0 = vmax.f32 %v913_v47, 0.0  ;;  %v912_v1 = vld [vmem:[%s5247_s27 + $0x2c0] sm:$0xff]  ;;  %v1151_v21 = vmax.f32 %v927_v5, 0.0 }
 0x138   : > { %1799 = vmatprep.subr.bf16.mxu1 %v1412_v7  ;;  %v5422_v61 = vld [vmem:[%s6874_s1 + $0x10] ss:$8 sps:$4 sm:$0xff]   ;;  %v885_v7 = vld [vmem:[%s5247_s27 + $0x1e8] sm:$0xff]  ;;  %v1215_v10 = vmax.f32 %v991_v60, 0.0  ;;  %v1336_v60 = vpack.c.bf16 %v1115_v40, %v1108_v39  ;;  %v1165_v44 = vmax.f32 %v941_v25, 0.0 }
 0x139   : > { %v1329_v35 = vpack.c.bf16 %v1101_v15, %v1094_v14  ;;  %v921_v14 = vld [vmem:[%s5247_s27 + $0x308] sm:$0xff]  ;;  %v1136_v15 = vmax.f32 %v912_v1, 0.0  ;;  %v1047_v32 = vld [vmem:[%s5247_s27 + $0x6f8] sm:$0xff] }
 0x13a   : > { %1607 = vmatpush1.bf16.msra.mxu0 %v1409_v13  ;;  %v998_v13 = vld [vmem:[%s5247_s27 + $0x570] sm:$0xff]  ;;  %v1387_v29 = vpack.c.bf16 %v1215_v10, %v1208_v9  ;;  %v5493_v36 = vld [vmem:[%s6874_s1 + $0x44] ss:$8 sps:$4 sm:$0xff]   ;;  %v1271_v40 = vmax.f32 %v1047_v32, 0.0  ;;  %v947_v47 = vld [vmem:[%s5247_s27 + $0x3d8] sm:$0xff] }
 0x13b   : > { %1800 = vmatpush1.bf16.msra.mxu1 %v1411_v19  ;;  %1962 = vmatprep.subr.bf16.mxu0 %v1309_v23  ;;  %v1109_v19 = vmax.f32 %v885_v7, 0.0  ;;  %v1116_v23 = vmax.f32 %v892_v8, 0.0  ;;  %v1222_v30 = vmax.f32 %v998_v13, 0.0  ;;  %v1338_v7 = vpack.c.bf16 %v1117_v50, %v1110_v49  ;;  %v914_v13 = vld [vmem:[%s5247_s27 + $0x2d0] sm:$0xff]  ;;  %v5508_v1 = vld [vmem:[%s6874_s1 + $0x40] ss:$8 sps:$4 sm:$0xff]  }
 0x13c   : > { %3540 = vmatprep.subr.bf16.mxu1 %v1366_v27  ;;  %v1096_v27 = vmax.f32 %v872_v11, 0.0  ;;  %v1124_v8 = vmax.f32 %v900_v54, 0.0  ;;  %v1250_v11 = vmax.f32 %v1026_v58, 0.0  ;;  %v1350_v39 = vpack.c.bf16 %v1143_v16, %v1136_v15  ;;  %v5515_v5 = vld [vmem:[%s6874_s1 + $0x54] ss:$8 sps:$4 sm:$0xff]   ;;  %v989_v25 = vld [vmem:[%s5247_s27 + $0x528] sm:$0xff] }
 0x13d   : > { %1609 = vmatmul.mubr.bf16.vlgmr.msra.gmra.mrb[0].mxu0 %v5393_v20  ;;  %v1337_v45 = vpack.c.bf16 %v1116_v23, %v1109_v19  ;;  %v1394_v51 = vpack.c.bf16 %v1229_v31, %v1222_v30  ;;  %v1343_v19 = vpack.c.bf16 %v1129_v63, %v1122_v57  ;;  %v933_v23 = vld [vmem:[%s5247_s27 + $0x368] sm:$0xff]  ;;  %v1040_v30 = vld [vmem:[%s5247_s27 + $0x6c0] sm:$0xff]  ;;  %v1171_v57 = vmax.f32 %v947_v47, 0.0  ;;  %v990_v15 = vld [vmem:[%s5247_s27 + $0x530] sm:$0xff] }
 0x13e   : > { %1802 = vmatmul.mubr.bf16.vlgmr.msra.gmra.mrb[0].mxu1 %v5393_v20  ;;  %1963 = vmatpush1.bf16.msra.mxu0 %v1308_v37  ;;  %v5452_v37 = vld [vmem:[%s6874_s1 + $0x20] ss:$8 sps:$4 sm:$0xff]   ;;  %v1408_v31 = vpack.c.bf16 %v1257_v12, %v1250_v11  ;;  %v1264_v33 = vmax.f32 %v1040_v30, 0.0  ;;  %v1157_v43 = vmax.f32 %v933_v23, 0.0  ;;  %v1214_v23 = vmax.f32 %v990_v15, 0.0 }
 0x13f   : > { %3541 = vmatpush3.bf16.msra.mxu1 %v1310_v42  ;;  %1618 = vmatprep.mubr.bf16.mxu0 %v5405_v38  ;;  %v1130_v42 = vmax.f32 %v906_v26, 0.0  ;;  %v948_v26 = vld [vmem:[%s5247_s27 + $0x3e0] sm:$0xff]  ;;  %v961_v63 = vld [vmem:[%s5247_s27 + $0x448] sm:$0xff]  ;;  %v1213_v32 = vmax.f32 %v989_v25, 0.0  ;;  %v5602_v25 = vld [vmem:[%s6874_s1 + $0x90] ss:$8 sps:$4 sm:$0xff]  }
 0x140   : > { %1811 = vmatprep.mubr.bf16.mxu1 %v5405_v38  ;;  %1964 = vmatprep.subr.bf16.mxu0 %v1316_v46  ;;  %v1331_v46 = vpack.c.bf16 %v1103_v28, %v1096_v27  ;;  %v1138_v28 = vmax.f32 %v914_v13, 0.0  ;;  %v968_v12 = vld [vmem:[%s5247_s27 + $0x480] sm:$0xff]  ;;  %v975_v13 = vld [vmem:[%s5247_s27 + $0x4b8] sm:$0xff] }
 0x141   : > { %3542 = vmatprep.subr.bf16.mxu1 %v1373_v52  ;;  %v1236_v52 = vmax.f32 %v1012_v34, 0.0  ;;  %v928_v34 = vld [vmem:[%s5247_s27 + $0x340] sm:$0xff] }
 0x142   : > { %1965 = vmatpush1.bf16.msra.mxu0 %v1315_v55  ;;  %v907_v55 = vld [vmem:[%s5247_s27 + $0x298] sm:$0xff]  ;;  %v1152_v49 = vmax.f32 %v928_v34, 0.0  ;;  %v5579_v15 = vld [vmem:[%s6874_s1 + $0x84] ss:$8 sps:$4 sm:$0xff]  }
 0x143   : > { %3543 = vmatpush3.bf16.msra.mxu1 %v1317_v56  ;;  %1966 = vmatprep.subr.bf16.mxu0 %v1323_v62  ;;  %v5463_v56 = vld [vmem:[%s6874_s1 + $0x34] ss:$8 sps:$4 sm:$0xff]   ;;  %v1344_v62 = vpack.c.bf16 %v1130_v42, %v1123_v41  ;;  %v1131_v9 = vmax.f32 %v907_v55, 0.0  ;;  %v1401_v10 = vpack.c.bf16 %v1243_v53, %v1236_v52  ;;  %v1415_v53 = vpack.c.bf16 %v1271_v40, %v1264_v33 }
 0x144   : > { %3544 = vmatprep.subr.bf16.mxu1 %v1380_v4  ;;  %v1144_v4 = vmax.f32 %v920_v48, 0.0  ;;  %v962_v52 = vld [vmem:[%s5247_s27 + $0x450] sm:$0xff]  ;;  %v1003_v40 = vld [vmem:[%s5247_s27 + $0x598] sm:$0xff] }
 0x145   : > { %1619 = vmatmul.mubr.bf16.gmra.mrb[4].mxu0 %v5422_v61  ;;  %v1345_v27 = vpack.c.bf16 %v1131_v9, %v1124_v8  ;;  %v1185_v8 = vmax.f32 %v961_v63, 0.0  ;;  %v1024_v63 = vld [vmem:[%s5247_s27 + $0x640] sm:$0xff] }
 0x146   : > { %1812 = vmatmul.mubr.bf16.gmra.mrb[4].mxu1 %v5422_v61  ;;  %1628 = vmatprep.mubr.bf16.mxu0 %v5429_v3  ;;  %v1351_v24 = vpack.c.bf16 %v1144_v4, %v1137_v0  ;;  %v976_v4 = vld [vmem:[%s5247_s27 + $0x4c0] sm:$0xff] }
 0x147   : > { %1821 = vmatprep.mubr.bf16.mxu1 %v5429_v3  ;;  %1967 = vmatpush1.bf16.msra.mxu0 %v1322_v17  ;;  %v926_v17 = vld [vmem:[%s5247_s27 + $0x330] sm:$0xff]  ;;  %v1200_v11 = vmax.f32 %v976_v4, 0.0 }
 0x148   : > { %1968 = vmatprep.subr.bf16.mxu0 %v1330_v18  ;;  %3545 = vmatpush3.bf16.msra.mxu1 %v1324_v22  ;;  %v5481_v18 = vld [vmem:[%s6874_s1 + $0x30] ss:$8 sps:$4 sm:$0xff]   ;;  %v1158_v22 = vmax.f32 %v934_v6, 0.0  ;;  %v1150_v42 = vmax.f32 %v926_v17, 0.0  ;;  %v1192_v17 = vmax.f32 %v968_v12, 0.0 }
 0x149   : > { %3546 = vmatprep.subr.bf16.mxu1 %v1387_v29  ;;  %v1145_v29 = vmax.f32 %v921_v14, 0.0  ;;  %v983_v14 = vld [vmem:[%s5247_s27 + $0x4f8] sm:$0xff]  ;;  %v1046_v4 = vld [vmem:[%s5247_s27 + $0x6f0] sm:$0xff] }
 0x14a   : > { %v1358_v41 = vpack.c.bf16 %v1158_v22, %v1151_v21  ;;  %v1357_v54 = vpack.c.bf16 %v1157_v43, %v1150_v42  ;;  %v1207_v22 = vmax.f32 %v983_v14, 0.0  ;;  %v1018_v42 = vld [vmem:[%s5247_s27 + $0x610] sm:$0xff] }
 0x14b   : > { %1969 = vmatpush1.bf16.msra.mxu0 %v1329_v35  ;;  %v935_v35 = vld [vmem:[%s5247_s27 + $0x378] sm:$0xff]  ;;  %v1352_v48 = vpack.c.bf16 %v1145_v29, %v1138_v28  ;;  %v1004_v28 = vld [vmem:[%s5247_s27 + $0x5a0] sm:$0xff]  ;;  %v1038_v12 = vld [vmem:[%s5247_s27 + $0x6b0] sm:$0xff] }
 0x14c   : > { %1970 = vmatprep.subr.bf16.mxu0 %v1337_v45  ;;  %3547 = vmatpush3.bf16.msra.mxu1 %v1331_v46  ;;  %v1172_v45 = vmax.f32 %v948_v26, 0.0  ;;  %v940_v46 = vld [vmem:[%s5247_s27 + $0x3a0] sm:$0xff]  ;;  %v1159_v50 = vmax.f32 %v935_v35, 0.0  ;;  %v5530_v26 = vld [vmem:[%s6874_s1 + $0x50] ss:$8 sps:$4 sm:$0xff]   ;;  %v1386_v33 = vpack.c.bf16 %v1214_v23, %v1207_v22  ;;  %v1228_v35 = vmax.f32 %v1004_v28, 0.0 }
 0x14d   : > { %1629 = vmatmul.mubr.bf16.gmra.mrb[8].mxu0 %v5452_v37  ;;  %3548 = vmatprep.subr.bf16.mxu1 %v1394_v51  ;;  %v955_v51 = vld [vmem:[%s5247_s27 + $0x418] sm:$0xff]  ;;  %v1164_v55 = vmax.f32 %v940_v46, 0.0  ;;  %v5537_v29 = vld [vmem:[%s6874_s1 + $0x64] ss:$8 sps:$4 sm:$0xff]   ;;  %v5588_v23 = vld [vmem:[%s6874_s1 + $0x80] ss:$8 sps:$4 sm:$0xff]  }
 0x14e   : > { %1822 = vmatmul.mubr.bf16.gmra.mrb[8].mxu1 %v5452_v37  ;;  %1638 = vmatprep.mubr.bf16.mxu0 %v5463_v56  ;;  %v1365_v58 = vpack.c.bf16 %v1172_v45, %v1165_v44  ;;  %v1179_v59 = vmax.f32 %v955_v51, 0.0  ;;  %v1359_v0 = vpack.c.bf16 %v1159_v50, %v1152_v49  ;;  %v1227_v45 = vmax.f32 %v1003_v40, 0.0  ;;  %v1010_v49 = vld [vmem:[%s5247_s27 + $0x5d0] sm:$0xff]  ;;  %v1017_v50 = vld [vmem:[%s5247_s27 + $0x608] sm:$0xff] }
 0x14f   : > { %1831 = vmatprep.mubr.bf16.mxu1 %v5463_v56  ;;  %1971 = vmatpush1.bf16.msra.mxu0 %v1336_v60  ;;  %v1186_v60 = vmax.f32 %v962_v52, 0.0  ;;  %v1364_v6 = vpack.c.bf16 %v1171_v57, %v1164_v55  ;;  %v5552_v51 = vld [vmem:[%s6874_s1 + $0x60] ss:$8 sps:$4 sm:$0xff]   ;;  %v1234_v57 = vmax.f32 %v1010_v49, 0.0  ;;  %v5574_v14 = vld [vmem:[%s6874_s1 + $0x70] ss:$8 sps:$4 sm:$0xff]  }
 0x150   : > { %1972 = vmatprep.subr.bf16.mxu0 %v1344_v62  ;;  %3549 = vmatpush3.bf16.msra.mxu1 %v1338_v7  ;;  %v954_v62 = vld [vmem:[%s5247_s27 + $0x410] sm:$0xff]  ;;  %v1025_v52 = vld [vmem:[%s5247_s27 + $0x648] sm:$0xff] }
 0x151   : > { %3550 = vmatprep.subr.bf16.mxu1 %v1401_v10  ;;  %v1178_v7 = vmax.f32 %v954_v62, 0.0  ;;  %v1372_v9 = vpack.c.bf16 %v1186_v60, %v1179_v59  ;;  %v1193_v10 = vmax.f32 %v969_v2, 0.0  ;;  %v1249_v60 = vmax.f32 %v1025_v52, 0.0  ;;  %v1039_v2 = vld [vmem:[%s5247_s27 + $0x6b8] sm:$0xff]  ;;  %v5616_v28 = vld [vmem:[%s6874_s1 + $0xa0] ss:$8 sps:$4 sm:$0xff]  }
 0x152   : > { %v5672_v40 = vld [vmem:[%s6874_s1 + $0xe0] ss:$8 sps:$4 sm:$0xff]  }
 0x153   : > { %1973 = vmatpush1.bf16.msra.mxu0 %v1343_v19  ;;  %v1371_v16 = vpack.c.bf16 %v1185_v8, %v1178_v7  ;;  %v1199_v19 = vmax.f32 %v975_v13, 0.0  ;;  %v1379_v21 = vpack.c.bf16 %v1200_v11, %v1193_v10  ;;  %v1248_v7 = vmax.f32 %v1024_v63, 0.0  ;;  %v1045_v13 = vld [vmem:[%s5247_s27 + $0x6e8] sm:$0xff] }
 0x154   : > { %1974 = vmatprep.subr.bf16.mxu0 %v1351_v24  ;;  %3551 = vmatpush3.bf16.msra.mxu1 %v1345_v27  ;;  %v982_v24 = vld [vmem:[%s5247_s27 + $0x4f0] sm:$0xff]  ;;  %v997_v27 = vld [vmem:[%s5247_s27 + $0x568] sm:$0xff]  ;;  %v1263_v10 = vmax.f32 %v1039_v2, 0.0  ;;  %v1270_v11 = vmax.f32 %v1046_v4, 0.0 }
 0x155   : > { %1639 = vmatmul.mubr.bf16.gmra.mrb[12].mxu0 %v5481_v18  ;;  %3552 = vmatprep.subr.bf16.mxu1 %v1408_v31  ;;  %v1378_v30 = vpack.c.bf16 %v1199_v19, %v1192_v17  ;;  %v1206_v31 = vmax.f32 %v982_v24, 0.0  ;;  %v1221_v34 = vmax.f32 %v997_v27, 0.0  ;;  %v1262_v17 = vmax.f32 %v1038_v12, 0.0  ;;  %v5593_v24 = vld [vmem:[%s6874_s1 + $0x94] ss:$8 sps:$4 sm:$0xff]  }
 0x156   : > { %1832 = vmatmul.mubr.bf16.gmra.mrb[12].mxu1 %v5481_v18  ;;  %1648 = vmatprep.mubr.bf16.mxu0 %v5493_v36  ;;  %v1269_v19 = vmax.f32 %v1045_v13, 0.0  ;;  %v5607_v27 = vld [vmem:[%s6874_s1 + $0xa4] ss:$8 sps:$4 sm:$0xff]  }
 0x157   : > { %1841 = vmatprep.mubr.bf16.mxu1 %v5493_v36  ;;  %1975 = vmatpush1.bf16.msra.mxu0 %v1350_v39  ;;  %v996_v39 = vld [vmem:[%s5247_s27 + $0x560] sm:$0xff]  ;;  %v1385_v43 = vpack.c.bf16 %v1213_v32, %v1206_v31  ;;  %v1393_v46 = vpack.c.bf16 %v1228_v35, %v1221_v34  ;;  %v5630_v31 = vld [vmem:[%s6874_s1 + $0xb0] ss:$8 sps:$4 sm:$0xff]   ;;  %v5649_v34 = vld [vmem:[%s6874_s1 + $0xd4] ss:$8 sps:$4 sm:$0xff]  }
 0x158   : > { %1976 = vmatprep.subr.bf16.mxu0 %v1358_v41  ;;  %3553 = vmatpush3.bf16.msra.mxu1 %v1352_v48  ;;  %v1011_v41 = vld [vmem:[%s5247_s27 + $0x5d8] sm:$0xff]  ;;  %v1220_v44 = vmax.f32 %v996_v39, 0.0  ;;  %v1242_v48 = vmax.f32 %v1018_v42, 0.0  ;;  %v1413_v22 = vpack.c.bf16 %v1269_v19, %v1262_v17  ;;  %v5635_v32 = vld [vmem:[%s6874_s1 + $0xc4] ss:$8 sps:$4 sm:$0xff]  }
 0x159   : > { %3554 = vmatprep.subr.bf16.mxu1 %v1415_v53  ;;  %v1235_v47 = vmax.f32 %v1011_v41, 0.0  ;;  %v1032_v53 = vld [vmem:[%s5247_s27 + $0x680] sm:$0xff]  ;;  %v5658_v35 = vld [vmem:[%s6874_s1 + $0xd0] ss:$8 sps:$4 sm:$0xff]   ;;  %v5677_v41 = vld [vmem:[%s6874_s1 + $0xf4] ss:$8 sps:$4 sm:$0xff]  }
 0x15a   : > { %v1392_v55 = vpack.c.bf16 %v1227_v45, %v1220_v44  ;;  %v1256_v62 = vmax.f32 %v1032_v53, 0.0  ;;  %v5663_v39 = vld [vmem:[%s6874_s1 + $0xe4] ss:$8 sps:$4 sm:$0xff]   ;;  %v5686_v42 = vld [vmem:[%s6874_s1 + $0xf0] ss:$8 sps:$4 sm:$0xff]  }
 0x15b   : > { %1977 = vmatpush1.bf16.msra.mxu0 %v1357_v54  ;;  %v5559_v54 = vld [vmem:[%s6874_s1 + $0x74] ss:$8 sps:$4 sm:$0xff]   ;;  %v1400_v59 = vpack.c.bf16 %v1242_v48, %v1235_v47 }
 0x15c   : > { %1978 = vmatprep.subr.bf16.mxu0 %v1365_v58  ;;  %3555 = vmatpush3.bf16.msra.mxu1 %v1359_v0  ;;  %v1241_v58 = vmax.f32 %v1017_v50, 0.0  ;;  %v1031_v0 = vld [vmem:[%s5247_s27 + $0x678] sm:$0xff] }
 0x15d   : > { %1649 = vmatmul.mubr.bf16.gmra.mrb[16].mxu0 %v5508_v1  ;;  %v1255_v8 = vmax.f32 %v1031_v0, 0.0 }
 0x15e   : > { %1842 = vmatmul.mubr.bf16.gmra.mrb[16].mxu1 %v5508_v1  ;;  %1658 = vmatprep.mubr.bf16.mxu0 %v5515_v5 }
 0x15f   : > { %1851 = vmatprep.mubr.bf16.mxu1 %v5515_v5  ;;  %1979 = vmatpush1.bf16.msra.mxu0 %v1364_v6  ;;  %v1399_v6 = vpack.c.bf16 %v1241_v58, %v1234_v57 }
 0x160   : > { %1980 = vmatprep.subr.bf16.mxu0 %v1372_v9  ;;  %v1407_v9 = vpack.c.bf16 %v1256_v62, %v1249_v60 }
 0x163   : > { %1981 = vmatpush1.bf16.msra.mxu0 %v1371_v16  ;;  %v1406_v16 = vpack.c.bf16 %v1255_v8, %v1248_v7 }
 0x164   : > { %1982 = vmatprep.subr.bf16.mxu0 %v1379_v21  ;;  %v1414_v21 = vpack.c.bf16 %v1270_v11, %v1263_v10 }
 0x165   : > { %1659 = vmatmul.mubr.bf16.gmra.mrb[20].mxu0 %v5530_v26 }
 0x166   : > { %1852 = vmatmul.mubr.bf16.gmra.mrb[20].mxu1 %v5530_v26  ;;  %1668 = vmatprep.mubr.bf16.mxu0 %v5537_v29 }
 0x167   : > { %1861 = vmatprep.mubr.bf16.mxu1 %v5537_v29  ;;  %1983 = vmatpush1.bf16.msra.mxu0 %v1378_v30  ;;  %v5621_v30 = vld [vmem:[%s6874_s1 + $0xb4] ss:$8 sps:$4 sm:$0xff]  }
 0x168   : > { %1984 = vmatprep.subr.bf16.mxu0 %v1386_v33  ;;  %v5644_v33 = vld [vmem:[%s6874_s1 + $0xc0] ss:$8 sps:$4 sm:$0xff]  }
 0x16b   : > { %1985 = vmatpush1.bf16.msra.mxu0 %v1385_v43  ;;  %v4002_v43 = vld [vmem:[%s6874_s1 + $0x4] ss:$8 sps:$4 sm:$0xff]  }
 0x16c   : > { %1986 = vmatprep.subr.bf16.mxu0 %v1393_v46 }
 0x16d   : > { %1669 = vmatmul.mubr.bf16.gmra.mrb[24].mxu0 %v5552_v51 }
 0x16e   : > { %1862 = vmatmul.mubr.bf16.gmra.mrb[24].mxu1 %v5552_v51  ;;  %1678 = vmatprep.mubr.bf16.mxu0 %v5559_v54 }
 0x16f   : > { %1871 = vmatprep.mubr.bf16.mxu1 %v5559_v54  ;;  %1987 = vmatpush1.bf16.msra.mxu0 %v1392_v55 }
 0x170   : > { %1988 = vmatprep.subr.bf16.mxu0 %v1400_v59 }
 0x173   : > { %1989 = vmatpush1.bf16.msra.mxu0 %v1399_v6 }
 0x174   : > { %1990 = vmatprep.subr.bf16.mxu0 %v1407_v9 }
 0x175   : > { %1679 = vmatmul.mubr.bf16.gmra.mrb[28].mxu0 %v5574_v14 }
 0x176   : > { %1872 = vmatmul.mubr.bf16.gmra.mrb[28].mxu1 %v5574_v14  ;;  %1688 = vmatprep.mubr.bf16.mxu0 %v5579_v15 }
 0x177   : > { %1881 = vmatprep.mubr.bf16.mxu1 %v5579_v15  ;;  %1991 = vmatpush1.bf16.msra.mxu0 %v1406_v16 }
 0x178   : > { %1992 = vmatprep.subr.bf16.mxu0 %v1414_v21 }
 0x17b   : > { %1993 = vmatpush1.bf16.msra.mxu0 %v1413_v22 }
 0x17d   : > { %1689 = vmatmul.mubr.bf16.gmra.mrb[32].mxu0 %v5588_v23 }
 0x17e   : > { %1882 = vmatmul.mubr.bf16.gmra.mrb[32].mxu1 %v5588_v23  ;;  %1698 = vmatprep.mubr.bf16.mxu0 %v5593_v24 }
 0x17f   : > { %1891 = vmatprep.mubr.bf16.mxu1 %v5593_v24 }
 0x185   : > { %1699 = vmatmul.mubr.bf16.gmra.mrb[36].mxu0 %v5602_v25 }
 0x186   : > { %1892 = vmatmul.mubr.bf16.gmra.mrb[36].mxu1 %v5602_v25  ;;  %1708 = vmatprep.mubr.bf16.mxu0 %v5607_v27 }
 0x187   : > { %1901 = vmatprep.mubr.bf16.mxu1 %v5607_v27 }
 0x18d   : > { %1709 = vmatmul.mubr.bf16.gmra.mrb[40].mxu0 %v5616_v28 }
 0x18e   : > { %1902 = vmatmul.mubr.bf16.gmra.mrb[40].mxu1 %v5616_v28  ;;  %1718 = vmatprep.mubr.bf16.mxu0 %v5621_v30 }
 0x18f   : > { %1911 = vmatprep.mubr.bf16.mxu1 %v5621_v30 }
 0x195   : > { %1719 = vmatmul.mubr.bf16.gmra.mrb[44].mxu0 %v5630_v31 }
 0x196   : > { %1912 = vmatmul.mubr.bf16.gmra.mrb[44].mxu1 %v5630_v31  ;;  %1728 = vmatprep.mubr.bf16.mxu0 %v5635_v32 }
 0x197   : > { %1921 = vmatprep.mubr.bf16.mxu1 %v5635_v32 }
 0x19d   : > { %1729 = vmatmul.mubr.bf16.gmra.mrb[48].mxu0 %v5644_v33 }
 0x19e   : > { %1922 = vmatmul.mubr.bf16.gmra.mrb[48].mxu1 %v5644_v33  ;;  %1738 = vmatprep.mubr.bf16.mxu0 %v5649_v34 }
 0x19f   : > { %1931 = vmatprep.mubr.bf16.mxu1 %v5649_v34 }
 0x1a5   : > { %1739 = vmatmul.mubr.bf16.gmra.mrb[52].mxu0 %v5658_v35 }
 0x1a6   : > { %1932 = vmatmul.mubr.bf16.gmra.mrb[52].mxu1 %v5658_v35  ;;  %1748 = vmatprep.mubr.bf16.mxu0 %v5663_v39 }
 0x1a7   : > { %1941 = vmatprep.mubr.bf16.mxu1 %v5663_v39 }
 0x1ad   : > { %1749 = vmatmul.mubr.bf16.gmra.mrb[56].mxu0 %v5672_v40 }
 0x1ae   : > { %1942 = vmatmul.mubr.bf16.gmra.mrb[56].mxu1 %v5672_v40  ;;  %1758 = vmatprep.mubr.bf16.mxu0 %v5677_v41 }
 0x1af   : > { %1951 = vmatprep.mubr.bf16.mxu1 %v5677_v41 }
 0x1b5   : > { %1759 = vmatmul.mubr.bf16.gmra.mrb[60].mxu0 %v5686_v42 }
 0x1b6   : > { %1952 = vmatmul.mubr.bf16.gmra.mrb[60].mxu1 %v5686_v42  ;;  %1994 = vmatprep.mubr.bf16.mxu0 %v4002_v43 }
 0x1b7   : > { %2187 = vmatprep.mubr.bf16.mxu1 %v4002_v43 }
 0x1bd   : > { %1995 = vmatmul.mubr.bf16.vlgmr.msra.gmra.mrb[64].mxu0 %v5393_v20 }
 0x1be   : > { %2188 = vmatmul.mubr.bf16.vlgmr.msra.gmra.mrb[64].mxu1 %v5393_v20  ;;  %2004 = vmatprep.mubr.bf16.mxu0 %v5405_v38 }
 0x1bf   : > { %2195 = vmatprep.mubr.bf16.mxu1 %v5405_v38 }
 0x1c5   : > { %2005 = vmatmul.mubr.bf16.gmra.mrb[68].mxu0 %v5422_v61 }
 0x1c6   : > { %2196 = vmatmul.mubr.bf16.gmra.mrb[68].mxu1 %v5422_v61  ;;  %2014 = vmatprep.mubr.bf16.mxu0 %v5429_v3 }
 0x1c7   : > { %2203 = vmatprep.mubr.bf16.mxu1 %v5429_v3 }
 0x1cd   : > { %2015 = vmatmul.mubr.bf16.gmra.mrb[72].mxu0 %v5452_v37 }
 0x1ce   : > { %2204 = vmatmul.mubr.bf16.gmra.mrb[72].mxu1 %v5452_v37  ;;  %2024 = vmatprep.mubr.bf16.mxu0 %v5463_v56 }
 0x1cf   : > { %2211 = vmatprep.mubr.bf16.mxu1 %v5463_v56 }
 0x1d5   : > { %2025 = vmatmul.mubr.bf16.gmra.mrb[76].mxu0 %v5481_v18 }
 0x1d6   : > { %2212 = vmatmul.mubr.bf16.gmra.mrb[76].mxu1 %v5481_v18  ;;  %2034 = vmatprep.mubr.bf16.mxu0 %v5493_v36 }
 0x1d7   : > { %2219 = vmatprep.mubr.bf16.mxu1 %v5493_v36 }
 0x1dd   : > { %2035 = vmatmul.mubr.bf16.gmra.mrb[80].mxu0 %v5508_v1 }
 0x1de   : > { %2220 = vmatmul.mubr.bf16.gmra.mrb[80].mxu1 %v5508_v1  ;;  %2044 = vmatprep.mubr.bf16.mxu0 %v5515_v5 }
 0x1df   : > { %2227 = vmatprep.mubr.bf16.mxu1 %v5515_v5 }
 0x1e5   : > { %2045 = vmatmul.mubr.bf16.gmra.mrb[84].mxu0 %v5530_v26 }
 0x1e6   : > { %2228 = vmatmul.mubr.bf16.gmra.mrb[84].mxu1 %v5530_v26  ;;  %2054 = vmatprep.mubr.bf16.mxu0 %v5537_v29 }
 0x1e7   : > { %2235 = vmatprep.mubr.bf16.mxu1 %v5537_v29 }
 0x1ed   : > { %2055 = vmatmul.mubr.bf16.gmra.mrb[88].mxu0 %v5552_v51 }
 0x1ee   : > { %2236 = vmatmul.mubr.bf16.gmra.mrb[88].mxu1 %v5552_v51  ;;  %2064 = vmatprep.mubr.bf16.mxu0 %v5559_v54 }
 0x1ef   : > { %2243 = vmatprep.mubr.bf16.mxu1 %v5559_v54 }
 0x1f5   : > { %2065 = vmatmul.mubr.bf16.gmra.mrb[92].mxu0 %v5574_v14 }
 0x1f6   : > { %2244 = vmatmul.mubr.bf16.gmra.mrb[92].mxu1 %v5574_v14  ;;  %2074 = vmatprep.mubr.bf16.mxu0 %v5579_v15 }
 0x1f7   : > { %2251 = vmatprep.mubr.bf16.mxu1 %v5579_v15 }
 0x1fd   : > { %2075 = vmatmul.mubr.bf16.gmra.mrb[96].mxu0 %v5588_v23 }
 0x1fe   : > { %2252 = vmatmul.mubr.bf16.gmra.mrb[96].mxu1 %v5588_v23  ;;  %2084 = vmatprep.mubr.bf16.mxu0 %v5593_v24 }
 0x1ff   : > { %2259 = vmatprep.mubr.bf16.mxu1 %v5593_v24 }
 0x205   : > { %2085 = vmatmul.mubr.bf16.gmra.mrb[100].mxu0 %v5602_v25 }
 0x206   : > { %2260 = vmatmul.mubr.bf16.gmra.mrb[100].mxu1 %v5602_v25  ;;  %2094 = vmatprep.mubr.bf16.mxu0 %v5607_v27 }
 0x207   : > { %2267 = vmatprep.mubr.bf16.mxu1 %v5607_v27 }
 0x20d   : > { %2095 = vmatmul.mubr.bf16.gmra.mrb[104].mxu0 %v5616_v28 }
 0x20e   : > { %2268 = vmatmul.mubr.bf16.gmra.mrb[104].mxu1 %v5616_v28  ;;  %2104 = vmatprep.mubr.bf16.mxu0 %v5621_v30 }
 0x20f   : > { %2275 = vmatprep.mubr.bf16.mxu1 %v5621_v30 }
 0x210   : > { %v1610_v20 = vpop.f32.mrb[0].mxu0 }
 0x211   : > { %2316 = vst [vmem:[%s5738_s22] sm:$0xff] %v1610_v20  ;;  %v1803_v38 = vpop.f32.mrb[0].mxu1  ;;  %v1612_v61 = vpop.f32.mrb[1].mxu0 }
 0x212   : > { %2318 = vst [vmem:[%s5738_s22 + $0x10] sm:$0xff] %v1803_v38  ;;  %2317 = vst [vmem:[%s5738_s22 + $0x8] sm:$0xff] %v1612_v61  ;;  %v1805_v3 = vpop.f32.mrb[1].mxu1  ;;  %v1614_v37 = vpop.f32.mrb[2].mxu0 }
 0x213   : > { %2319 = vst [vmem:[%s5738_s22 + $0x18] sm:$0xff] %v1805_v3  ;;  %2323 = vst [vmem:[%s5738_s22 + $0x38] sm:$0xff] %v1614_v37  ;;  %v1807_v56 = vpop.f32.mrb[2].mxu1  ;;  %v1616_v18 = vpop.f32.mrb[3].mxu0 }
 0x214   : > { %2325 = vst [vmem:[%s5738_s22 + $0x48] sm:$0xff] %v1807_v56  ;;  %2324 = vst [vmem:[%s5738_s22 + $0x40] sm:$0xff] %v1616_v18  ;;  %v1809_v36 = vpop.f32.mrb[3].mxu1 }
 0x215   : > { %2326 = vst [vmem:[%s5738_s22 + $0x50] sm:$0xff] %v1809_v36  ;;  %2105 = vmatmul.mubr.bf16.gmra.mrb[108].mxu0 %v5630_v31 }
 0x216   : > { %2276 = vmatmul.mubr.bf16.gmra.mrb[108].mxu1 %v5630_v31  ;;  %2114 = vmatprep.mubr.bf16.mxu0 %v5635_v32 }
 0x217   : > { %2283 = vmatprep.mubr.bf16.mxu1 %v5635_v32 }
 0x218   : > { %v1620_v1 = vpop.f32.mrb[4].mxu0 }
 0x219   : > { %2330 = vst [vmem:[%s5738_s22 + $0x70] sm:$0xff] %v1620_v1  ;;  %v1813_v5 = vpop.f32.mrb[4].mxu1  ;;  %v1622_v26 = vpop.f32.mrb[5].mxu0 }
 0x21a   : > { %2332 = vst [vmem:[%s5738_s22 + $0x80] sm:$0xff] %v1813_v5  ;;  %2331 = vst [vmem:[%s5738_s22 + $0x78] sm:$0xff] %v1622_v26  ;;  %v1815_v29 = vpop.f32.mrb[5].mxu1  ;;  %v1624_v44 = vpop.f32.mrb[6].mxu0 }
 0x21b   : > { %2333 = vst [vmem:[%s5738_s22 + $0x88] sm:$0xff] %v1815_v29  ;;  %2337 = vst [vmem:[%s5738_s22 + $0xa8] sm:$0xff] %v1624_v44  ;;  %v1817_v45 = vpop.f32.mrb[6].mxu1  ;;  %v1626_v46 = vpop.f32.mrb[7].mxu0 }
 0x21c   : > { %2339 = vst [vmem:[%s5738_s22 + $0xb8] sm:$0xff] %v1817_v45  ;;  %2338 = vst [vmem:[%s5738_s22 + $0xb0] sm:$0xff] %v1626_v46  ;;  %v1819_v47 = vpop.f32.mrb[7].mxu1 }
 0x21d   : > { %2340 = vst [vmem:[%s5738_s22 + $0xc0] sm:$0xff] %v1819_v47  ;;  %2115 = vmatmul.mubr.bf16.gmra.mrb[112].mxu0 %v5644_v33 }
 0x21e   : > { %2284 = vmatmul.mubr.bf16.gmra.mrb[112].mxu1 %v5644_v33  ;;  %2124 = vmatprep.mubr.bf16.mxu0 %v5649_v34 }
 0x21f   : > { %2291 = vmatprep.mubr.bf16.mxu1 %v5649_v34 }
 0x220   : > { %v1630_v48 = vpop.f32.mrb[8].mxu0 }
 0x221   : > { %2344 = vst [vmem:[%s5738_s22 + $0xe0] sm:$0xff] %v1630_v48  ;;  %v1823_v49 = vpop.f32.mrb[8].mxu1  ;;  %v1632_v50 = vpop.f32.mrb[9].mxu0 }
 0x222   : > { %2346 = vst [vmem:[%s5738_s22 + $0xf0] sm:$0xff] %v1823_v49  ;;  %2345 = vst [vmem:[%s5738_s22 + $0xe8] sm:$0xff] %v1632_v50  ;;  %v1825_v51 = vpop.f32.mrb[9].mxu1  ;;  %v1634_v52 = vpop.f32.mrb[10].mxu0 }
 0x223   : > { %2347 = vst [vmem:[%s5738_s22 + $0xf8] sm:$0xff] %v1825_v51  ;;  %2351 = vst [vmem:[%s5738_s22 + $0x118] sm:$0xff] %v1634_v52  ;;  %v1827_v53 = vpop.f32.mrb[10].mxu1  ;;  %v1636_v54 = vpop.f32.mrb[11].mxu0 }
 0x224   : > { %2353 = vst [vmem:[%s5738_s22 + $0x128] sm:$0xff] %v1827_v53  ;;  %2352 = vst [vmem:[%s5738_s22 + $0x120] sm:$0xff] %v1636_v54  ;;  %v1829_v55 = vpop.f32.mrb[11].mxu1 }
 0x225   : > { %2354 = vst [vmem:[%s5738_s22 + $0x130] sm:$0xff] %v1829_v55  ;;  %2125 = vmatmul.mubr.bf16.gmra.mrb[116].mxu0 %v5658_v35 }
 0x226   : > { %2292 = vmatmul.mubr.bf16.gmra.mrb[116].mxu1 %v5658_v35  ;;  %2134 = vmatprep.mubr.bf16.mxu0 %v5663_v39 }
 0x227   : > { %2299 = vmatprep.mubr.bf16.mxu1 %v5663_v39 }
 0x228   : > { %v1640_v57 = vpop.f32.mrb[12].mxu0 }
 0x229   : > { %2358 = vst [vmem:[%s5738_s22 + $0x150] sm:$0xff] %v1640_v57  ;;  %v1833_v58 = vpop.f32.mrb[12].mxu1  ;;  %v1642_v59 = vpop.f32.mrb[13].mxu0 }
 0x22a   : > { %2360 = vst [vmem:[%s5738_s22 + $0x160] sm:$0xff] %v1833_v58  ;;  %2359 = vst [vmem:[%s5738_s22 + $0x158] sm:$0xff] %v1642_v59  ;;  %v1835_v60 = vpop.f32.mrb[13].mxu1  ;;  %v1644_v62 = vpop.f32.mrb[14].mxu0 }
 0x22b   : > { %2361 = vst [vmem:[%s5738_s22 + $0x168] sm:$0xff] %v1835_v60  ;;  %2365 = vst [vmem:[%s5738_s22 + $0x188] sm:$0xff] %v1644_v62  ;;  %v1837_v63 = vpop.f32.mrb[14].mxu1  ;;  %v1646_v0 = vpop.f32.mrb[15].mxu0 }
 0x22c   : > { %2367 = vst [vmem:[%s5738_s22 + $0x198] sm:$0xff] %v1837_v63  ;;  %2366 = vst [vmem:[%s5738_s22 + $0x190] sm:$0xff] %v1646_v0  ;;  %v1839_v2 = vpop.f32.mrb[15].mxu1 }
 0x22d   : > { %2368 = vst [vmem:[%s5738_s22 + $0x1a0] sm:$0xff] %v1839_v2  ;;  %2135 = vmatmul.mubr.bf16.gmra.mrb[120].mxu0 %v5672_v40 }
 0x22e   : > { %2300 = vmatmul.mubr.bf16.gmra.mrb[120].mxu1 %v5672_v40  ;;  %2144 = vmatprep.mubr.bf16.mxu0 %v5677_v41 }
 0x22f   : > { %2307 = vmatprep.mubr.bf16.mxu1 %v5677_v41 }
 0x230   : > { %v1650_v4 = vpop.f32.mrb[16].mxu0 }
 0x231   : > { %2372 = vst [vmem:[%s5738_s22 + $0x1c0] sm:$0xff] %v1650_v4  ;;  %v1843_v6 = vpop.f32.mrb[16].mxu1  ;;  %v1652_v7 = vpop.f32.mrb[17].mxu0 }
 0x232   : > { %2374 = vst [vmem:[%s5738_s22 + $0x1d0] sm:$0xff] %v1843_v6  ;;  %2373 = vst [vmem:[%s5738_s22 + $0x1c8] sm:$0xff] %v1652_v7  ;;  %v1845_v8 = vpop.f32.mrb[17].mxu1  ;;  %v1654_v9 = vpop.f32.mrb[18].mxu0 }
 0x233   : > { %2375 = vst [vmem:[%s5738_s22 + $0x1d8] sm:$0xff] %v1845_v8  ;;  %2379 = vst [vmem:[%s5738_s22 + $0x1f8] sm:$0xff] %v1654_v9  ;;  %v1847_v10 = vpop.f32.mrb[18].mxu1  ;;  %v1656_v11 = vpop.f32.mrb[19].mxu0 }
 0x234   : > { %2381 = vst [vmem:[%s5738_s22 + $0x208] sm:$0xff] %v1847_v10  ;;  %2380 = vst [vmem:[%s5738_s22 + $0x200] sm:$0xff] %v1656_v11  ;;  %v1849_v12 = vpop.f32.mrb[19].mxu1 }
 0x235   : > { %2382 = vst [vmem:[%s5738_s22 + $0x210] sm:$0xff] %v1849_v12  ;;  %2145 = vmatmul.mubr.bf16.gmra.mrb[124].mxu0 %v5686_v42 }
 0x236   : > { %2308 = vmatmul.mubr.bf16.gmra.mrb[124].mxu1 %v5686_v42 }
 0x238   : > { %v1660_v13 = vpop.f32.mrb[20].mxu0 }
 0x239   : > { %2386 = vst [vmem:[%s5738_s22 + $0x230] sm:$0xff] %v1660_v13  ;;  %v1853_v14 = vpop.f32.mrb[20].mxu1  ;;  %v1662_v15 = vpop.f32.mrb[21].mxu0 }
 0x23a   : > { %2388 = vst [vmem:[%s5738_s22 + $0x240] sm:$0xff] %v1853_v14  ;;  %2387 = vst [vmem:[%s5738_s22 + $0x238] sm:$0xff] %v1662_v15  ;;  %v1855_v16 = vpop.f32.mrb[21].mxu1  ;;  %v1664_v17 = vpop.f32.mrb[22].mxu0 }
 0x23b   : > { %2389 = vst [vmem:[%s5738_s22 + $0x248] sm:$0xff] %v1855_v16  ;;  %2393 = vst [vmem:[%s5738_s22 + $0x268] sm:$0xff] %v1664_v17  ;;  %v1857_v19 = vpop.f32.mrb[22].mxu1  ;;  %v1666_v21 = vpop.f32.mrb[23].mxu0 }
 0x23c   : > { %2395 = vst [vmem:[%s5738_s22 + $0x278] sm:$0xff] %v1857_v19  ;;  %2394 = vst [vmem:[%s5738_s22 + $0x270] sm:$0xff] %v1666_v21  ;;  %v1859_v22 = vpop.f32.mrb[23].mxu1 }
 0x23d   : > { %2396 = vst [vmem:[%s5738_s22 + $0x280] sm:$0xff] %v1859_v22 }
 0x240   : > { %v1670_v23 = vpop.f32.mrb[24].mxu0 }
 0x241   : > { %2400 = vst [vmem:[%s5738_s22 + $0x2a0] sm:$0xff] %v1670_v23  ;;  %v1863_v24 = vpop.f32.mrb[24].mxu1  ;;  %v1672_v25 = vpop.f32.mrb[25].mxu0 }
 0x242   : > { %2402 = vst [vmem:[%s5738_s22 + $0x2b0] sm:$0xff] %v1863_v24  ;;  %2401 = vst [vmem:[%s5738_s22 + $0x2a8] sm:$0xff] %v1672_v25  ;;  %v1865_v27 = vpop.f32.mrb[25].mxu1  ;;  %v1674_v28 = vpop.f32.mrb[26].mxu0 }
 0x243   : > { %2403 = vst [vmem:[%s5738_s22 + $0x2b8] sm:$0xff] %v1865_v27  ;;  %2407 = vst [vmem:[%s5738_s22 + $0x2d8] sm:$0xff] %v1674_v28  ;;  %v1867_v30 = vpop.f32.mrb[26].mxu1  ;;  %v1676_v31 = vpop.f32.mrb[27].mxu0 }
 0x244   : > { %2409 = vst [vmem:[%s5738_s22 + $0x2e8] sm:$0xff] %v1867_v30  ;;  %2408 = vst [vmem:[%s5738_s22 + $0x2e0] sm:$0xff] %v1676_v31  ;;  %v1869_v32 = vpop.f32.mrb[27].mxu1 }
 0x245   : > { %2410 = vst [vmem:[%s5738_s22 + $0x2f0] sm:$0xff] %v1869_v32 }
 0x248   : > { %v1680_v33 = vpop.f32.mrb[28].mxu0 }
 0x249   : > { %2414 = vst [vmem:[%s5738_s22 + $0x310] sm:$0xff] %v1680_v33  ;;  %v1873_v34 = vpop.f32.mrb[28].mxu1  ;;  %v1682_v35 = vpop.f32.mrb[29].mxu0 }
 0x24a   : > { %2416 = vst [vmem:[%s5738_s22 + $0x320] sm:$0xff] %v1873_v34  ;;  %2415 = vst [vmem:[%s5738_s22 + $0x318] sm:$0xff] %v1682_v35  ;;  %v1875_v39 = vpop.f32.mrb[29].mxu1  ;;  %v1684_v40 = vpop.f32.mrb[30].mxu0 }
 0x24b   : > { %2417 = vst [vmem:[%s5738_s22 + $0x328] sm:$0xff] %v1875_v39  ;;  %2421 = vst [vmem:[%s5738_s22 + $0x348] sm:$0xff] %v1684_v40  ;;  %v1877_v41 = vpop.f32.mrb[30].mxu1  ;;  %v1686_v42 = vpop.f32.mrb[31].mxu0 }
 0x24c   : > { %2423 = vst [vmem:[%s5738_s22 + $0x358] sm:$0xff] %v1877_v41  ;;  %2422 = vst [vmem:[%s5738_s22 + $0x350] sm:$0xff] %v1686_v42  ;;  %v1879_v43 = vpop.f32.mrb[31].mxu1 }
 0x24d   : > { %2424 = vst [vmem:[%s5738_s22 + $0x360] sm:$0xff] %v1879_v43 }
 0x250   : > { %v1690_v20 = vpop.f32.mrb[32].mxu0 }
 0x251   : > { %2428 = vst [vmem:[%s5738_s22 + $0x380] sm:$0xff] %v1690_v20  ;;  %v1883_v38 = vpop.f32.mrb[32].mxu1  ;;  %v1692_v61 = vpop.f32.mrb[33].mxu0 }
 0x252   : > { %2430 = vst [vmem:[%s5738_s22 + $0x390] sm:$0xff] %v1883_v38  ;;  %2429 = vst [vmem:[%s5738_s22 + $0x388] sm:$0xff] %v1692_v61  ;;  %v1885_v3 = vpop.f32.mrb[33].mxu1  ;;  %v1694_v37 = vpop.f32.mrb[34].mxu0 }
 0x253   : > { %2431 = vst [vmem:[%s5738_s22 + $0x398] sm:$0xff] %v1885_v3  ;;  %2435 = vst [vmem:[%s5738_s22 + $0x3b8] sm:$0xff] %v1694_v37  ;;  %v1887_v56 = vpop.f32.mrb[34].mxu1  ;;  %v1696_v18 = vpop.f32.mrb[35].mxu0 }
 0x254   : > { %2437 = vst [vmem:[%s5738_s22 + $0x3c8] sm:$0xff] %v1887_v56  ;;  %2436 = vst [vmem:[%s5738_s22 + $0x3c0] sm:$0xff] %v1696_v18  ;;  %v1889_v36 = vpop.f32.mrb[35].mxu1 }
 0x255   : > { %2438 = vst [vmem:[%s5738_s22 + $0x3d0] sm:$0xff] %v1889_v36 }
 0x258   : > { %v1700_v1 = vpop.f32.mrb[36].mxu0 }
 0x259   : > { %2442 = vst [vmem:[%s5738_s22 + $0x3f0] sm:$0xff] %v1700_v1  ;;  %v1893_v5 = vpop.f32.mrb[36].mxu1  ;;  %v1702_v26 = vpop.f32.mrb[37].mxu0 }
 0x25a   : > { %2444 = vst [vmem:[%s5738_s22 + $0x400] sm:$0xff] %v1893_v5  ;;  %2443 = vst [vmem:[%s5738_s22 + $0x3f8] sm:$0xff] %v1702_v26  ;;  %v1895_v29 = vpop.f32.mrb[37].mxu1  ;;  %v1704_v44 = vpop.f32.mrb[38].mxu0 }
 0x25b   : > { %2445 = vst [vmem:[%s5738_s22 + $0x408] sm:$0xff] %v1895_v29  ;;  %2449 = vst [vmem:[%s5738_s22 + $0x428] sm:$0xff] %v1704_v44  ;;  %v1897_v45 = vpop.f32.mrb[38].mxu1  ;;  %v1706_v46 = vpop.f32.mrb[39].mxu0 }
 0x25c   : > { %2451 = vst [vmem:[%s5738_s22 + $0x438] sm:$0xff] %v1897_v45  ;;  %2450 = vst [vmem:[%s5738_s22 + $0x430] sm:$0xff] %v1706_v46  ;;  %v1899_v47 = vpop.f32.mrb[39].mxu1 }
 0x25d   : > { %2452 = vst [vmem:[%s5738_s22 + $0x440] sm:$0xff] %v1899_v47 }
 0x260   : > { %v1710_v48 = vpop.f32.mrb[40].mxu0 }
 0x261   : > { %2456 = vst [vmem:[%s5738_s22 + $0x460] sm:$0xff] %v1710_v48  ;;  %v1903_v49 = vpop.f32.mrb[40].mxu1  ;;  %v1712_v50 = vpop.f32.mrb[41].mxu0 }
 0x262   : > { %2458 = vst [vmem:[%s5738_s22 + $0x470] sm:$0xff] %v1903_v49  ;;  %2457 = vst [vmem:[%s5738_s22 + $0x468] sm:$0xff] %v1712_v50  ;;  %v1905_v51 = vpop.f32.mrb[41].mxu1  ;;  %v1714_v52 = vpop.f32.mrb[42].mxu0 }
 0x263   : > { %2459 = vst [vmem:[%s5738_s22 + $0x478] sm:$0xff] %v1905_v51  ;;  %2463 = vst [vmem:[%s5738_s22 + $0x498] sm:$0xff] %v1714_v52  ;;  %v1907_v53 = vpop.f32.mrb[42].mxu1  ;;  %v1716_v54 = vpop.f32.mrb[43].mxu0 }
 0x264   : > { %2465 = vst [vmem:[%s5738_s22 + $0x4a8] sm:$0xff] %v1907_v53  ;;  %2464 = vst [vmem:[%s5738_s22 + $0x4a0] sm:$0xff] %v1716_v54  ;;  %v1909_v55 = vpop.f32.mrb[43].mxu1 }
 0x265   : > { %2466 = vst [vmem:[%s5738_s22 + $0x4b0] sm:$0xff] %v1909_v55 }
 0x268   : > { %v1720_v57 = vpop.f32.mrb[44].mxu0 }
 0x269   : > { %2470 = vst [vmem:[%s5738_s22 + $0x4d0] sm:$0xff] %v1720_v57  ;;  %v1913_v58 = vpop.f32.mrb[44].mxu1  ;;  %v1722_v59 = vpop.f32.mrb[45].mxu0 }
 0x26a   : > { %2472 = vst [vmem:[%s5738_s22 + $0x4e0] sm:$0xff] %v1913_v58  ;;  %2471 = vst [vmem:[%s5738_s22 + $0x4d8] sm:$0xff] %v1722_v59  ;;  %v1915_v60 = vpop.f32.mrb[45].mxu1  ;;  %v1724_v62 = vpop.f32.mrb[46].mxu0 }
 0x26b   : > { %2473 = vst [vmem:[%s5738_s22 + $0x4e8] sm:$0xff] %v1915_v60  ;;  %2477 = vst [vmem:[%s5738_s22 + $0x508] sm:$0xff] %v1724_v62  ;;  %v1917_v63 = vpop.f32.mrb[46].mxu1  ;;  %v1726_v0 = vpop.f32.mrb[47].mxu0 }
 0x26c   : > { %2479 = vst [vmem:[%s5738_s22 + $0x518] sm:$0xff] %v1917_v63  ;;  %2478 = vst [vmem:[%s5738_s22 + $0x510] sm:$0xff] %v1726_v0  ;;  %v1919_v2 = vpop.f32.mrb[47].mxu1 }
 0x26d   : > { %2480 = vst [vmem:[%s5738_s22 + $0x520] sm:$0xff] %v1919_v2 }
 0x270   : > { %v1730_v4 = vpop.f32.mrb[48].mxu0 }
 0x271   : > { %2484 = vst [vmem:[%s5738_s22 + $0x540] sm:$0xff] %v1730_v4  ;;  %v1923_v6 = vpop.f32.mrb[48].mxu1  ;;  %v1732_v7 = vpop.f32.mrb[49].mxu0 }
 0x272   : > { %2486 = vst [vmem:[%s5738_s22 + $0x550] sm:$0xff] %v1923_v6  ;;  %2485 = vst [vmem:[%s5738_s22 + $0x548] sm:$0xff] %v1732_v7  ;;  %v1925_v8 = vpop.f32.mrb[49].mxu1  ;;  %v1734_v9 = vpop.f32.mrb[50].mxu0 }
 0x273   : > { %2487 = vst [vmem:[%s5738_s22 + $0x558] sm:$0xff] %v1925_v8  ;;  %2491 = vst [vmem:[%s5738_s22 + $0x578] sm:$0xff] %v1734_v9  ;;  %v1927_v10 = vpop.f32.mrb[50].mxu1  ;;  %v1736_v11 = vpop.f32.mrb[51].mxu0 }
 0x274   : > { %2493 = vst [vmem:[%s5738_s22 + $0x588] sm:$0xff] %v1927_v10  ;;  %2492 = vst [vmem:[%s5738_s22 + $0x580] sm:$0xff] %v1736_v11  ;;  %v1929_v12 = vpop.f32.mrb[51].mxu1 }
 0x275   : > { %2494 = vst [vmem:[%s5738_s22 + $0x590] sm:$0xff] %v1929_v12 }
 0x278   : > { %v1740_v13 = vpop.f32.mrb[52].mxu0 }
 0x279   : > { %2498 = vst [vmem:[%s5738_s22 + $0x5b0] sm:$0xff] %v1740_v13  ;;  %v1933_v14 = vpop.f32.mrb[52].mxu1  ;;  %v1742_v15 = vpop.f32.mrb[53].mxu0 }
 0x27a   : > { %2500 = vst [vmem:[%s5738_s22 + $0x5c0] sm:$0xff] %v1933_v14  ;;  %2499 = vst [vmem:[%s5738_s22 + $0x5b8] sm:$0xff] %v1742_v15  ;;  %v1935_v16 = vpop.f32.mrb[53].mxu1  ;;  %v1744_v17 = vpop.f32.mrb[54].mxu0 }
 0x27b   : > { %2501 = vst [vmem:[%s5738_s22 + $0x5c8] sm:$0xff] %v1935_v16  ;;  %2505 = vst [vmem:[%s5738_s22 + $0x5e8] sm:$0xff] %v1744_v17  ;;  %v1937_v19 = vpop.f32.mrb[54].mxu1  ;;  %v1746_v21 = vpop.f32.mrb[55].mxu0 }
 0x27c   : > { %2507 = vst [vmem:[%s5738_s22 + $0x5f8] sm:$0xff] %v1937_v19  ;;  %2506 = vst [vmem:[%s5738_s22 + $0x5f0] sm:$0xff] %v1746_v21  ;;  %v1939_v22 = vpop.f32.mrb[55].mxu1 }
 0x27d   : > { %2508 = vst [vmem:[%s5738_s22 + $0x600] sm:$0xff] %v1939_v22 }
 0x280   : > { %v1750_v23 = vpop.f32.mrb[56].mxu0 }
 0x281   : > { %2512 = vst [vmem:[%s5738_s22 + $0x620] sm:$0xff] %v1750_v23  ;;  %v1943_v24 = vpop.f32.mrb[56].mxu1  ;;  %v1752_v25 = vpop.f32.mrb[57].mxu0 }
 0x282   : > { %2514 = vst [vmem:[%s5738_s22 + $0x630] sm:$0xff] %v1943_v24  ;;  %2513 = vst [vmem:[%s5738_s22 + $0x628] sm:$0xff] %v1752_v25  ;;  %v1945_v27 = vpop.f32.mrb[57].mxu1  ;;  %v1754_v28 = vpop.f32.mrb[58].mxu0 }
 0x283   : > { %2515 = vst [vmem:[%s5738_s22 + $0x638] sm:$0xff] %v1945_v27  ;;  %2519 = vst [vmem:[%s5738_s22 + $0x658] sm:$0xff] %v1754_v28  ;;  %v1947_v30 = vpop.f32.mrb[58].mxu1  ;;  %v1756_v31 = vpop.f32.mrb[59].mxu0 }
 0x284   : > { %2521 = vst [vmem:[%s5738_s22 + $0x668] sm:$0xff] %v1947_v30  ;;  %2520 = vst [vmem:[%s5738_s22 + $0x660] sm:$0xff] %v1756_v31  ;;  %v1949_v32 = vpop.f32.mrb[59].mxu1 }
 0x285   : > { %2522 = vst [vmem:[%s5738_s22 + $0x670] sm:$0xff] %v1949_v32 }
 0x288   : > { %v1760_v33 = vpop.f32.mrb[60].mxu0 }
 0x289   : > { %2526 = vst [vmem:[%s5738_s22 + $0x690] sm:$0xff] %v1760_v33  ;;  %v1953_v34 = vpop.f32.mrb[60].mxu1  ;;  %v1762_v35 = vpop.f32.mrb[61].mxu0 }
 0x28a   : > { %2528 = vst [vmem:[%s5738_s22 + $0x6a0] sm:$0xff] %v1953_v34  ;;  %2527 = vst [vmem:[%s5738_s22 + $0x698] sm:$0xff] %v1762_v35  ;;  %v1955_v39 = vpop.f32.mrb[61].mxu1  ;;  %v1764_v40 = vpop.f32.mrb[62].mxu0 }
 0x28b   : > { %2529 = vst [vmem:[%s5738_s22 + $0x6a8] sm:$0xff] %v1955_v39  ;;  %2533 = vst [vmem:[%s5738_s22 + $0x6c8] sm:$0xff] %v1764_v40  ;;  %v1957_v41 = vpop.f32.mrb[62].mxu1  ;;  %v1766_v42 = vpop.f32.mrb[63].mxu0 }
 0x28c   : > { %2535 = vst [vmem:[%s5738_s22 + $0x6d8] sm:$0xff] %v1957_v41  ;;  %2534 = vst [vmem:[%s5738_s22 + $0x6d0] sm:$0xff] %v1766_v42  ;;  %v1959_v43 = vpop.f32.mrb[63].mxu1 }
 0x28d   : > { %2536 = vst [vmem:[%s5738_s22 + $0x6e0] sm:$0xff] %v1959_v43 }
 0x290   : > { %v1996_v20 = vpop.f32.mrb[64].mxu0 }
 0x291   : > { %2320 = vst [vmem:[%s5738_s22 + $0x20] sm:$0xff] %v1996_v20  ;;  %v3556_v38 = vpop.f32.mrb[64].mxu1  ;;  %v1998_v61 = vpop.f32.mrb[65].mxu0 }
 0x292   : > { %2321 = vst [vmem:[%s5738_s22 + $0x28] sm:$0xff] %v1998_v61  ;;  %v3557_v3 = vpop.f32.mrb[65].mxu1  ;;  %v2000_v37 = vpop.f32.mrb[66].mxu0 }
 0x293   : > { %v3558_v56 = vadd.f32 %v3557_v3, %v3556_v38  ;;  %2327 = vst [vmem:[%s5738_s22 + $0x58] sm:$0xff] %v2000_v37  ;;  %v3559_v18 = vpop.f32.mrb[66].mxu1  ;;  %v2002_v36 = vpop.f32.mrb[67].mxu0 }
 0x294   : > { %2328 = vst [vmem:[%s5738_s22 + $0x60] sm:$0xff] %v2002_v36  ;;  %v3560_v1 = vpop.f32.mrb[67].mxu1 }
 0x295   : > { %2322 = vst [vmem:[%s5738_s22 + $0x30] sm:$0xff] %v3558_v56  ;;  %v3561_v5 = vadd.f32 %v3560_v1, %v3559_v18 }
 0x297   : > { %2329 = vst [vmem:[%s5738_s22 + $0x68] sm:$0xff] %v3561_v5 }
 0x298   : > { %v2006_v26 = vpop.f32.mrb[68].mxu0 }
 0x299   : > { %2334 = vst [vmem:[%s5738_s22 + $0x90] sm:$0xff] %v2006_v26  ;;  %v3562_v29 = vpop.f32.mrb[68].mxu1  ;;  %v2008_v44 = vpop.f32.mrb[69].mxu0 }
 0x29a   : > { %2335 = vst [vmem:[%s5738_s22 + $0x98] sm:$0xff] %v2008_v44  ;;  %v3563_v45 = vpop.f32.mrb[69].mxu1  ;;  %v2010_v46 = vpop.f32.mrb[70].mxu0 }
 0x29b   : > { %v3564_v47 = vadd.f32 %v3563_v45, %v3562_v29  ;;  %2341 = vst [vmem:[%s5738_s22 + $0xc8] sm:$0xff] %v2010_v46  ;;  %v3565_v48 = vpop.f32.mrb[70].mxu1  ;;  %v2012_v49 = vpop.f32.mrb[71].mxu0 }
 0x29c   : > { %2342 = vst [vmem:[%s5738_s22 + $0xd0] sm:$0xff] %v2012_v49  ;;  %v3566_v50 = vpop.f32.mrb[71].mxu1 }
 0x29d   : > { %2336 = vst [vmem:[%s5738_s22 + $0xa0] sm:$0xff] %v3564_v47  ;;  %v3567_v51 = vadd.f32 %v3566_v50, %v3565_v48 }
 0x29f   : > { %2343 = vst [vmem:[%s5738_s22 + $0xd8] sm:$0xff] %v3567_v51 }
 0x2a0   : > { %v2016_v52 = vpop.f32.mrb[72].mxu0 }
 0x2a1   : > { %2348 = vst [vmem:[%s5738_s22 + $0x100] sm:$0xff] %v2016_v52  ;;  %v3568_v53 = vpop.f32.mrb[72].mxu1  ;;  %v2018_v54 = vpop.f32.mrb[73].mxu0 }
 0x2a2   : > { %2349 = vst [vmem:[%s5738_s22 + $0x108] sm:$0xff] %v2018_v54  ;;  %v3569_v55 = vpop.f32.mrb[73].mxu1  ;;  %v2020_v57 = vpop.f32.mrb[74].mxu0 }
 0x2a3   : > { %v3570_v58 = vadd.f32 %v3569_v55, %v3568_v53  ;;  %2355 = vst [vmem:[%s5738_s22 + $0x138] sm:$0xff] %v2020_v57  ;;  %v3571_v59 = vpop.f32.mrb[74].mxu1  ;;  %v2022_v60 = vpop.f32.mrb[75].mxu0 }
 0x2a4   : > { %2356 = vst [vmem:[%s5738_s22 + $0x140] sm:$0xff] %v2022_v60  ;;  %v3572_v62 = vpop.f32.mrb[75].mxu1 }
 0x2a5   : > { %2350 = vst [vmem:[%s5738_s22 + $0x110] sm:$0xff] %v3570_v58  ;;  %v3573_v63 = vadd.f32 %v3572_v62, %v3571_v59 }
 0x2a7   : > { %2357 = vst [vmem:[%s5738_s22 + $0x148] sm:$0xff] %v3573_v63 }
 0x2a8   : > { %v2026_v0 = vpop.f32.mrb[76].mxu0 }
 0x2a9   : > { %2362 = vst [vmem:[%s5738_s22 + $0x170] sm:$0xff] %v2026_v0  ;;  %v3574_v2 = vpop.f32.mrb[76].mxu1  ;;  %v2028_v4 = vpop.f32.mrb[77].mxu0 }
 0x2aa   : > { %2363 = vst [vmem:[%s5738_s22 + $0x178] sm:$0xff] %v2028_v4  ;;  %v3575_v6 = vpop.f32.mrb[77].mxu1  ;;  %v2030_v7 = vpop.f32.mrb[78].mxu0 }
 0x2ab   : > { %v3576_v8 = vadd.f32 %v3575_v6, %v3574_v2  ;;  %2369 = vst [vmem:[%s5738_s22 + $0x1a8] sm:$0xff] %v2030_v7  ;;  %v3577_v9 = vpop.f32.mrb[78].mxu1  ;;  %v2032_v10 = vpop.f32.mrb[79].mxu0 }
 0x2ac   : > { %2370 = vst [vmem:[%s5738_s22 + $0x1b0] sm:$0xff] %v2032_v10  ;;  %v3578_v11 = vpop.f32.mrb[79].mxu1 }
 0x2ad   : > { %2364 = vst [vmem:[%s5738_s22 + $0x180] sm:$0xff] %v3576_v8  ;;  %v3579_v12 = vadd.f32 %v3578_v11, %v3577_v9 }
 0x2af   : > { %2371 = vst [vmem:[%s5738_s22 + $0x1b8] sm:$0xff] %v3579_v12 }
 0x2b0   : > { %v2036_v13 = vpop.f32.mrb[80].mxu0 }
 0x2b1   : > { %2376 = vst [vmem:[%s5738_s22 + $0x1e0] sm:$0xff] %v2036_v13  ;;  %v3580_v14 = vpop.f32.mrb[80].mxu1  ;;  %v2038_v15 = vpop.f32.mrb[81].mxu0 }
 0x2b2   : > { %2377 = vst [vmem:[%s5738_s22 + $0x1e8] sm:$0xff] %v2038_v15  ;;  %v3581_v16 = vpop.f32.mrb[81].mxu1  ;;  %v2040_v17 = vpop.f32.mrb[82].mxu0 }
 0x2b3   : > { %v3582_v19 = vadd.f32 %v3581_v16, %v3580_v14  ;;  %2383 = vst [vmem:[%s5738_s22 + $0x218] sm:$0xff] %v2040_v17  ;;  %v3583_v21 = vpop.f32.mrb[82].mxu1  ;;  %v2042_v22 = vpop.f32.mrb[83].mxu0 }
 0x2b4   : > { %2384 = vst [vmem:[%s5738_s22 + $0x220] sm:$0xff] %v2042_v22  ;;  %v3584_v23 = vpop.f32.mrb[83].mxu1 }
 0x2b5   : > { %2378 = vst [vmem:[%s5738_s22 + $0x1f0] sm:$0xff] %v3582_v19  ;;  %v3585_v24 = vadd.f32 %v3584_v23, %v3583_v21 }
 0x2b7   : > { %2385 = vst [vmem:[%s5738_s22 + $0x228] sm:$0xff] %v3585_v24 }
 0x2b8   : > { %v2046_v25 = vpop.f32.mrb[84].mxu0 }
 0x2b9   : > { %2390 = vst [vmem:[%s5738_s22 + $0x250] sm:$0xff] %v2046_v25  ;;  %v3586_v27 = vpop.f32.mrb[84].mxu1  ;;  %v2048_v28 = vpop.f32.mrb[85].mxu0 }
 0x2ba   : > { %2391 = vst [vmem:[%s5738_s22 + $0x258] sm:$0xff] %v2048_v28  ;;  %v3587_v30 = vpop.f32.mrb[85].mxu1  ;;  %v2050_v31 = vpop.f32.mrb[86].mxu0 }
 0x2bb   : > { %v3588_v32 = vadd.f32 %v3587_v30, %v3586_v27  ;;  %2397 = vst [vmem:[%s5738_s22 + $0x288] sm:$0xff] %v2050_v31  ;;  %v3589_v33 = vpop.f32.mrb[86].mxu1  ;;  %v2052_v34 = vpop.f32.mrb[87].mxu0 }
 0x2bc   : > { %2398 = vst [vmem:[%s5738_s22 + $0x290] sm:$0xff] %v2052_v34  ;;  %v3590_v35 = vpop.f32.mrb[87].mxu1 }
 0x2bd   : > { %2392 = vst [vmem:[%s5738_s22 + $0x260] sm:$0xff] %v3588_v32  ;;  %v3591_v39 = vadd.f32 %v3590_v35, %v3589_v33 }
 0x2bf   : > { %2399 = vst [vmem:[%s5738_s22 + $0x298] sm:$0xff] %v3591_v39 }
 0x2c0   : > { %v2056_v40 = vpop.f32.mrb[88].mxu0 }
 0x2c1   : > { %2404 = vst [vmem:[%s5738_s22 + $0x2c0] sm:$0xff] %v2056_v40  ;;  %v3592_v41 = vpop.f32.mrb[88].mxu1  ;;  %v2058_v42 = vpop.f32.mrb[89].mxu0 }
 0x2c2   : > { %2405 = vst [vmem:[%s5738_s22 + $0x2c8] sm:$0xff] %v2058_v42  ;;  %v3593_v43 = vpop.f32.mrb[89].mxu1  ;;  %v2060_v20 = vpop.f32.mrb[90].mxu0 }
 0x2c3   : > { %v3594_v38 = vadd.f32 %v3593_v43, %v3592_v41  ;;  %2411 = vst [vmem:[%s5738_s22 + $0x2f8] sm:$0xff] %v2060_v20  ;;  %v3595_v61 = vpop.f32.mrb[90].mxu1  ;;  %v2062_v3 = vpop.f32.mrb[91].mxu0 }
 0x2c4   : > { %2412 = vst [vmem:[%s5738_s22 + $0x300] sm:$0xff] %v2062_v3  ;;  %v3596_v37 = vpop.f32.mrb[91].mxu1 }
 0x2c5   : > { %2406 = vst [vmem:[%s5738_s22 + $0x2d0] sm:$0xff] %v3594_v38  ;;  %v3597_v56 = vadd.f32 %v3596_v37, %v3595_v61 }
 0x2c7   : > { %2413 = vst [vmem:[%s5738_s22 + $0x308] sm:$0xff] %v3597_v56 }
 0x2c8   : > { %v2066_v18 = vpop.f32.mrb[92].mxu0 }
 0x2c9   : > { %2418 = vst [vmem:[%s5738_s22 + $0x330] sm:$0xff] %v2066_v18  ;;  %v3598_v36 = vpop.f32.mrb[92].mxu1  ;;  %v2068_v1 = vpop.f32.mrb[93].mxu0 }
 0x2ca   : > { %2419 = vst [vmem:[%s5738_s22 + $0x338] sm:$0xff] %v2068_v1  ;;  %v3599_v5 = vpop.f32.mrb[93].mxu1  ;;  %v2070_v26 = vpop.f32.mrb[94].mxu0 }
 0x2cb   : > { %v3600_v29 = vadd.f32 %v3599_v5, %v3598_v36  ;;  %2425 = vst [vmem:[%s5738_s22 + $0x368] sm:$0xff] %v2070_v26  ;;  %v3601_v44 = vpop.f32.mrb[94].mxu1  ;;  %v2072_v45 = vpop.f32.mrb[95].mxu0 }
 0x2cc   : > { %2426 = vst [vmem:[%s5738_s22 + $0x370] sm:$0xff] %v2072_v45  ;;  %v3602_v46 = vpop.f32.mrb[95].mxu1 }
 0x2cd   : > { %2420 = vst [vmem:[%s5738_s22 + $0x340] sm:$0xff] %v3600_v29  ;;  %v3603_v47 = vadd.f32 %v3602_v46, %v3601_v44 }
 0x2cf   : > { %2427 = vst [vmem:[%s5738_s22 + $0x378] sm:$0xff] %v3603_v47 }
 0x2d0   : > { %v2076_v48 = vpop.f32.mrb[96].mxu0 }
 0x2d1   : > { %2432 = vst [vmem:[%s5738_s22 + $0x3a0] sm:$0xff] %v2076_v48  ;;  %v3604_v49 = vpop.f32.mrb[96].mxu1  ;;  %v2078_v50 = vpop.f32.mrb[97].mxu0 }
 0x2d2   : > { %2433 = vst [vmem:[%s5738_s22 + $0x3a8] sm:$0xff] %v2078_v50  ;;  %v3605_v51 = vpop.f32.mrb[97].mxu1  ;;  %v2080_v52 = vpop.f32.mrb[98].mxu0 }
 0x2d3   : > { %v3606_v53 = vadd.f32 %v3605_v51, %v3604_v49  ;;  %2439 = vst [vmem:[%s5738_s22 + $0x3d8] sm:$0xff] %v2080_v52  ;;  %v3607_v54 = vpop.f32.mrb[98].mxu1  ;;  %v2082_v55 = vpop.f32.mrb[99].mxu0 }
 0x2d4   : > { %2440 = vst [vmem:[%s5738_s22 + $0x3e0] sm:$0xff] %v2082_v55  ;;  %v3608_v57 = vpop.f32.mrb[99].mxu1 }
 0x2d5   : > { %2434 = vst [vmem:[%s5738_s22 + $0x3b0] sm:$0xff] %v3606_v53  ;;  %v3609_v58 = vadd.f32 %v3608_v57, %v3607_v54 }
 0x2d7   : > { %2441 = vst [vmem:[%s5738_s22 + $0x3e8] sm:$0xff] %v3609_v58 }
 0x2d8   : > { %v2086_v59 = vpop.f32.mrb[100].mxu0 }
 0x2d9   : > { %2446 = vst [vmem:[%s5738_s22 + $0x410] sm:$0xff] %v2086_v59  ;;  %v3610_v60 = vpop.f32.mrb[100].mxu1  ;;  %v2088_v62 = vpop.f32.mrb[101].mxu0 }
 0x2da   : > { %2447 = vst [vmem:[%s5738_s22 + $0x418] sm:$0xff] %v2088_v62  ;;  %v3611_v63 = vpop.f32.mrb[101].mxu1  ;;  %v2090_v0 = vpop.f32.mrb[102].mxu0 }
 0x2db   : > { %v3612_v2 = vadd.f32 %v3611_v63, %v3610_v60  ;;  %2453 = vst [vmem:[%s5738_s22 + $0x448] sm:$0xff] %v2090_v0  ;;  %v3613_v4 = vpop.f32.mrb[102].mxu1  ;;  %v2092_v6 = vpop.f32.mrb[103].mxu0 }
 0x2dc   : > { %2454 = vst [vmem:[%s5738_s22 + $0x450] sm:$0xff] %v2092_v6  ;;  %v3614_v7 = vpop.f32.mrb[103].mxu1 }
 0x2dd   : > { %2448 = vst [vmem:[%s5738_s22 + $0x420] sm:$0xff] %v3612_v2  ;;  %v3615_v8 = vadd.f32 %v3614_v7, %v3613_v4 }
 0x2df   : > { %2455 = vst [vmem:[%s5738_s22 + $0x458] sm:$0xff] %v3615_v8 }
 0x2e0   : > { %v2096_v9 = vpop.f32.mrb[104].mxu0 }
 0x2e1   : > { %2460 = vst [vmem:[%s5738_s22 + $0x480] sm:$0xff] %v2096_v9  ;;  %v3616_v10 = vpop.f32.mrb[104].mxu1  ;;  %v2098_v11 = vpop.f32.mrb[105].mxu0 }
 0x2e2   : > { %2461 = vst [vmem:[%s5738_s22 + $0x488] sm:$0xff] %v2098_v11  ;;  %v3617_v12 = vpop.f32.mrb[105].mxu1  ;;  %v2100_v13 = vpop.f32.mrb[106].mxu0 }
 0x2e3   : > { %v3618_v14 = vadd.f32 %v3617_v12, %v3616_v10  ;;  %2467 = vst [vmem:[%s5738_s22 + $0x4b8] sm:$0xff] %v2100_v13  ;;  %v3619_v15 = vpop.f32.mrb[106].mxu1  ;;  %v2102_v16 = vpop.f32.mrb[107].mxu0 }
 0x2e4   : > { %2468 = vst [vmem:[%s5738_s22 + $0x4c0] sm:$0xff] %v2102_v16  ;;  %v3620_v17 = vpop.f32.mrb[107].mxu1 }
 0x2e5   : > { %2462 = vst [vmem:[%s5738_s22 + $0x490] sm:$0xff] %v3618_v14  ;;  %v3621_v19 = vadd.f32 %v3620_v17, %v3619_v15 }
 0x2e7   : > { %2469 = vst [vmem:[%s5738_s22 + $0x4c8] sm:$0xff] %v3621_v19 }
 0x2e8   : > { %v2106_v21 = vpop.f32.mrb[108].mxu0 }
 0x2e9   : > { %2474 = vst [vmem:[%s5738_s22 + $0x4f0] sm:$0xff] %v2106_v21  ;;  %v3622_v22 = vpop.f32.mrb[108].mxu1  ;;  %v2108_v23 = vpop.f32.mrb[109].mxu0 }
 0x2ea   : > { %2475 = vst [vmem:[%s5738_s22 + $0x4f8] sm:$0xff] %v2108_v23  ;;  %v3623_v24 = vpop.f32.mrb[109].mxu1  ;;  %v2110_v25 = vpop.f32.mrb[110].mxu0 }
 0x2eb   : > { %v3624_v27 = vadd.f32 %v3623_v24, %v3622_v22  ;;  %2481 = vst [vmem:[%s5738_s22 + $0x528] sm:$0xff] %v2110_v25  ;;  %v3625_v28 = vpop.f32.mrb[110].mxu1  ;;  %v2112_v30 = vpop.f32.mrb[111].mxu0 }
 0x2ec   : > { %2482 = vst [vmem:[%s5738_s22 + $0x530] sm:$0xff] %v2112_v30  ;;  %v3626_v31 = vpop.f32.mrb[111].mxu1 }
 0x2ed   : > { %2476 = vst [vmem:[%s5738_s22 + $0x500] sm:$0xff] %v3624_v27  ;;  %v3627_v32 = vadd.f32 %v3626_v31, %v3625_v28 }
 0x2ef   : > { %2483 = vst [vmem:[%s5738_s22 + $0x538] sm:$0xff] %v3627_v32 }
 0x2f0   : > { %v2116_v33 = vpop.f32.mrb[112].mxu0 }
 0x2f1   : > { %2488 = vst [vmem:[%s5738_s22 + $0x560] sm:$0xff] %v2116_v33  ;;  %v3628_v34 = vpop.f32.mrb[112].mxu1  ;;  %v2118_v35 = vpop.f32.mrb[113].mxu0 }
 0x2f2   : > { %2489 = vst [vmem:[%s5738_s22 + $0x568] sm:$0xff] %v2118_v35  ;;  %v3629_v39 = vpop.f32.mrb[113].mxu1  ;;  %v2120_v40 = vpop.f32.mrb[114].mxu0 }
 0x2f3   : > { %v3630_v41 = vadd.f32 %v3629_v39, %v3628_v34  ;;  %2495 = vst [vmem:[%s5738_s22 + $0x598] sm:$0xff] %v2120_v40  ;;  %v3631_v42 = vpop.f32.mrb[114].mxu1  ;;  %v2122_v43 = vpop.f32.mrb[115].mxu0 }
 0x2f4   : > { %2496 = vst [vmem:[%s5738_s22 + $0x5a0] sm:$0xff] %v2122_v43  ;;  %v3632_v20 = vpop.f32.mrb[115].mxu1 }
 0x2f5   : > { %2490 = vst [vmem:[%s5738_s22 + $0x570] sm:$0xff] %v3630_v41  ;;  %v3633_v38 = vadd.f32 %v3632_v20, %v3631_v42 }
 0x2f7   : > { %2497 = vst [vmem:[%s5738_s22 + $0x5a8] sm:$0xff] %v3633_v38 }
 0x2f8   : > { %v2126_v61 = vpop.f32.mrb[116].mxu0 }
 0x2f9   : > { %2502 = vst [vmem:[%s5738_s22 + $0x5d0] sm:$0xff] %v2126_v61  ;;  %v3634_v3 = vpop.f32.mrb[116].mxu1  ;;  %v2128_v37 = vpop.f32.mrb[117].mxu0 }
 0x2fa   : > { %2503 = vst [vmem:[%s5738_s22 + $0x5d8] sm:$0xff] %v2128_v37  ;;  %v3635_v56 = vpop.f32.mrb[117].mxu1  ;;  %v2130_v18 = vpop.f32.mrb[118].mxu0 }
 0x2fb   : > { %v3636_v36 = vadd.f32 %v3635_v56, %v3634_v3  ;;  %2509 = vst [vmem:[%s5738_s22 + $0x608] sm:$0xff] %v2130_v18  ;;  %v3637_v1 = vpop.f32.mrb[118].mxu1  ;;  %v2132_v5 = vpop.f32.mrb[119].mxu0 }
 0x2fc   : > { %2510 = vst [vmem:[%s5738_s22 + $0x610] sm:$0xff] %v2132_v5  ;;  %v3638_v26 = vpop.f32.mrb[119].mxu1 }
 0x2fd   : > { %2504 = vst [vmem:[%s5738_s22 + $0x5e0] sm:$0xff] %v3636_v36  ;;  %v3639_v29 = vadd.f32 %v3638_v26, %v3637_v1 }
 0x2ff   : > { %2511 = vst [vmem:[%s5738_s22 + $0x618] sm:$0xff] %v3639_v29 }
 0x300   : > { %v2136_v44 = vpop.f32.mrb[120].mxu0 }
 0x301   : > { %2516 = vst [vmem:[%s5738_s22 + $0x640] sm:$0xff] %v2136_v44  ;;  %v3640_v45 = vpop.f32.mrb[120].mxu1  ;;  %v2138_v46 = vpop.f32.mrb[121].mxu0 }
 0x302   : > { %2517 = vst [vmem:[%s5738_s22 + $0x648] sm:$0xff] %v2138_v46  ;;  %v3641_v47 = vpop.f32.mrb[121].mxu1  ;;  %v2140_v48 = vpop.f32.mrb[122].mxu0 }
 0x303   : > { %v3642_v49 = vadd.f32 %v3641_v47, %v3640_v45  ;;  %2523 = vst [vmem:[%s5738_s22 + $0x678] sm:$0xff] %v2140_v48  ;;  %v3643_v50 = vpop.f32.mrb[122].mxu1  ;;  %v2142_v51 = vpop.f32.mrb[123].mxu0 }
 0x304   : > { %2524 = vst [vmem:[%s5738_s22 + $0x680] sm:$0xff] %v2142_v51  ;;  %v3644_v52 = vpop.f32.mrb[123].mxu1 }
 0x305   : > { %2518 = vst [vmem:[%s5738_s22 + $0x650] sm:$0xff] %v3642_v49  ;;  %v3645_v53 = vadd.f32 %v3644_v52, %v3643_v50 }
 0x307   : > { %2525 = vst [vmem:[%s5738_s22 + $0x688] sm:$0xff] %v3645_v53 }
 0x308   : > { %v2146_v54 = vpop.f32.mrb[124].mxu0 }
 0x309   : > { %2530 = vst [vmem:[%s5738_s22 + $0x6b0] sm:$0xff] %v2146_v54  ;;  %v3646_v55 = vpop.f32.mrb[124].mxu1  ;;  %v2148_v57 = vpop.f32.mrb[125].mxu0  ;;  %2546 = sbr.rel (!%p4355_p6) target bundleno = 1019 (0x3fb), region = 98 }
 0x30a   : > { %2531 = vst [vmem:[%s5738_s22 + $0x6b8] sm:$0xff] %v2148_v57  ;;  %v3647_v58 = vpop.f32.mrb[125].mxu1  ;;  %v2150_v59 = vpop.f32.mrb[126].mxu0 }
 0x30b   : > { %v3648_v60 = vadd.f32 %v3647_v58, %v3646_v55  ;;  %2537 = vst [vmem:[%s5738_s22 + $0x6e8] sm:$0xff] %v2150_v59  ;;  %v3649_v62 = vpop.f32.mrb[126].mxu1  ;;  %v2152_v63 = vpop.f32.mrb[127].mxu0 }
 0x30c   : > { %2538 = vst [vmem:[%s5738_s22 + $0x6f0] sm:$0xff] %v2152_v63  ;;  %v3650_v0 = vpop.f32.mrb[127].mxu1 }
 0x30d   : > { %2532 = vst [vmem:[%s5738_s22 + $0x6c0] sm:$0xff] %v3648_v60  ;;  %v3651_v2 = vadd.f32 %v3650_v0, %v3649_v62 }
 0x30f   : > { %2539 = vst [vmem:[%s5738_s22 + $0x6f8] sm:$0xff] %v3651_v2 }
 0x310   : > { %s6934_s26 = smov (!%p2549_p0, %s2548_s26), 7 }
 0x311   : > { %s3503_s8 = sshll.u32 %s6934_s26, 12  ;;  %s5991_s4 = sshll.u32 %s6934_s26, 3 }
 0x312   : > { %p3507_p1 = scmp.eq.s32.totalorder %s3503_s8, 0 }
 0x313   : > { %p2561_p2 = scmp.lt.u32.totalorder (!%p3507_p1), %s5991_s4, 8 }
 0x314   : > { %2560 = sbr.rel (%p3507_p1) target bundleno = 1019 (0x3fb), region = 102 }
 0x31b   : > { %2564 = sbr.rel (%p2561_p2) target bundleno = 984 (0x3d8), region = 106  ;;  %s5995_s18 = sand.u32 (!%p2561_p2), 7, %s5991_s4  }
 0x31c   : > { %p2642_p6 = scmp.eq.s32.totalorder (!%p2561_p2), %s5995_s18, 0  ;;  %p3508_p3 = scmp.ne.s32.totalorder (!%p2561_p2), %s5995_s18, 0 }
 0x322   : > { %2645 = sbr.rel (%p3508_p3) target bundleno = 876 (0x36c), region = 121  ;;  %s2646_s11 = sshrl.u32 (!%p3508_p3), %s5991_s4, 3 }
 0x323   : > { %s6002_s27 = sshrl.u32 (!%p3508_p3), %s2646_s11, 1 }
 0x324   : > { %p3509_p4 = scmp.le.s32.totalorder (!%p3508_p3), %s6002_s27, 0 }
 0x329   : > { %3361 = sbr.rel (%p3509_p4) target bundleno = 849 (0x351), region = 269  ;;  %s6897_s15 = smov (!%p3509_p4), %s5989_s6 }
 0x32a   : > { %s6898_s3 = smov (!%p3509_p4), %s5738_s22  ;;  %s6011_s21 = smov (!%p3509_p4), 0  }
 0x32b   : > { %s6013_s29 = smov (!%p3509_p4), 0  }
 0x330 LB: >> { %v2659_v4 = vld [vmem:[%s4243_s3] sm:$0xff]  ;;  %v2661_v6 = vld [vmem:[%s4243_s3 + $0x8] sm:$0xff]  ;;  %v2663_v7 = vld [vmem:[%s4243_s3 + $0x38] sm:$0xff]  ;;  %s2787_s23 = sadd.s32 1, %s4247_s21  ;;  %s2653_s29 = sadd.s32 1, %s4251_s29   ;;  %s4251_s29 = sphi %s6013_s29, %s2653_s29   ;;  %s4247_s21 = sphi %s6011_s21, %s6901_s21   ;;  %s4243_s3 = sphi %s6898_s3, %s6900_s3   ;;  %s4239_s15 = sphi %s6897_s15, %s6899_s15  }
 0x331   : >> { %2660 = vst [vmem:[%s4239_s15] sm:$0xff] %v2659_v4  ;;  %2662 = vst [vmem:[%s4239_s15 + $0x8] sm:$0xff] %v2661_v6  ;;  %v2665_v8 = vld [vmem:[%s4243_s3 + $0x40] sm:$0xff]  ;;  %v2667_v9 = vld [vmem:[%s4243_s3 + $0x70] sm:$0xff]  ;;  %p2788_p5 = scmp.ge.s32.totalorder %s2787_s23, %s6002_s27  ;;  %p2652_p7 = scmp.ge.s32.totalorder %s2653_s29, %s6002_s27 }
 0x332   : >> { %2664 = vst [vmem:[%s4239_s15 + $0xc8] sm:$0xff] %v2663_v7  ;;  %v2669_v10 = vld [vmem:[%s4243_s3 + $0x78] sm:$0xff]  ;;  %2666 = vst [vmem:[%s4239_s15 + $0xd0] sm:$0xff] %v2665_v8  ;;  %v2671_v11 = vld [vmem:[%s4243_s3 + $0xa8] sm:$0xff] }
 0x333   : >> { %2668 = vst [vmem:[%s4239_s15 + $0x190] sm:$0xff] %v2667_v9  ;;  %2670 = vst [vmem:[%s4239_s15 + $0x198] sm:$0xff] %v2669_v10  ;;  %v2673_v12 = vld [vmem:[%s4243_s3 + $0xb0] sm:$0xff]  ;;  %v2675_v13 = vld [vmem:[%s4243_s3 + $0xe0] sm:$0xff]  ;;  %s6936_s23 = smov (%p2788_p5, %s2787_s23), 0 }
 0x334   : >> { %2672 = vst [vmem:[%s4239_s15 + $0x258] sm:$0xff] %v2671_v11  ;;  %2674 = vst [vmem:[%s4239_s15 + $0x260] sm:$0xff] %v2673_v12  ;;  %v2677_v14 = vld [vmem:[%s4243_s3 + $0xe8] sm:$0xff]  ;;  %v2679_v15 = vld [vmem:[%s4243_s3 + $0x118] sm:$0xff]  ;;  %s3510_s5 = sshll.u32 %s6936_s23, 4  ;;  %s6901_s21 = smov %s6936_s23 }
 0x335   : >> { %2676 = vst [vmem:[%s4239_s15 + $0x320] sm:$0xff] %v2675_v13  ;;  %v2681_v16 = vld [vmem:[%s4243_s3 + $0x120] sm:$0xff]  ;;  %2678 = vst [vmem:[%s4239_s15 + $0x328] sm:$0xff] %v2677_v14  ;;  %v2683_v17 = vld [vmem:[%s4243_s3 + $0x150] sm:$0xff]  ;;  %s6069_s9 = scalar_lea.vmem %s5738_s22, %s3510_s5 [#allocation3]   ;;  %s6072_s30 = scalar_lea.vmem %s5989_s6, %s3510_s5  }
 0x336   : >> { %2680 = vst [vmem:[%s4239_s15 + $0x3e8] sm:$0xff] %v2679_v15  ;;  %2682 = vst [vmem:[%s4239_s15 + $0x3f0] sm:$0xff] %v2681_v16  ;;  %v2685_v19 = vld [vmem:[%s4243_s3 + $0x158] sm:$0xff]  ;;  %v2687_v21 = vld [vmem:[%s4243_s3 + $0x188] sm:$0xff] }
 0x337   : >> { %2684 = vst [vmem:[%s4239_s15 + $0x4b0] sm:$0xff] %v2683_v17  ;;  %2686 = vst [vmem:[%s4239_s15 + $0x4b8] sm:$0xff] %v2685_v19  ;;  %v2689_v22 = vld [vmem:[%s4243_s3 + $0x190] sm:$0xff]  ;;  %v2691_v23 = vld [vmem:[%s4243_s3 + $0x1c0] sm:$0xff] }
 0x338   : >> { %2688 = vst [vmem:[%s4239_s15 + $0x578] sm:$0xff] %v2687_v21  ;;  %v2693_v24 = vld [vmem:[%s4243_s3 + $0x1c8] sm:$0xff]  ;;  %2690 = vst [vmem:[%s4239_s15 + $0x580] sm:$0xff] %v2689_v22  ;;  %v2695_v25 = vld [vmem:[%s4243_s3 + $0x1f8] sm:$0xff] }
 0x339   : >> { %2692 = vst [vmem:[%s4239_s15 + $0x640] sm:$0xff] %v2691_v23  ;;  %2694 = vst [vmem:[%s4239_s15 + $0x648] sm:$0xff] %v2693_v24  ;;  %v2697_v27 = vld [vmem:[%s4243_s3 + $0x200] sm:$0xff]  ;;  %v2699_v28 = vld [vmem:[%s4243_s3 + $0x230] sm:$0xff] }
 0x33a   : >> { %2696 = vst [vmem:[%s4239_s15 + $0x708] sm:$0xff] %v2695_v25  ;;  %2698 = vst [vmem:[%s4239_s15 + $0x710] sm:$0xff] %v2697_v27  ;;  %v2701_v30 = vld [vmem:[%s4243_s3 + $0x238] sm:$0xff]  ;;  %v2703_v31 = vld [vmem:[%s4243_s3 + $0x268] sm:$0xff] }
 0x33b   : >> { %2700 = vst [vmem:[%s4239_s15 + $0x7d0] sm:$0xff] %v2699_v28  ;;  %v2705_v32 = vld [vmem:[%s4243_s3 + $0x270] sm:$0xff]  ;;  %2702 = vst [vmem:[%s4239_s15 + $0x7d8] sm:$0xff] %v2701_v30  ;;  %v2707_v33 = vld [vmem:[%s4243_s3 + $0x2a0] sm:$0xff] }
 0x33c   : >> { %2704 = vst [vmem:[%s4239_s15 + $0x898] sm:$0xff] %v2703_v31  ;;  %2706 = vst [vmem:[%s4239_s15 + $0x8a0] sm:$0xff] %v2705_v32  ;;  %v2709_v34 = vld [vmem:[%s4243_s3 + $0x2a8] sm:$0xff]  ;;  %v2711_v35 = vld [vmem:[%s4243_s3 + $0x2d8] sm:$0xff] }
 0x33d   : >> { %2708 = vst [vmem:[%s4239_s15 + $0x960] sm:$0xff] %v2707_v33  ;;  %2710 = vst [vmem:[%s4239_s15 + $0x968] sm:$0xff] %v2709_v34  ;;  %v2713_v39 = vld [vmem:[%s4243_s3 + $0x2e0] sm:$0xff]  ;;  %v2715_v40 = vld [vmem:[%s4243_s3 + $0x310] sm:$0xff] }
 0x33e   : >> { %2712 = vst [vmem:[%s4239_s15 + $0xa28] sm:$0xff] %v2711_v35  ;;  %v2717_v41 = vld [vmem:[%s4243_s3 + $0x318] sm:$0xff]  ;;  %2714 = vst [vmem:[%s4239_s15 + $0xa30] sm:$0xff] %v2713_v39  ;;  %v2719_v42 = vld [vmem:[%s4243_s3 + $0x348] sm:$0xff] }
 0x33f   : >> { %2716 = vst [vmem:[%s4239_s15 + $0xaf0] sm:$0xff] %v2715_v40  ;;  %2718 = vst [vmem:[%s4239_s15 + $0xaf8] sm:$0xff] %v2717_v41  ;;  %v2721_v43 = vld [vmem:[%s4243_s3 + $0x350] sm:$0xff]  ;;  %v2723_v20 = vld [vmem:[%s4243_s3 + $0x380] sm:$0xff] }
 0x340   : >> { %2720 = vst [vmem:[%s4239_s15 + $0xbb8] sm:$0xff] %v2719_v42  ;;  %2722 = vst [vmem:[%s4239_s15 + $0xbc0] sm:$0xff] %v2721_v43  ;;  %v2725_v38 = vld [vmem:[%s4243_s3 + $0x388] sm:$0xff]  ;;  %v2727_v61 = vld [vmem:[%s4243_s3 + $0x3b8] sm:$0xff] }
 0x341   : >> { %2724 = vst [vmem:[%s4239_s15 + $0xc80] sm:$0xff] %v2723_v20  ;;  %v2729_v3 = vld [vmem:[%s4243_s3 + $0x3c0] sm:$0xff]  ;;  %2726 = vst [vmem:[%s4239_s15 + $0xc88] sm:$0xff] %v2725_v38  ;;  %v2731_v37 = vld [vmem:[%s4243_s3 + $0x3f0] sm:$0xff] }
 0x342   : >> { %2728 = vst [vmem:[%s4239_s15 + $0xd48] sm:$0xff] %v2727_v61  ;;  %2730 = vst [vmem:[%s4239_s15 + $0xd50] sm:$0xff] %v2729_v3  ;;  %v2733_v56 = vld [vmem:[%s4243_s3 + $0x3f8] sm:$0xff]  ;;  %v2735_v18 = vld [vmem:[%s4243_s3 + $0x428] sm:$0xff] }
 0x343   : >> { %2732 = vst [vmem:[%s4239_s15 + $0xe10] sm:$0xff] %v2731_v37  ;;  %2734 = vst [vmem:[%s4239_s15 + $0xe18] sm:$0xff] %v2733_v56  ;;  %v2737_v36 = vld [vmem:[%s4243_s3 + $0x430] sm:$0xff]  ;;  %v2739_v1 = vld [vmem:[%s4243_s3 + $0x460] sm:$0xff] }
 0x344   : >> { %2736 = vst [vmem:[%s4239_s15 + $0xed8] sm:$0xff] %v2735_v18  ;;  %v2741_v5 = vld [vmem:[%s4243_s3 + $0x468] sm:$0xff]  ;;  %2738 = vst [vmem:[%s4239_s15 + $0xee0] sm:$0xff] %v2737_v36  ;;  %v2743_v26 = vld [vmem:[%s4243_s3 + $0x498] sm:$0xff] }
 0x345   : >> { %2740 = vst [vmem:[%s4239_s15 + $0xfa0] sm:$0xff] %v2739_v1  ;;  %2742 = vst [vmem:[%s4239_s15 + $0xfa8] sm:$0xff] %v2741_v5  ;;  %v2745_v29 = vld [vmem:[%s4243_s3 + $0x4a0] sm:$0xff]  ;;  %v2747_v44 = vld [vmem:[%s4243_s3 + $0x4d0] sm:$0xff] }
 0x346   : >> { %2744 = vst [vmem:[%s4239_s15 + $0x1068] sm:$0xff] %v2743_v26  ;;  %2746 = vst [vmem:[%s4239_s15 + $0x1070] sm:$0xff] %v2745_v29  ;;  %v2749_v45 = vld [vmem:[%s4243_s3 + $0x4d8] sm:$0xff]  ;;  %v2751_v46 = vld [vmem:[%s4243_s3 + $0x508] sm:$0xff] }
 0x347   : >> { %2748 = vst [vmem:[%s4239_s15 + $0x1130] sm:$0xff] %v2747_v44  ;;  %v2753_v47 = vld [vmem:[%s4243_s3 + $0x510] sm:$0xff]  ;;  %2750 = vst [vmem:[%s4239_s15 + $0x1138] sm:$0xff] %v2749_v45  ;;  %v2755_v48 = vld [vmem:[%s4243_s3 + $0x540] sm:$0xff] }
 0x348   : >> { %2752 = vst [vmem:[%s4239_s15 + $0x11f8] sm:$0xff] %v2751_v46  ;;  %2754 = vst [vmem:[%s4239_s15 + $0x1200] sm:$0xff] %v2753_v47  ;;  %v2757_v49 = vld [vmem:[%s4243_s3 + $0x548] sm:$0xff]  ;;  %v2759_v50 = vld [vmem:[%s4243_s3 + $0x578] sm:$0xff] }
 0x349   : >> { %2756 = vst [vmem:[%s4239_s15 + $0x12c0] sm:$0xff] %v2755_v48  ;;  %2758 = vst [vmem:[%s4239_s15 + $0x12c8] sm:$0xff] %v2757_v49  ;;  %v2761_v51 = vld [vmem:[%s4243_s3 + $0x580] sm:$0xff]  ;;  %v2763_v52 = vld [vmem:[%s4243_s3 + $0x5b0] sm:$0xff] }
 0x34a   : >> { %2760 = vst [vmem:[%s4239_s15 + $0x1388] sm:$0xff] %v2759_v50  ;;  %v2765_v53 = vld [vmem:[%s4243_s3 + $0x5b8] sm:$0xff]  ;;  %2762 = vst [vmem:[%s4239_s15 + $0x1390] sm:$0xff] %v2761_v51  ;;  %v2767_v54 = vld [vmem:[%s4243_s3 + $0x5e8] sm:$0xff]  ;;  %2655 = sbr.rel (!%p2652_p7) target bundleno = 816 (0x330), region = 275 }
 0x34b   : >> { %2764 = vst [vmem:[%s4239_s15 + $0x1450] sm:$0xff] %v2763_v52  ;;  %2766 = vst [vmem:[%s4239_s15 + $0x1458] sm:$0xff] %v2765_v53  ;;  %v2769_v55 = vld [vmem:[%s4243_s3 + $0x5f0] sm:$0xff]  ;;  %v2771_v57 = vld [vmem:[%s4243_s3 + $0x620] sm:$0xff] }
 0x34c   : >> { %2768 = vst [vmem:[%s4239_s15 + $0x1518] sm:$0xff] %v2767_v54  ;;  %2770 = vst [vmem:[%s4239_s15 + $0x1520] sm:$0xff] %v2769_v55  ;;  %v2773_v58 = vld [vmem:[%s4243_s3 + $0x628] sm:$0xff]  ;;  %v2775_v59 = vld [vmem:[%s4243_s3 + $0x658] sm:$0xff] }
 0x34d   : >> { %2772 = vst [vmem:[%s4239_s15 + $0x15e0] sm:$0xff] %v2771_v57  ;;  %v2777_v60 = vld [vmem:[%s4243_s3 + $0x660] sm:$0xff]  ;;  %2774 = vst [vmem:[%s4239_s15 + $0x15e8] sm:$0xff] %v2773_v58  ;;  %v2779_v62 = vld [vmem:[%s4243_s3 + $0x690] sm:$0xff] }
 0x34e   : >> { %2776 = vst [vmem:[%s4239_s15 + $0x16a8] sm:$0xff] %v2775_v59  ;;  %2778 = vst [vmem:[%s4239_s15 + $0x16b0] sm:$0xff] %v2777_v60  ;;  %v2781_v63 = vld [vmem:[%s4243_s3 + $0x698] sm:$0xff]  ;;  %v2783_v0 = vld [vmem:[%s4243_s3 + $0x6c8] sm:$0xff] }
 0x34f   : >> { %2780 = vst [vmem:[%s4239_s15 + $0x1770] sm:$0xff] %v2779_v62  ;;  %2782 = vst [vmem:[%s4239_s15 + $0x1778] sm:$0xff] %v2781_v63  ;;  %v2785_v2 = vld [vmem:[%s4243_s3 + $0x6d0] sm:$0xff]  ;;  %s6900_s3 = smov %s6069_s9 }
 0x350   : >> { %2784 = vst [vmem:[%s4239_s15 + $0x1838] sm:$0xff] %v2783_v0  ;;  %2786 = vst [vmem:[%s4239_s15 + $0x1840] sm:$0xff] %v2785_v2  ;;  %s6899_s15 = smov %s6072_s30 }
 0x351 PF: > { %s6178_s17 = sand.u32 1, %s2646_s11   ;;  %s3536_s7 = sshll.u32 %s6002_s27, 8 }
 0x352   : > { %s2798_s28 = sshra.s32 %s3536_s7, 4  ;;  %p3515_p8 = scmp.le.s32.totalorder %s6178_s17, 0 }
 0x353   : > { %s6182_s16 = scalar_lea.vmem %s5738_s22, %s2798_s28 [#allocation3]   ;;  %s6185_s25 = scalar_lea.vmem %s5989_s6, %s2798_s28  }
 0x354   : > { %3375 = sbr.rel (%p3515_p8) target bundleno = 876 (0x36c), region = 280  ;;  %s6902_s26 = smov (!%p3515_p8), %s6185_s25 }
 0x355   : > { %s6903_s20 = smov (!%p3515_p8), %s6182_s16  ;;  %s6194_s24 = smov (!%p3515_p8), 0  }
 0x356   : > { %s6196_s8 = smov (!%p3515_p8), 0  }
 0x35b LB: >> { %v2814_v4 = vld [vmem:[%s4259_s20] sm:$0xff]  ;;  %v2816_v6 = vld [vmem:[%s4259_s20 + $0x38] sm:$0xff]  ;;  %v2818_v7 = vld [vmem:[%s4259_s20 + $0x70] sm:$0xff]  ;;  %s2878_s11 = sadd.s32 1, %s4263_s24  ;;  %s2808_s8 = sadd.s32 1, %s4267_s8   ;;  %s4267_s8 = sphi %s6196_s8, %s2808_s8   ;;  %s4263_s24 = sphi %s6194_s24, %s6906_s24   ;;  %s4259_s20 = sphi %s6903_s20, %s6905_s20   ;;  %s4255_s26 = sphi %s6902_s26, %s6904_s26  }
 0x35c   : >> { %2815 = vst [vmem:[%s4255_s26] sm:$0xff] %v2814_v4  ;;  %2817 = vst [vmem:[%s4255_s26 + $0xc8] sm:$0xff] %v2816_v6  ;;  %v2820_v8 = vld [vmem:[%s4259_s20 + $0xa8] sm:$0xff]  ;;  %v2822_v9 = vld [vmem:[%s4259_s20 + $0xe0] sm:$0xff]  ;;  %p2879_p9 = scmp.ge.s32.totalorder %s2878_s11, %s6178_s17  ;;  %p2807_p10 = scmp.ge.s32.totalorder %s2808_s8, %s6178_s17 }
 0x35d   : >> { %2819 = vst [vmem:[%s4255_s26 + $0x190] sm:$0xff] %v2818_v7  ;;  %v2824_v10 = vld [vmem:[%s4259_s20 + $0x118] sm:$0xff]  ;;  %2821 = vst [vmem:[%s4255_s26 + $0x258] sm:$0xff] %v2820_v8  ;;  %v2826_v11 = vld [vmem:[%s4259_s20 + $0x150] sm:$0xff] }
 0x35e   : >> { %2823 = vst [vmem:[%s4255_s26 + $0x320] sm:$0xff] %v2822_v9  ;;  %2825 = vst [vmem:[%s4255_s26 + $0x3e8] sm:$0xff] %v2824_v10  ;;  %v2828_v12 = vld [vmem:[%s4259_s20 + $0x188] sm:$0xff]  ;;  %v2830_v13 = vld [vmem:[%s4259_s20 + $0x1c0] sm:$0xff]  ;;  %s6938_s11 = smov (%p2879_p9, %s2878_s11), 0 }
 0x35f   : >> { %2827 = vst [vmem:[%s4255_s26 + $0x4b0] sm:$0xff] %v2826_v11  ;;  %2829 = vst [vmem:[%s4255_s26 + $0x578] sm:$0xff] %v2828_v12  ;;  %v2832_v14 = vld [vmem:[%s4259_s20 + $0x1f8] sm:$0xff]  ;;  %v2834_v15 = vld [vmem:[%s4259_s20 + $0x230] sm:$0xff]  ;;  %s3516_s27 = sshll.u32 %s6938_s11, 3  ;;  %s6906_s24 = smov %s6938_s11 }
 0x360   : >> { %2831 = vst [vmem:[%s4255_s26 + $0x640] sm:$0xff] %v2830_v13  ;;  %v2836_v16 = vld [vmem:[%s4259_s20 + $0x268] sm:$0xff]  ;;  %2833 = vst [vmem:[%s4255_s26 + $0x708] sm:$0xff] %v2832_v14  ;;  %v2838_v17 = vld [vmem:[%s4259_s20 + $0x2a0] sm:$0xff]  ;;  %s6252_s15 = scalar_lea.vmem %s6182_s16, %s3516_s27 [#allocation3]   ;;  %s2884_s3 = scalar_lea.vmem %s6185_s25, %s3516_s27  }
 0x361   : >> { %2835 = vst [vmem:[%s4255_s26 + $0x7d0] sm:$0xff] %v2834_v15  ;;  %2837 = vst [vmem:[%s4255_s26 + $0x898] sm:$0xff] %v2836_v16  ;;  %v2840_v19 = vld [vmem:[%s4259_s20 + $0x2d8] sm:$0xff]  ;;  %v2842_v21 = vld [vmem:[%s4259_s20 + $0x310] sm:$0xff] }
 0x362   : >> { %2839 = vst [vmem:[%s4255_s26 + $0x960] sm:$0xff] %v2838_v17  ;;  %2841 = vst [vmem:[%s4255_s26 + $0xa28] sm:$0xff] %v2840_v19  ;;  %v2844_v22 = vld [vmem:[%s4259_s20 + $0x348] sm:$0xff]  ;;  %v2846_v23 = vld [vmem:[%s4259_s20 + $0x380] sm:$0xff] }
 0x363   : >> { %2843 = vst [vmem:[%s4255_s26 + $0xaf0] sm:$0xff] %v2842_v21  ;;  %v2848_v24 = vld [vmem:[%s4259_s20 + $0x3b8] sm:$0xff]  ;;  %2845 = vst [vmem:[%s4255_s26 + $0xbb8] sm:$0xff] %v2844_v22  ;;  %v2850_v25 = vld [vmem:[%s4259_s20 + $0x3f0] sm:$0xff] }
 0x364   : >> { %2847 = vst [vmem:[%s4255_s26 + $0xc80] sm:$0xff] %v2846_v23  ;;  %2849 = vst [vmem:[%s4255_s26 + $0xd48] sm:$0xff] %v2848_v24  ;;  %v2852_v27 = vld [vmem:[%s4259_s20 + $0x428] sm:$0xff]  ;;  %v2854_v28 = vld [vmem:[%s4259_s20 + $0x460] sm:$0xff] }
 0x365   : >> { %2851 = vst [vmem:[%s4255_s26 + $0xe10] sm:$0xff] %v2850_v25  ;;  %2853 = vst [vmem:[%s4255_s26 + $0xed8] sm:$0xff] %v2852_v27  ;;  %v2856_v30 = vld [vmem:[%s4259_s20 + $0x498] sm:$0xff]  ;;  %v2858_v31 = vld [vmem:[%s4259_s20 + $0x4d0] sm:$0xff]  ;;  %2810 = sbr.rel (!%p2807_p10) target bundleno = 859 (0x35b), region = 286 }
 0x366   : >> { %2855 = vst [vmem:[%s4255_s26 + $0xfa0] sm:$0xff] %v2854_v28  ;;  %v2860_v32 = vld [vmem:[%s4259_s20 + $0x508] sm:$0xff]  ;;  %2857 = vst [vmem:[%s4255_s26 + $0x1068] sm:$0xff] %v2856_v30  ;;  %v2862_v33 = vld [vmem:[%s4259_s20 + $0x540] sm:$0xff] }
 0x367   : >> { %2859 = vst [vmem:[%s4255_s26 + $0x1130] sm:$0xff] %v2858_v31  ;;  %2861 = vst [vmem:[%s4255_s26 + $0x11f8] sm:$0xff] %v2860_v32  ;;  %v2864_v34 = vld [vmem:[%s4259_s20 + $0x578] sm:$0xff]  ;;  %v2866_v35 = vld [vmem:[%s4259_s20 + $0x5b0] sm:$0xff] }
 0x368   : >> { %2863 = vst [vmem:[%s4255_s26 + $0x12c0] sm:$0xff] %v2862_v33  ;;  %2865 = vst [vmem:[%s4255_s26 + $0x1388] sm:$0xff] %v2864_v34  ;;  %v2868_v39 = vld [vmem:[%s4259_s20 + $0x5e8] sm:$0xff]  ;;  %v2870_v40 = vld [vmem:[%s4259_s20 + $0x620] sm:$0xff] }
 0x369   : >> { %2867 = vst [vmem:[%s4255_s26 + $0x1450] sm:$0xff] %v2866_v35  ;;  %v2872_v41 = vld [vmem:[%s4259_s20 + $0x658] sm:$0xff]  ;;  %2869 = vst [vmem:[%s4255_s26 + $0x1518] sm:$0xff] %v2868_v39  ;;  %v2874_v42 = vld [vmem:[%s4259_s20 + $0x690] sm:$0xff] }
 0x36a   : >> { %2871 = vst [vmem:[%s4255_s26 + $0x15e0] sm:$0xff] %v2870_v40  ;;  %2873 = vst [vmem:[%s4255_s26 + $0x16a8] sm:$0xff] %v2872_v41  ;;  %v2876_v43 = vld [vmem:[%s4259_s20 + $0x6c8] sm:$0xff]  ;;  %s6905_s20 = smov %s6252_s15 }
 0x36b   : >> { %2875 = vst [vmem:[%s4255_s26 + $0x1770] sm:$0xff] %v2874_v42  ;;  %2877 = vst [vmem:[%s4255_s26 + $0x1838] sm:$0xff] %v2876_v43  ;;  %s6904_s26 = smov %s2884_s3 }
 0x36c PF: > { %2887 = sbr.rel (%p2642_p6) target bundleno = 984 (0x3d8), region = 139  ;;  %s2889_s21 = ssub.s32 (!%p2642_p6), %s5991_s4, %s5995_s18 }
 0x36d   : > { %s2893_s29 = sshrl.u32 (!%p2642_p6), %s5991_s4, 3  ;;  %s6298_s23 = scalar_lea.vmem (!%p2642_p6), %s5738_s22, %s2889_s21 [#allocation3] }
 0x36e   : > { %s6301_s5 = scalar_lea.vmem (!%p2642_p6), %s5989_s6, %s2889_s21  ;;  %s6305_s9 = sshrl.u32 (!%p2642_p6), %s2893_s29, 1 }
 0x36f   : > { %p3518_p11 = scmp.le.s32.totalorder (!%p2642_p6), %s6305_s9, 0 }
 0x373   : > { %3389 = sbr.rel (%p3518_p11) target bundleno = 923 (0x39b), region = 291  ;;  %s6907_s30 = smov (!%p3518_p11), %s5989_s6 }
 0x374   : > { %s6908_s17 = smov (!%p3518_p11), %s5738_s22  ;;  %s6314_s7 = smov (!%p3518_p11), 0  }
 0x375   : > { %s6316_s28 = smov (!%p3518_p11), 0  }
 0x37a LB: >> { %v2906_v20 = vld [vmem:[%s4275_s17] sm:$0xff]  ;;  %v2908_v38 = vld [vmem:[%s4275_s17 + $0x8] sm:$0xff]  ;;  %v2910_v61 = vld [vmem:[%s4275_s17 + $0x38] sm:$0xff]  ;;  %s3034_s16 = sadd.s32 1, %s4279_s7  ;;  %s2900_s28 = sadd.s32 1, %s4283_s28   ;;  %s4283_s28 = sphi %s6316_s28, %s2900_s28   ;;  %s4279_s7 = sphi %s6314_s7, %s6911_s7   ;;  %s4275_s17 = sphi %s6908_s17, %s6910_s17   ;;  %s4271_s30 = sphi %s6907_s30, %s6909_s30  }
 0x37b   : >> { %2907 = vst [vmem:[%s4271_s30] sm:$0xff] %v2906_v20  ;;  %2909 = vst [vmem:[%s4271_s30 + $0x8] sm:$0xff] %v2908_v38  ;;  %v2912_v3 = vld [vmem:[%s4275_s17 + $0x40] sm:$0xff]  ;;  %v2914_v37 = vld [vmem:[%s4275_s17 + $0x70] sm:$0xff]  ;;  %p3035_p12 = scmp.ge.s32.totalorder %s3034_s16, %s6305_s9  ;;  %p2899_p13 = scmp.ge.s32.totalorder %s2900_s28, %s6305_s9 }
 0x37c   : >> { %2911 = vst [vmem:[%s4271_s30 + $0xc8] sm:$0xff] %v2910_v61  ;;  %v2916_v56 = vld [vmem:[%s4275_s17 + $0x78] sm:$0xff]  ;;  %2913 = vst [vmem:[%s4271_s30 + $0xd0] sm:$0xff] %v2912_v3  ;;  %v2918_v18 = vld [vmem:[%s4275_s17 + $0xa8] sm:$0xff] }
 0x37d   : >> { %2915 = vst [vmem:[%s4271_s30 + $0x190] sm:$0xff] %v2914_v37  ;;  %2917 = vst [vmem:[%s4271_s30 + $0x198] sm:$0xff] %v2916_v56  ;;  %v2920_v36 = vld [vmem:[%s4275_s17 + $0xb0] sm:$0xff]  ;;  %v2922_v1 = vld [vmem:[%s4275_s17 + $0xe0] sm:$0xff]  ;;  %s6940_s16 = smov (%p3035_p12, %s3034_s16), 0 }
 0x37e   : >> { %2919 = vst [vmem:[%s4271_s30 + $0x258] sm:$0xff] %v2918_v18  ;;  %2921 = vst [vmem:[%s4271_s30 + $0x260] sm:$0xff] %v2920_v36  ;;  %v2924_v5 = vld [vmem:[%s4275_s17 + $0xe8] sm:$0xff]  ;;  %v2926_v26 = vld [vmem:[%s4275_s17 + $0x118] sm:$0xff]  ;;  %s3519_s25 = sshll.u32 %s6940_s16, 4  ;;  %s6911_s7 = smov %s6940_s16 }
 0x37f   : >> { %2923 = vst [vmem:[%s4271_s30 + $0x320] sm:$0xff] %v2922_v1  ;;  %v2928_v29 = vld [vmem:[%s4275_s17 + $0x120] sm:$0xff]  ;;  %2925 = vst [vmem:[%s4271_s30 + $0x328] sm:$0xff] %v2924_v5  ;;  %v2930_v44 = vld [vmem:[%s4275_s17 + $0x150] sm:$0xff]  ;;  %s6372_s26 = scalar_lea.vmem %s5738_s22, %s3519_s25 [#allocation3]   ;;  %s6375_s20 = scalar_lea.vmem %s5989_s6, %s3519_s25  }
 0x380   : >> { %2927 = vst [vmem:[%s4271_s30 + $0x3e8] sm:$0xff] %v2926_v26  ;;  %2929 = vst [vmem:[%s4271_s30 + $0x3f0] sm:$0xff] %v2928_v29  ;;  %v2932_v45 = vld [vmem:[%s4275_s17 + $0x158] sm:$0xff]  ;;  %v2934_v46 = vld [vmem:[%s4275_s17 + $0x188] sm:$0xff] }
 0x381   : >> { %2931 = vst [vmem:[%s4271_s30 + $0x4b0] sm:$0xff] %v2930_v44  ;;  %2933 = vst [vmem:[%s4271_s30 + $0x4b8] sm:$0xff] %v2932_v45  ;;  %v2936_v47 = vld [vmem:[%s4275_s17 + $0x190] sm:$0xff]  ;;  %v2938_v48 = vld [vmem:[%s4275_s17 + $0x1c0] sm:$0xff] }
 0x382   : >> { %2935 = vst [vmem:[%s4271_s30 + $0x578] sm:$0xff] %v2934_v46  ;;  %v2940_v49 = vld [vmem:[%s4275_s17 + $0x1c8] sm:$0xff]  ;;  %2937 = vst [vmem:[%s4271_s30 + $0x580] sm:$0xff] %v2936_v47  ;;  %v2942_v50 = vld [vmem:[%s4275_s17 + $0x1f8] sm:$0xff] }
 0x383   : >> { %2939 = vst [vmem:[%s4271_s30 + $0x640] sm:$0xff] %v2938_v48  ;;  %2941 = vst [vmem:[%s4271_s30 + $0x648] sm:$0xff] %v2940_v49  ;;  %v2944_v51 = vld [vmem:[%s4275_s17 + $0x200] sm:$0xff]  ;;  %v2946_v52 = vld [vmem:[%s4275_s17 + $0x230] sm:$0xff] }
 0x384   : >> { %2943 = vst [vmem:[%s4271_s30 + $0x708] sm:$0xff] %v2942_v50  ;;  %2945 = vst [vmem:[%s4271_s30 + $0x710] sm:$0xff] %v2944_v51  ;;  %v2948_v53 = vld [vmem:[%s4275_s17 + $0x238] sm:$0xff]  ;;  %v2950_v54 = vld [vmem:[%s4275_s17 + $0x268] sm:$0xff] }
 0x385   : >> { %2947 = vst [vmem:[%s4271_s30 + $0x7d0] sm:$0xff] %v2946_v52  ;;  %v2952_v55 = vld [vmem:[%s4275_s17 + $0x270] sm:$0xff]  ;;  %2949 = vst [vmem:[%s4271_s30 + $0x7d8] sm:$0xff] %v2948_v53  ;;  %v2954_v57 = vld [vmem:[%s4275_s17 + $0x2a0] sm:$0xff] }
 0x386   : >> { %2951 = vst [vmem:[%s4271_s30 + $0x898] sm:$0xff] %v2950_v54  ;;  %2953 = vst [vmem:[%s4271_s30 + $0x8a0] sm:$0xff] %v2952_v55  ;;  %v2956_v58 = vld [vmem:[%s4275_s17 + $0x2a8] sm:$0xff]  ;;  %v2958_v59 = vld [vmem:[%s4275_s17 + $0x2d8] sm:$0xff] }
 0x387   : >> { %2955 = vst [vmem:[%s4271_s30 + $0x960] sm:$0xff] %v2954_v57  ;;  %2957 = vst [vmem:[%s4271_s30 + $0x968] sm:$0xff] %v2956_v58  ;;  %v2960_v60 = vld [vmem:[%s4275_s17 + $0x2e0] sm:$0xff]  ;;  %v2962_v62 = vld [vmem:[%s4275_s17 + $0x310] sm:$0xff] }
 0x388   : >> { %2959 = vst [vmem:[%s4271_s30 + $0xa28] sm:$0xff] %v2958_v59  ;;  %v2964_v63 = vld [vmem:[%s4275_s17 + $0x318] sm:$0xff]  ;;  %2961 = vst [vmem:[%s4271_s30 + $0xa30] sm:$0xff] %v2960_v60  ;;  %v2966_v0 = vld [vmem:[%s4275_s17 + $0x348] sm:$0xff] }
 0x389   : >> { %2963 = vst [vmem:[%s4271_s30 + $0xaf0] sm:$0xff] %v2962_v62  ;;  %2965 = vst [vmem:[%s4271_s30 + $0xaf8] sm:$0xff] %v2964_v63  ;;  %v2968_v2 = vld [vmem:[%s4275_s17 + $0x350] sm:$0xff]  ;;  %v2970_v4 = vld [vmem:[%s4275_s17 + $0x380] sm:$0xff] }
 0x38a   : >> { %2967 = vst [vmem:[%s4271_s30 + $0xbb8] sm:$0xff] %v2966_v0  ;;  %2969 = vst [vmem:[%s4271_s30 + $0xbc0] sm:$0xff] %v2968_v2  ;;  %v2972_v6 = vld [vmem:[%s4275_s17 + $0x388] sm:$0xff]  ;;  %v2974_v7 = vld [vmem:[%s4275_s17 + $0x3b8] sm:$0xff] }
 0x38b   : >> { %2971 = vst [vmem:[%s4271_s30 + $0xc80] sm:$0xff] %v2970_v4  ;;  %v2976_v8 = vld [vmem:[%s4275_s17 + $0x3c0] sm:$0xff]  ;;  %2973 = vst [vmem:[%s4271_s30 + $0xc88] sm:$0xff] %v2972_v6  ;;  %v2978_v9 = vld [vmem:[%s4275_s17 + $0x3f0] sm:$0xff] }
 0x38c   : >> { %2975 = vst [vmem:[%s4271_s30 + $0xd48] sm:$0xff] %v2974_v7  ;;  %2977 = vst [vmem:[%s4271_s30 + $0xd50] sm:$0xff] %v2976_v8  ;;  %v2980_v10 = vld [vmem:[%s4275_s17 + $0x3f8] sm:$0xff]  ;;  %v2982_v11 = vld [vmem:[%s4275_s17 + $0x428] sm:$0xff] }
 0x38d   : >> { %2979 = vst [vmem:[%s4271_s30 + $0xe10] sm:$0xff] %v2978_v9  ;;  %2981 = vst [vmem:[%s4271_s30 + $0xe18] sm:$0xff] %v2980_v10  ;;  %v2984_v12 = vld [vmem:[%s4275_s17 + $0x430] sm:$0xff]  ;;  %v2986_v13 = vld [vmem:[%s4275_s17 + $0x460] sm:$0xff] }
 0x38e   : >> { %2983 = vst [vmem:[%s4271_s30 + $0xed8] sm:$0xff] %v2982_v11  ;;  %v2988_v14 = vld [vmem:[%s4275_s17 + $0x468] sm:$0xff]  ;;  %2985 = vst [vmem:[%s4271_s30 + $0xee0] sm:$0xff] %v2984_v12  ;;  %v2990_v15 = vld [vmem:[%s4275_s17 + $0x498] sm:$0xff] }
 0x38f   : >> { %2987 = vst [vmem:[%s4271_s30 + $0xfa0] sm:$0xff] %v2986_v13  ;;  %2989 = vst [vmem:[%s4271_s30 + $0xfa8] sm:$0xff] %v2988_v14  ;;  %v2992_v16 = vld [vmem:[%s4275_s17 + $0x4a0] sm:$0xff]  ;;  %v2994_v17 = vld [vmem:[%s4275_s17 + $0x4d0] sm:$0xff] }
 0x390   : >> { %2991 = vst [vmem:[%s4271_s30 + $0x1068] sm:$0xff] %v2990_v15  ;;  %2993 = vst [vmem:[%s4271_s30 + $0x1070] sm:$0xff] %v2992_v16  ;;  %v2996_v19 = vld [vmem:[%s4275_s17 + $0x4d8] sm:$0xff]  ;;  %v2998_v21 = vld [vmem:[%s4275_s17 + $0x508] sm:$0xff] }
 0x391   : >> { %2995 = vst [vmem:[%s4271_s30 + $0x1130] sm:$0xff] %v2994_v17  ;;  %v3000_v22 = vld [vmem:[%s4275_s17 + $0x510] sm:$0xff]  ;;  %2997 = vst [vmem:[%s4271_s30 + $0x1138] sm:$0xff] %v2996_v19  ;;  %v3002_v23 = vld [vmem:[%s4275_s17 + $0x540] sm:$0xff] }
 0x392   : >> { %2999 = vst [vmem:[%s4271_s30 + $0x11f8] sm:$0xff] %v2998_v21  ;;  %3001 = vst [vmem:[%s4271_s30 + $0x1200] sm:$0xff] %v3000_v22  ;;  %v3004_v24 = vld [vmem:[%s4275_s17 + $0x548] sm:$0xff]  ;;  %v3006_v25 = vld [vmem:[%s4275_s17 + $0x578] sm:$0xff] }
 0x393   : >> { %3003 = vst [vmem:[%s4271_s30 + $0x12c0] sm:$0xff] %v3002_v23  ;;  %3005 = vst [vmem:[%s4271_s30 + $0x12c8] sm:$0xff] %v3004_v24  ;;  %v3008_v27 = vld [vmem:[%s4275_s17 + $0x580] sm:$0xff]  ;;  %v3010_v28 = vld [vmem:[%s4275_s17 + $0x5b0] sm:$0xff] }
 0x394   : >> { %3007 = vst [vmem:[%s4271_s30 + $0x1388] sm:$0xff] %v3006_v25  ;;  %v3012_v30 = vld [vmem:[%s4275_s17 + $0x5b8] sm:$0xff]  ;;  %3009 = vst [vmem:[%s4271_s30 + $0x1390] sm:$0xff] %v3008_v27  ;;  %v3014_v31 = vld [vmem:[%s4275_s17 + $0x5e8] sm:$0xff]  ;;  %2902 = sbr.rel (!%p2899_p13) target bundleno = 890 (0x37a), region = 297 }
 0x395   : >> { %3011 = vst [vmem:[%s4271_s30 + $0x1450] sm:$0xff] %v3010_v28  ;;  %3013 = vst [vmem:[%s4271_s30 + $0x1458] sm:$0xff] %v3012_v30  ;;  %v3016_v32 = vld [vmem:[%s4275_s17 + $0x5f0] sm:$0xff]  ;;  %v3018_v33 = vld [vmem:[%s4275_s17 + $0x620] sm:$0xff] }
 0x396   : >> { %3015 = vst [vmem:[%s4271_s30 + $0x1518] sm:$0xff] %v3014_v31  ;;  %3017 = vst [vmem:[%s4271_s30 + $0x1520] sm:$0xff] %v3016_v32  ;;  %v3020_v34 = vld [vmem:[%s4275_s17 + $0x628] sm:$0xff]  ;;  %v3022_v35 = vld [vmem:[%s4275_s17 + $0x658] sm:$0xff] }
 0x397   : >> { %3019 = vst [vmem:[%s4271_s30 + $0x15e0] sm:$0xff] %v3018_v33  ;;  %v3024_v39 = vld [vmem:[%s4275_s17 + $0x660] sm:$0xff]  ;;  %3021 = vst [vmem:[%s4271_s30 + $0x15e8] sm:$0xff] %v3020_v34  ;;  %v3026_v40 = vld [vmem:[%s4275_s17 + $0x690] sm:$0xff] }
 0x398   : >> { %3023 = vst [vmem:[%s4271_s30 + $0x16a8] sm:$0xff] %v3022_v35  ;;  %3025 = vst [vmem:[%s4271_s30 + $0x16b0] sm:$0xff] %v3024_v39  ;;  %v3028_v41 = vld [vmem:[%s4275_s17 + $0x698] sm:$0xff]  ;;  %v3030_v42 = vld [vmem:[%s4275_s17 + $0x6c8] sm:$0xff] }
 0x399   : >> { %3027 = vst [vmem:[%s4271_s30 + $0x1770] sm:$0xff] %v3026_v40  ;;  %3029 = vst [vmem:[%s4271_s30 + $0x1778] sm:$0xff] %v3028_v41  ;;  %v3032_v43 = vld [vmem:[%s4275_s17 + $0x6d0] sm:$0xff]  ;;  %s6910_s17 = smov %s6372_s26 }
 0x39a   : >> { %3031 = vst [vmem:[%s4271_s30 + $0x1838] sm:$0xff] %v3030_v42  ;;  %3033 = vst [vmem:[%s4271_s30 + $0x1840] sm:$0xff] %v3032_v43  ;;  %s6909_s30 = smov %s6375_s20 }
 0x39b PF: > { %s6481_s24 = sand.u32 1, %s2893_s29   ;;  %s3538_s8 = sshll.u32 %s6305_s9, 8 }
 0x39c   : > { %s3045_s11 = sshra.s32 %s3538_s8, 4  ;;  %p3524_p0 = scmp.le.s32.totalorder %s6481_s24, 0 }
 0x39d   : > { %s6485_s27 = scalar_lea.vmem %s5738_s22, %s3045_s11 [#allocation3]   ;;  %s6488_s15 = scalar_lea.vmem %s5989_s6, %s3045_s11  }
 0x39e   : > { %3403 = sbr.rel (%p3524_p0) target bundleno = 950 (0x3b6), region = 302  ;;  %s6912_s3 = smov (!%p3524_p0), %s6488_s15 }
 0x39f   : > { %s6913_s21 = smov (!%p3524_p0), %s6485_s27  ;;  %s6497_s30 = smov (!%p3524_p0), 0  }
 0x3a0   : > { %s6499_s17 = smov (!%p3524_p0), 0  }
 0x3a5 LB: >> { %v3061_v20 = vld [vmem:[%s4291_s21] sm:$0xff]  ;;  %v3063_v38 = vld [vmem:[%s4291_s21 + $0x38] sm:$0xff]  ;;  %v3065_v61 = vld [vmem:[%s4291_s21 + $0x70] sm:$0xff]  ;;  %s3125_s29 = sadd.s32 1, %s4295_s30  ;;  %s3055_s17 = sadd.s32 1, %s4299_s17   ;;  %s4299_s17 = sphi %s6499_s17, %s3055_s17   ;;  %s4295_s30 = sphi %s6497_s30, %s6916_s30   ;;  %s4291_s21 = sphi %s6913_s21, %s6915_s21   ;;  %s4287_s3 = sphi %s6912_s3, %s6914_s3  }
 0x3a6   : >> { %3062 = vst [vmem:[%s4287_s3] sm:$0xff] %v3061_v20  ;;  %3064 = vst [vmem:[%s4287_s3 + $0xc8] sm:$0xff] %v3063_v38  ;;  %v3067_v3 = vld [vmem:[%s4291_s21 + $0xa8] sm:$0xff]  ;;  %v3069_v37 = vld [vmem:[%s4291_s21 + $0xe0] sm:$0xff]  ;;  %p3126_p1 = scmp.ge.s32.totalorder %s3125_s29, %s6481_s24  ;;  %p3054_p2 = scmp.ge.s32.totalorder %s3055_s17, %s6481_s24 }
 0x3a7   : >> { %3066 = vst [vmem:[%s4287_s3 + $0x190] sm:$0xff] %v3065_v61  ;;  %v3071_v56 = vld [vmem:[%s4291_s21 + $0x118] sm:$0xff]  ;;  %3068 = vst [vmem:[%s4287_s3 + $0x258] sm:$0xff] %v3067_v3  ;;  %v3073_v18 = vld [vmem:[%s4291_s21 + $0x150] sm:$0xff] }
 0x3a8   : >> { %3070 = vst [vmem:[%s4287_s3 + $0x320] sm:$0xff] %v3069_v37  ;;  %3072 = vst [vmem:[%s4287_s3 + $0x3e8] sm:$0xff] %v3071_v56  ;;  %v3075_v36 = vld [vmem:[%s4291_s21 + $0x188] sm:$0xff]  ;;  %v3077_v1 = vld [vmem:[%s4291_s21 + $0x1c0] sm:$0xff]  ;;  %s6942_s29 = smov (%p3126_p1, %s3125_s29), 0 }
 0x3a9   : >> { %3074 = vst [vmem:[%s4287_s3 + $0x4b0] sm:$0xff] %v3073_v18  ;;  %3076 = vst [vmem:[%s4287_s3 + $0x578] sm:$0xff] %v3075_v36  ;;  %v3079_v5 = vld [vmem:[%s4291_s21 + $0x1f8] sm:$0xff]  ;;  %v3081_v26 = vld [vmem:[%s4291_s21 + $0x230] sm:$0xff]  ;;  %s3525_s9 = sshll.u32 %s6942_s29, 3  ;;  %s6916_s30 = smov %s6942_s29 }
 0x3aa   : >> { %3078 = vst [vmem:[%s4287_s3 + $0x640] sm:$0xff] %v3077_v1  ;;  %v3083_v29 = vld [vmem:[%s4291_s21 + $0x268] sm:$0xff]  ;;  %3080 = vst [vmem:[%s4287_s3 + $0x708] sm:$0xff] %v3079_v5  ;;  %v3085_v44 = vld [vmem:[%s4291_s21 + $0x2a0] sm:$0xff]  ;;  %s6555_s7 = scalar_lea.vmem %s6485_s27, %s3525_s9 [#allocation3]   ;;  %s3131_s28 = scalar_lea.vmem %s6488_s15, %s3525_s9  }
 0x3ab   : >> { %3082 = vst [vmem:[%s4287_s3 + $0x7d0] sm:$0xff] %v3081_v26  ;;  %3084 = vst [vmem:[%s4287_s3 + $0x898] sm:$0xff] %v3083_v29  ;;  %v3087_v45 = vld [vmem:[%s4291_s21 + $0x2d8] sm:$0xff]  ;;  %v3089_v46 = vld [vmem:[%s4291_s21 + $0x310] sm:$0xff] }
 0x3ac   : >> { %3086 = vst [vmem:[%s4287_s3 + $0x960] sm:$0xff] %v3085_v44  ;;  %3088 = vst [vmem:[%s4287_s3 + $0xa28] sm:$0xff] %v3087_v45  ;;  %v3091_v47 = vld [vmem:[%s4291_s21 + $0x348] sm:$0xff]  ;;  %v3093_v48 = vld [vmem:[%s4291_s21 + $0x380] sm:$0xff] }
 0x3ad   : >> { %3090 = vst [vmem:[%s4287_s3 + $0xaf0] sm:$0xff] %v3089_v46  ;;  %v3095_v49 = vld [vmem:[%s4291_s21 + $0x3b8] sm:$0xff]  ;;  %3092 = vst [vmem:[%s4287_s3 + $0xbb8] sm:$0xff] %v3091_v47  ;;  %v3097_v50 = vld [vmem:[%s4291_s21 + $0x3f0] sm:$0xff] }
 0x3ae   : >> { %3094 = vst [vmem:[%s4287_s3 + $0xc80] sm:$0xff] %v3093_v48  ;;  %3096 = vst [vmem:[%s4287_s3 + $0xd48] sm:$0xff] %v3095_v49  ;;  %v3099_v51 = vld [vmem:[%s4291_s21 + $0x428] sm:$0xff]  ;;  %v3101_v52 = vld [vmem:[%s4291_s21 + $0x460] sm:$0xff] }
 0x3af   : >> { %3098 = vst [vmem:[%s4287_s3 + $0xe10] sm:$0xff] %v3097_v50  ;;  %3100 = vst [vmem:[%s4287_s3 + $0xed8] sm:$0xff] %v3099_v51  ;;  %v3103_v53 = vld [vmem:[%s4291_s21 + $0x498] sm:$0xff]  ;;  %v3105_v54 = vld [vmem:[%s4291_s21 + $0x4d0] sm:$0xff]  ;;  %3057 = sbr.rel (!%p3054_p2) target bundleno = 933 (0x3a5), region = 308 }
 0x3b0   : >> { %3102 = vst [vmem:[%s4287_s3 + $0xfa0] sm:$0xff] %v3101_v52  ;;  %v3107_v55 = vld [vmem:[%s4291_s21 + $0x508] sm:$0xff]  ;;  %3104 = vst [vmem:[%s4287_s3 + $0x1068] sm:$0xff] %v3103_v53  ;;  %v3109_v57 = vld [vmem:[%s4291_s21 + $0x540] sm:$0xff] }
 0x3b1   : >> { %3106 = vst [vmem:[%s4287_s3 + $0x1130] sm:$0xff] %v3105_v54  ;;  %3108 = vst [vmem:[%s4287_s3 + $0x11f8] sm:$0xff] %v3107_v55  ;;  %v3111_v58 = vld [vmem:[%s4291_s21 + $0x578] sm:$0xff]  ;;  %v3113_v59 = vld [vmem:[%s4291_s21 + $0x5b0] sm:$0xff] }
 0x3b2   : >> { %3110 = vst [vmem:[%s4287_s3 + $0x12c0] sm:$0xff] %v3109_v57  ;;  %3112 = vst [vmem:[%s4287_s3 + $0x1388] sm:$0xff] %v3111_v58  ;;  %v3115_v60 = vld [vmem:[%s4291_s21 + $0x5e8] sm:$0xff]  ;;  %v3117_v62 = vld [vmem:[%s4291_s21 + $0x620] sm:$0xff] }
 0x3b3   : >> { %3114 = vst [vmem:[%s4287_s3 + $0x1450] sm:$0xff] %v3113_v59  ;;  %v3119_v63 = vld [vmem:[%s4291_s21 + $0x658] sm:$0xff]  ;;  %3116 = vst [vmem:[%s4287_s3 + $0x1518] sm:$0xff] %v3115_v60  ;;  %v3121_v0 = vld [vmem:[%s4291_s21 + $0x690] sm:$0xff] }
 0x3b4   : >> { %3118 = vst [vmem:[%s4287_s3 + $0x15e0] sm:$0xff] %v3117_v62  ;;  %3120 = vst [vmem:[%s4287_s3 + $0x16a8] sm:$0xff] %v3119_v63  ;;  %v3123_v2 = vld [vmem:[%s4291_s21 + $0x6c8] sm:$0xff]  ;;  %s6915_s21 = smov %s6555_s7 }
 0x3b5   : >> { %3122 = vst [vmem:[%s4287_s3 + $0x1770] sm:$0xff] %v3121_v0  ;;  %3124 = vst [vmem:[%s4287_s3 + $0x1838] sm:$0xff] %v3123_v2  ;;  %s6914_s3 = smov %s3131_s28 }
 0x3b6 PF: > { %s4303_s16 = smov 0  }
 0x3b7   : > { %s6596_s25 = sshllo.u32 %s4303_s16, %s5995_s18 }
 0x3b8   : > { %v3141_v4 = vld [vmem:[%s6298_s23] sm:%s6596_s25]  ;;  %v3143_v6 = vld [vmem:[%s6298_s23 + $0x38] sm:%s6596_s25] }
 0x3b9   : > { %3142 = vst [vmem:[%s6301_s5] sm:%s6596_s25] %v3141_v4  ;;  %3144 = vst [vmem:[%s6301_s5 + $0xc8] sm:%s6596_s25] %v3143_v6 }
 0x3ba   : > { %v3145_v7 = vld [vmem:[%s6298_s23 + $0x70] sm:%s6596_s25]  ;;  %v3147_v8 = vld [vmem:[%s6298_s23 + $0xa8] sm:%s6596_s25] }
 0x3bb   : > { %3146 = vst [vmem:[%s6301_s5 + $0x190] sm:%s6596_s25] %v3145_v7  ;;  %3148 = vst [vmem:[%s6301_s5 + $0x258] sm:%s6596_s25] %v3147_v8 }
 0x3bc   : > { %v3149_v9 = vld [vmem:[%s6298_s23 + $0xe0] sm:%s6596_s25]  ;;  %v3151_v10 = vld [vmem:[%s6298_s23 + $0x118] sm:%s6596_s25] }
 0x3bd   : > { %3150 = vst [vmem:[%s6301_s5 + $0x320] sm:%s6596_s25] %v3149_v9  ;;  %3152 = vst [vmem:[%s6301_s5 + $0x3e8] sm:%s6596_s25] %v3151_v10 }
 0x3be   : > { %v3153_v11 = vld [vmem:[%s6298_s23 + $0x150] sm:%s6596_s25]  ;;  %v3155_v12 = vld [vmem:[%s6298_s23 + $0x188] sm:%s6596_s25] }
 0x3bf   : > { %3154 = vst [vmem:[%s6301_s5 + $0x4b0] sm:%s6596_s25] %v3153_v11  ;;  %3156 = vst [vmem:[%s6301_s5 + $0x578] sm:%s6596_s25] %v3155_v12 }
 0x3c0   : > { %v3157_v13 = vld [vmem:[%s6298_s23 + $0x1c0] sm:%s6596_s25]  ;;  %v3159_v14 = vld [vmem:[%s6298_s23 + $0x1f8] sm:%s6596_s25] }
 0x3c1   : > { %3158 = vst [vmem:[%s6301_s5 + $0x640] sm:%s6596_s25] %v3157_v13  ;;  %3160 = vst [vmem:[%s6301_s5 + $0x708] sm:%s6596_s25] %v3159_v14 }
 0x3c2   : > { %v3161_v15 = vld [vmem:[%s6298_s23 + $0x230] sm:%s6596_s25]  ;;  %v3163_v16 = vld [vmem:[%s6298_s23 + $0x268] sm:%s6596_s25] }
 0x3c3   : > { %3162 = vst [vmem:[%s6301_s5 + $0x7d0] sm:%s6596_s25] %v3161_v15  ;;  %3164 = vst [vmem:[%s6301_s5 + $0x898] sm:%s6596_s25] %v3163_v16 }
 0x3c4   : > { %v3165_v17 = vld [vmem:[%s6298_s23 + $0x2a0] sm:%s6596_s25]  ;;  %v3167_v19 = vld [vmem:[%s6298_s23 + $0x2d8] sm:%s6596_s25] }
 0x3c5   : > { %3166 = vst [vmem:[%s6301_s5 + $0x960] sm:%s6596_s25] %v3165_v17  ;;  %3168 = vst [vmem:[%s6301_s5 + $0xa28] sm:%s6596_s25] %v3167_v19 }
 0x3c6   : > { %v3169_v21 = vld [vmem:[%s6298_s23 + $0x310] sm:%s6596_s25]  ;;  %v3171_v22 = vld [vmem:[%s6298_s23 + $0x348] sm:%s6596_s25] }
 0x3c7   : > { %3170 = vst [vmem:[%s6301_s5 + $0xaf0] sm:%s6596_s25] %v3169_v21  ;;  %3172 = vst [vmem:[%s6301_s5 + $0xbb8] sm:%s6596_s25] %v3171_v22 }
 0x3c8   : > { %v3173_v23 = vld [vmem:[%s6298_s23 + $0x380] sm:%s6596_s25]  ;;  %v3175_v24 = vld [vmem:[%s6298_s23 + $0x3b8] sm:%s6596_s25] }
 0x3c9   : > { %3174 = vst [vmem:[%s6301_s5 + $0xc80] sm:%s6596_s25] %v3173_v23  ;;  %3176 = vst [vmem:[%s6301_s5 + $0xd48] sm:%s6596_s25] %v3175_v24 }
 0x3ca   : > { %v3177_v25 = vld [vmem:[%s6298_s23 + $0x3f0] sm:%s6596_s25]  ;;  %v3179_v27 = vld [vmem:[%s6298_s23 + $0x428] sm:%s6596_s25] }
 0x3cb   : > { %3178 = vst [vmem:[%s6301_s5 + $0xe10] sm:%s6596_s25] %v3177_v25  ;;  %3180 = vst [vmem:[%s6301_s5 + $0xed8] sm:%s6596_s25] %v3179_v27 }
 0x3cc   : > { %v3181_v28 = vld [vmem:[%s6298_s23 + $0x460] sm:%s6596_s25]  ;;  %v3183_v30 = vld [vmem:[%s6298_s23 + $0x498] sm:%s6596_s25] }
 0x3cd   : > { %3182 = vst [vmem:[%s6301_s5 + $0xfa0] sm:%s6596_s25] %v3181_v28  ;;  %3184 = vst [vmem:[%s6301_s5 + $0x1068] sm:%s6596_s25] %v3183_v30 }
 0x3ce   : > { %v3185_v31 = vld [vmem:[%s6298_s23 + $0x4d0] sm:%s6596_s25]  ;;  %v3187_v32 = vld [vmem:[%s6298_s23 + $0x508] sm:%s6596_s25] }
 0x3cf   : > { %3186 = vst [vmem:[%s6301_s5 + $0x1130] sm:%s6596_s25] %v3185_v31  ;;  %3188 = vst [vmem:[%s6301_s5 + $0x11f8] sm:%s6596_s25] %v3187_v32 }
 0x3d0   : > { %v3189_v33 = vld [vmem:[%s6298_s23 + $0x540] sm:%s6596_s25]  ;;  %v3191_v34 = vld [vmem:[%s6298_s23 + $0x578] sm:%s6596_s25] }
 0x3d1   : > { %3190 = vst [vmem:[%s6301_s5 + $0x12c0] sm:%s6596_s25] %v3189_v33  ;;  %3192 = vst [vmem:[%s6301_s5 + $0x1388] sm:%s6596_s25] %v3191_v34 }
 0x3d2   : > { %v3193_v35 = vld [vmem:[%s6298_s23 + $0x5b0] sm:%s6596_s25]  ;;  %v3195_v39 = vld [vmem:[%s6298_s23 + $0x5e8] sm:%s6596_s25] }
 0x3d3   : > { %3194 = vst [vmem:[%s6301_s5 + $0x1450] sm:%s6596_s25] %v3193_v35  ;;  %3196 = vst [vmem:[%s6301_s5 + $0x1518] sm:%s6596_s25] %v3195_v39 }
 0x3d4   : > { %v3197_v40 = vld [vmem:[%s6298_s23 + $0x620] sm:%s6596_s25]  ;;  %v3199_v41 = vld [vmem:[%s6298_s23 + $0x658] sm:%s6596_s25] }
 0x3d5   : > { %3198 = vst [vmem:[%s6301_s5 + $0x15e0] sm:%s6596_s25] %v3197_v40  ;;  %3200 = vst [vmem:[%s6301_s5 + $0x16a8] sm:%s6596_s25] %v3199_v41 }
 0x3d6   : > { %v3201_v42 = vld [vmem:[%s6298_s23 + $0x690] sm:%s6596_s25]  ;;  %v3203_v43 = vld [vmem:[%s6298_s23 + $0x6c8] sm:%s6596_s25] }
 0x3d7   : > { %3202 = vst [vmem:[%s6301_s5 + $0x1770] sm:%s6596_s25] %v3201_v42  ;;  %3204 = vst [vmem:[%s6301_s5 + $0x1838] sm:%s6596_s25] %v3203_v43 }
 0x3d8 PF: > { %p3527_p6 = scmp.ge.u32.totalorder %s5991_s4, 8 }
 0x3d9   : > { %s4304_s18 = smov (!%p3527_p6), 0  }
 0x3da   : > { %2567 = sbr.rel (%p3527_p6) target bundleno = 1019 (0x3fb), region = 110  ;;  %s6728_s23 = sshllo.u32 (!%p3527_p6), %s4304_s18, %s5991_s4 }
 0x3db   : > { %v2577_v20 = vld [vmem:[%s5738_s22] sm:%s6728_s23] (!%p3527_p6)  ;;  %v2579_v38 = vld [vmem:[%s5738_s22 + $0x38] sm:%s6728_s23] (!%p3527_p6) }
 0x3dc   : > { %2578 = vst [vmem:[%s5989_s6] sm:%s6728_s23] (!%p3527_p6), %v2577_v20  ;;  %2580 = vst [vmem:[%s5989_s6 + $0xc8] sm:%s6728_s23] (!%p3527_p6), %v2579_v38 }
 0x3dd   : > { %v2581_v61 = vld [vmem:[%s5738_s22 + $0x70] sm:%s6728_s23] (!%p3527_p6)  ;;  %v2583_v3 = vld [vmem:[%s5738_s22 + $0xa8] sm:%s6728_s23] (!%p3527_p6) }
 0x3de   : > { %2582 = vst [vmem:[%s5989_s6 + $0x190] sm:%s6728_s23] (!%p3527_p6), %v2581_v61  ;;  %2584 = vst [vmem:[%s5989_s6 + $0x258] sm:%s6728_s23] (!%p3527_p6), %v2583_v3 }
 0x3df   : > { %v2585_v37 = vld [vmem:[%s5738_s22 + $0xe0] sm:%s6728_s23] (!%p3527_p6)  ;;  %v2587_v56 = vld [vmem:[%s5738_s22 + $0x118] sm:%s6728_s23] (!%p3527_p6) }
 0x3e0   : > { %2586 = vst [vmem:[%s5989_s6 + $0x320] sm:%s6728_s23] (!%p3527_p6), %v2585_v37  ;;  %2588 = vst [vmem:[%s5989_s6 + $0x3e8] sm:%s6728_s23] (!%p3527_p6), %v2587_v56 }
 0x3e1   : > { %v2589_v18 = vld [vmem:[%s5738_s22 + $0x150] sm:%s6728_s23]  ;;  %v2591_v36 = vld [vmem:[%s5738_s22 + $0x188] sm:%s6728_s23] }
 0x3e2   : > { %2590 = vst [vmem:[%s5989_s6 + $0x4b0] sm:%s6728_s23] %v2589_v18  ;;  %2592 = vst [vmem:[%s5989_s6 + $0x578] sm:%s6728_s23] %v2591_v36 }
 0x3e3   : > { %v2593_v1 = vld [vmem:[%s5738_s22 + $0x1c0] sm:%s6728_s23]  ;;  %v2595_v5 = vld [vmem:[%s5738_s22 + $0x1f8] sm:%s6728_s23] }
 0x3e4   : > { %2594 = vst [vmem:[%s5989_s6 + $0x640] sm:%s6728_s23] %v2593_v1  ;;  %2596 = vst [vmem:[%s5989_s6 + $0x708] sm:%s6728_s23] %v2595_v5 }
 0x3e5   : > { %v2597_v26 = vld [vmem:[%s5738_s22 + $0x230] sm:%s6728_s23]  ;;  %v2599_v29 = vld [vmem:[%s5738_s22 + $0x268] sm:%s6728_s23] }
 0x3e6   : > { %2598 = vst [vmem:[%s5989_s6 + $0x7d0] sm:%s6728_s23] %v2597_v26  ;;  %2600 = vst [vmem:[%s5989_s6 + $0x898] sm:%s6728_s23] %v2599_v29 }
 0x3e7   : > { %v2601_v44 = vld [vmem:[%s5738_s22 + $0x2a0] sm:%s6728_s23]  ;;  %v2603_v45 = vld [vmem:[%s5738_s22 + $0x2d8] sm:%s6728_s23] }
 0x3e8   : > { %2602 = vst [vmem:[%s5989_s6 + $0x960] sm:%s6728_s23] %v2601_v44  ;;  %2604 = vst [vmem:[%s5989_s6 + $0xa28] sm:%s6728_s23] %v2603_v45 }
 0x3e9   : > { %v2605_v46 = vld [vmem:[%s5738_s22 + $0x310] sm:%s6728_s23]  ;;  %v2607_v47 = vld [vmem:[%s5738_s22 + $0x348] sm:%s6728_s23] }
 0x3ea   : > { %2606 = vst [vmem:[%s5989_s6 + $0xaf0] sm:%s6728_s23] %v2605_v46  ;;  %2608 = vst [vmem:[%s5989_s6 + $0xbb8] sm:%s6728_s23] %v2607_v47 }
 0x3eb   : > { %v2609_v48 = vld [vmem:[%s5738_s22 + $0x380] sm:%s6728_s23]  ;;  %v2611_v49 = vld [vmem:[%s5738_s22 + $0x3b8] sm:%s6728_s23] }
 0x3ec   : > { %2610 = vst [vmem:[%s5989_s6 + $0xc80] sm:%s6728_s23] %v2609_v48  ;;  %2612 = vst [vmem:[%s5989_s6 + $0xd48] sm:%s6728_s23] %v2611_v49 }
 0x3ed   : > { %v2613_v50 = vld [vmem:[%s5738_s22 + $0x3f0] sm:%s6728_s23]  ;;  %v2615_v51 = vld [vmem:[%s5738_s22 + $0x428] sm:%s6728_s23] }
 0x3ee   : > { %2614 = vst [vmem:[%s5989_s6 + $0xe10] sm:%s6728_s23] %v2613_v50  ;;  %2616 = vst [vmem:[%s5989_s6 + $0xed8] sm:%s6728_s23] %v2615_v51 }
 0x3ef   : > { %v2617_v52 = vld [vmem:[%s5738_s22 + $0x460] sm:%s6728_s23]  ;;  %v2619_v53 = vld [vmem:[%s5738_s22 + $0x498] sm:%s6728_s23] }
 0x3f0   : > { %2618 = vst [vmem:[%s5989_s6 + $0xfa0] sm:%s6728_s23] %v2617_v52  ;;  %2620 = vst [vmem:[%s5989_s6 + $0x1068] sm:%s6728_s23] %v2619_v53 }
 0x3f1   : > { %v2621_v54 = vld [vmem:[%s5738_s22 + $0x4d0] sm:%s6728_s23]  ;;  %v2623_v55 = vld [vmem:[%s5738_s22 + $0x508] sm:%s6728_s23] }
 0x3f2   : > { %2622 = vst [vmem:[%s5989_s6 + $0x1130] sm:%s6728_s23] %v2621_v54  ;;  %2624 = vst [vmem:[%s5989_s6 + $0x11f8] sm:%s6728_s23] %v2623_v55 }
 0x3f3   : > { %v2625_v57 = vld [vmem:[%s5738_s22 + $0x540] sm:%s6728_s23]  ;;  %v2627_v58 = vld [vmem:[%s5738_s22 + $0x578] sm:%s6728_s23] }
 0x3f4   : > { %2626 = vst [vmem:[%s5989_s6 + $0x12c0] sm:%s6728_s23] %v2625_v57  ;;  %2628 = vst [vmem:[%s5989_s6 + $0x1388] sm:%s6728_s23] %v2627_v58 }
 0x3f5   : > { %v2629_v59 = vld [vmem:[%s5738_s22 + $0x5b0] sm:%s6728_s23]  ;;  %v2631_v60 = vld [vmem:[%s5738_s22 + $0x5e8] sm:%s6728_s23] }
 0x3f6   : > { %2630 = vst [vmem:[%s5989_s6 + $0x1450] sm:%s6728_s23] %v2629_v59  ;;  %2632 = vst [vmem:[%s5989_s6 + $0x1518] sm:%s6728_s23] %v2631_v60 }
 0x3f7   : > { %v2633_v62 = vld [vmem:[%s5738_s22 + $0x620] sm:%s6728_s23]  ;;  %v2635_v63 = vld [vmem:[%s5738_s22 + $0x658] sm:%s6728_s23] }
 0x3f8   : > { %2634 = vst [vmem:[%s5989_s6 + $0x15e0] sm:%s6728_s23] %v2633_v62  ;;  %2636 = vst [vmem:[%s5989_s6 + $0x16a8] sm:%s6728_s23] %v2635_v63 }
 0x3f9   : > { %v2637_v0 = vld [vmem:[%s5738_s22 + $0x690] sm:%s6728_s23]  ;;  %v2639_v2 = vld [vmem:[%s5738_s22 + $0x6c8] sm:%s6728_s23] }
 0x3fa   : > { %2638 = vst [vmem:[%s5989_s6 + $0x1770] sm:%s6728_s23] %v2637_v0  ;;  %2640 = vst [vmem:[%s5989_s6 + $0x1838] sm:%s6728_s23] %v2639_v2 }
 0x3fb PF: > { %s12_s13 = sadd.s32 1, %s4171_s13   ;;  %s6917_s9 = smov %s4159_s10 }
 0x3fc   : > { %p9_p3 = scmp.ge.s32.totalorder %s12_s13, 6   ;;  %s6918_s10 = smov %s4360_s19 }
 0x3fd   : > { %s6919_s11 = smov %s4167_s12  ;;  %s6920_s12 = smov %s6922_s14 }
 0x3fe   :  { %11 = sbr.rel (!%p9_p3) target bundleno = 3 (0x3), region = 319 }

</bundles_post_ra>
